<compile_context>
chip_gen: v6e
topology: v6e:2x2x1
jax: 0.10.0
libtpu: 0.0.40
codegen_flags: <defaults>
</compile_context>

<pallas_src>
import functools

import jax
import jax.numpy as jnp
from jax import lax
from jax.experimental import pallas as pl
from jax.experimental.pallas import tpu as pltpu


def double_conv_kernel(x_ref, w1_ref, s1_ref, b1_ref, w2_ref, s2_ref, b2_ref,
                       o_ref, mid_ref, *, H, W, Wp):
    # x_ref  : (Nb, Cin)   f32  padded input, flattened rows (Nb = (H+3)*Wp)
    # w1_ref : (9, Cin, Cmid)  bf16  (tap index ky*3+kx on axis 0)
    # w2_ref : (9, Cmid, Cout) bf16
    # s*/b*  : (1, C)      f32  folded BN scale / shift (conv bias included)
    # o_ref  : (Nc, Cout)  f32  padded-width output slab (Nc = H*Wp)
    # mid_ref: (Nb, Cmid)  f32  scratch, same flat padded layout as x
    Nc = H * Wp
    Nb = mid_ref.shape[0]
    Cmid = mid_ref.shape[1]
    Cout = o_ref.shape[1]

    def conv3x3(src_ref, w_ref, n_out):
        # Implicit GEMM: 9 contiguous row slices of the flat padded buffer,
        # cast to bf16 at the MXU, accumulated in f32.
        acc = jnp.zeros((Nc, n_out), jnp.float32)
        for ky in range(3):
            for kx in range(3):
                off = ky * Wp + kx
                acc = acc + jnp.dot(
                    src_ref[off:off + Nc, :].astype(jnp.bfloat16),
                    w_ref[ky * 3 + kx],
                    preferred_element_type=jnp.float32)
        return acc

    # ---- conv1 + BN1 + ReLU ----
    h1 = jnp.maximum(conv3x3(x_ref, w1_ref, Cmid) * s1_ref[...] + b1_ref[...],
                     0.0)

    # Columns j in {W, W+1} of every row are garbage (padded-width trick);
    # zero them so they land as zeros on mid's border columns.
    col = lax.broadcasted_iota(jnp.int32, (Nc, 1), 0) % Wp
    h1 = jnp.where(col < W, h1, 0.0)

    # Re-zero only the border rows of the scratch (interior is fully
    # overwritten every step), then store h1 at flat offset Wp+1 == (1, 1).
    mid_ref[0:Wp + 1, :] = jnp.zeros((Wp + 1, Cmid), mid_ref.dtype)
    mid_ref[Wp + 1 + Nc:, :] = jnp.zeros((Nb - Wp - 1 - Nc, Cmid),
                                         mid_ref.dtype)
    mid_ref[Wp + 1:Wp + 1 + Nc, :] = h1.astype(mid_ref.dtype)

    # ---- conv2 + BN2 + ReLU ----
    h2 = jnp.maximum(conv3x3(mid_ref, w2_ref, Cout) * s2_ref[...] + b2_ref[...],
                     0.0)
    o_ref[...] = h2.astype(o_ref.dtype)


def double_conv_pallas(x_nchw, w1, b1, bn1, w2, b2, bn2, *, eps=1e-5):
    """x_nchw: (B, Cin, H, W). w*: (3,3,Cin,Cout) HWIO. bn*: (gamma, beta, mean, var)."""
    B, Cin, H, W = x_nchw.shape
    Cmid = w1.shape[-1]
    Cout = w2.shape[-1]
    Wp = W + 2
    Nc = H * Wp          # padded-width rows carrying the valid outputs
    Nb = (H + 3) * Wp    # flat buffer rows (1 top + 2 bottom pad rows)

    # NCHW -> NHWC, zero-pad (top 1, bottom 2, left 1, right 1), flatten rows.
    # TODO(synk): fuse this pad and the final crop/transpose into the kernel's
    #             DMA pattern to save an extra HBM round trip of activations.
    x_nhwc = jnp.transpose(x_nchw, (0, 2, 3, 1))
    x_pad = jnp.pad(x_nhwc, ((0, 0), (1, 2), (1, 1), (0, 0)))
    x_flat = x_pad.reshape(B, Nb, Cin).astype(jnp.float32)

    # Fold BN (eval mode) + conv bias into per-channel scale/shift (f32).
    def fold(bias, bn):
        gamma, beta, mean, var = bn
        scale = gamma / jnp.sqrt(var + eps)
        shift = (bias - mean) * scale + beta
        return (scale.reshape(1, -1).astype(jnp.float32),
                shift.reshape(1, -1).astype(jnp.float32))

    s1, sb1 = fold(b1, bn1)
    s2, sb2 = fold(b2, bn2)

    # bf16 weights for the MXU.
    w1_flat = w1.reshape(9, Cin, Cmid).astype(jnp.bfloat16)
    w2_flat = w2.reshape(9, Cmid, Cout).astype(jnp.bfloat16)

    kernel = functools.partial(double_conv_kernel, H=H, W=W, Wp=Wp)

    out_slab = pl.pallas_call(
        kernel,
        out_shape=jax.ShapeDtypeStruct((B, Nc, Cout), jnp.float32),
        grid=(B,),
        in_specs=[
            pl.BlockSpec((None, Nb, Cin), lambda b: (b, 0, 0)),
            pl.BlockSpec((9, Cin, Cmid), lambda b: (0, 0, 0)),
            pl.BlockSpec((1, Cmid), lambda b: (0, 0)),
            pl.BlockSpec((1, Cmid), lambda b: (0, 0)),
            pl.BlockSpec((9, Cmid, Cout), lambda b: (0, 0, 0)),
            pl.BlockSpec((1, Cout), lambda b: (0, 0)),
            pl.BlockSpec((1, Cout), lambda b: (0, 0)),
        ],
        out_specs=pl.BlockSpec((None, Nc, Cout), lambda b: (b, 0, 0)),
        scratch_shapes=[pltpu.VMEM((Nb, Cmid), jnp.float32)],
        compiler_params=pltpu.CompilerParams(
            dimension_semantics=("parallel",),
            vmem_limit_bytes=32 * 1024 * 1024),
    )(x_flat, w1_flat, s1, sb1, w2_flat, s2, sb2)

    # (B, H*Wp, Cout) slab -> crop the 2 garbage columns -> NCHW.
    out_nhwc = out_slab.reshape(B, H, Wp, Cout)[:, :, :W, :]
    return jnp.transpose(out_nhwc, (0, 3, 1, 2))


def double_conv_reference(x_nchw, w1, b1, bn1, w2, b2, bn2, *, eps=1e-5):
    """Pure-JAX f32 reference (lax conv, NHWC/HWIO) for validation."""
    x = jnp.transpose(x_nchw, (0, 2, 3, 1))
    dn = lax.conv_dimension_numbers(x.shape, w1.shape, ("NHWC", "HWIO", "NHWC"))

    def block(h, w, b, bn):
        y = lax.conv_general_dilated(h, w, (1, 1), ((1, 1), (1, 1)),
                                     dimension_numbers=dn) + b
        gamma, beta, mean, var = bn
        y = (y - mean) / jnp.sqrt(var + eps) * gamma + beta
        return jnp.maximum(y, 0.0)

    y = block(x, w1, b1, bn1)
    y = block(y, w2, b2, bn2)
    return jnp.transpose(y, (0, 3, 1, 2))


if __name__ == "__main__":
    B, Cin, Cout, H, W = 2, 4, 8, 16, 16

    key = jax.random.PRNGKey(0)
    ks = jax.random.split(key, 10)

    # Conv weights in HWIO; deterministic synthetic init.
    w1 = jax.random.normal(ks[0], (3, 3, Cin, Cout), jnp.float32) * 0.1
    b1 = jax.random.normal(ks[1], (Cout,), jnp.float32) * 0.1
    w2 = jax.random.normal(ks[2], (3, 3, Cout, Cout), jnp.float32) * 0.1
    b2 = jax.random.normal(ks[3], (Cout,), jnp.float32) * 0.1

    # BatchNorm params (eval mode): gamma, beta, running_mean, running_var.
    bn1 = (jax.random.normal(ks[4], (Cout,), jnp.float32) * 0.1 + 1.0,
           jax.random.normal(ks[5], (Cout,), jnp.float32) * 0.1,
           jax.random.normal(ks[6], (Cout,), jnp.float32) * 0.1,
           jax.random.uniform(ks[7], (Cout,), jnp.float32, 0.5, 1.5))
    bn2 = (jnp.ones((Cout,), jnp.float32),
           jnp.zeros((Cout,), jnp.float32),
           jax.random.normal(ks[8], (Cout,), jnp.float32) * 0.1,
           jax.random.uniform(ks[9], (Cout,), jnp.float32, 0.5, 1.5))

    x = jax.random.normal(key, (B, Cin, H, W), jnp.float32)

    out = double_conv_pallas(x, w1, b1, bn1, w2, b2, bn2)
    out = jax.block_until_ready(out)

    ref = double_conv_reference(x, w1, b1, bn1, w2, b2, bn2)
    assert out.shape == (B, Cout, H, W), out.shape
    # bf16 MXU operands vs f32 reference -> loosened tolerance.
    assert jnp.allclose(out, ref, atol=5e-2, rtol=5e-2), (
        float(jnp.max(jnp.abs(out - ref))))

    print("KERNEL_OK")
</pallas_src>

<mosaic_0001>
module attributes {stable_mosaic.version = 11 : i64} {
  func.func @double_conv_kernel(%arg0: i32, %arg1: memref<1x342x4xf32, #tpu.memory_space<vmem>>, %arg2: memref<9x4x8xbf16, #tpu.memory_space<vmem>>, %arg3: memref<1x8xf32, #tpu.memory_space<vmem>>, %arg4: memref<1x8xf32, #tpu.memory_space<vmem>>, %arg5: memref<9x8x8xbf16, #tpu.memory_space<vmem>>, %arg6: memref<1x8xf32, #tpu.memory_space<vmem>>, %arg7: memref<1x8xf32, #tpu.memory_space<vmem>>, %arg8: memref<1x288x8xf32, #tpu.memory_space<vmem>>, %arg9: memref<342x8xf32, #tpu.memory_space<vmem>>) attributes {dimension_semantics = [#tpu.dimension_semantics<parallel>], iteration_bounds = array<i64: 2>, scalar_prefetch = 0 : i64, scratch_operands = 1 : i64, tpu.core_type = #tpu.core_type<tc>, window_params = [{transform_indices = @transform_0, window_bounds = array<i64: 1, 342, 4>}, {pipeline_mode = #tpu.pipeline_mode<synchronous>, transform_indices = @transform_1, window_bounds = array<i64: 9, 4, 8>}, {pipeline_mode = #tpu.pipeline_mode<synchronous>, transform_indices = @transform_2, window_bounds = array<i64: 1, 8>}, {pipeline_mode = #tpu.pipeline_mode<synchronous>, transform_indices = @transform_3, window_bounds = array<i64: 1, 8>}, {pipeline_mode = #tpu.pipeline_mode<synchronous>, transform_indices = @transform_4, window_bounds = array<i64: 9, 8, 8>}, {pipeline_mode = #tpu.pipeline_mode<synchronous>, transform_indices = @transform_5, window_bounds = array<i64: 1, 8>}, {pipeline_mode = #tpu.pipeline_mode<synchronous>, transform_indices = @transform_6, window_bounds = array<i64: 1, 8>}, {transform_indices = @transform_7, window_bounds = array<i64: 1, 288, 8>}]} {
    %cst = arith.constant 0.000000e+00 : f32
    %0 = vector.broadcast %cst : f32 to vector<288x8xf32>
    %c0 = arith.constant 0 : index
    %c0_0 = arith.constant 0 : index
    %c0_1 = arith.constant 0 : index
    %1 = vector.load %arg1[%c0, %c0_0, %c0_1] : memref<1x342x4xf32, #tpu.memory_space<vmem>>, vector<1x288x4xf32>
    %2 = vector.shape_cast %1 : vector<1x288x4xf32> to vector<288x4xf32>
    %3 = arith.truncf %2 : vector<288x4xf32> to vector<288x4xbf16>
    %c0_2 = arith.constant 0 : index
    %c0_3 = arith.constant 0 : index
    %c0_4 = arith.constant 0 : index
    %4 = vector.load %arg2[%c0_2, %c0_3, %c0_4] : memref<9x4x8xbf16, #tpu.memory_space<vmem>>, vector<1x4x8xbf16>
    %5 = vector.shape_cast %4 : vector<1x4x8xbf16> to vector<4x8xbf16>
    %cst_5 = arith.constant dense<0.000000e+00> : vector<288x8xf32>
    %6 = tpu.matmul %3, %5, %cst_5 {dimension_numbers = #tpu.dot_dimension_numbers<[1], [0], [0], [1], [0, 0, 1, 1], [], []>} : vector<288x4xbf16>, vector<4x8xbf16>, vector<288x8xf32> -> vector<288x8xf32>
    %7 = arith.addf %0, %6 : vector<288x8xf32>
    %c0_6 = arith.constant 0 : index
    %c1 = arith.constant 1 : index
    %c0_7 = arith.constant 0 : index
    %8 = vector.load %arg1[%c0_6, %c1, %c0_7] : memref<1x342x4xf32, #tpu.memory_space<vmem>>, vector<1x288x4xf32>
    %9 = vector.shape_cast %8 : vector<1x288x4xf32> to vector<288x4xf32>
    %10 = arith.truncf %9 : vector<288x4xf32> to vector<288x4xbf16>
    %c1_8 = arith.constant 1 : index
    %c0_9 = arith.constant 0 : index
    %c0_10 = arith.constant 0 : index
    %11 = vector.load %arg2[%c1_8, %c0_9, %c0_10] : memref<9x4x8xbf16, #tpu.memory_space<vmem>>, vector<1x4x8xbf16>
    %12 = vector.shape_cast %11 : vector<1x4x8xbf16> to vector<4x8xbf16>
    %cst_11 = arith.constant dense<0.000000e+00> : vector<288x8xf32>
    %13 = tpu.matmul %10, %12, %cst_11 {dimension_numbers = #tpu.dot_dimension_numbers<[1], [0], [0], [1], [0, 0, 1, 1], [], []>} : vector<288x4xbf16>, vector<4x8xbf16>, vector<288x8xf32> -> vector<288x8xf32>
    %14 = arith.addf %7, %13 : vector<288x8xf32>
    %c0_12 = arith.constant 0 : index
    %c2 = arith.constant 2 : index
    %c0_13 = arith.constant 0 : index
    %15 = vector.load %arg1[%c0_12, %c2, %c0_13] : memref<1x342x4xf32, #tpu.memory_space<vmem>>, vector<1x288x4xf32>
    %16 = vector.shape_cast %15 : vector<1x288x4xf32> to vector<288x4xf32>
    %17 = arith.truncf %16 : vector<288x4xf32> to vector<288x4xbf16>
    %c2_14 = arith.constant 2 : index
    %c0_15 = arith.constant 0 : index
    %c0_16 = arith.constant 0 : index
    %18 = vector.load %arg2[%c2_14, %c0_15, %c0_16] : memref<9x4x8xbf16, #tpu.memory_space<vmem>>, vector<1x4x8xbf16>
    %19 = vector.shape_cast %18 : vector<1x4x8xbf16> to vector<4x8xbf16>
    %cst_17 = arith.constant dense<0.000000e+00> : vector<288x8xf32>
    %20 = tpu.matmul %17, %19, %cst_17 {dimension_numbers = #tpu.dot_dimension_numbers<[1], [0], [0], [1], [0, 0, 1, 1], [], []>} : vector<288x4xbf16>, vector<4x8xbf16>, vector<288x8xf32> -> vector<288x8xf32>
    %21 = arith.addf %14, %20 : vector<288x8xf32>
    %c0_18 = arith.constant 0 : index
    %c18 = arith.constant 18 : index
    %c0_19 = arith.constant 0 : index
    %22 = vector.load %arg1[%c0_18, %c18, %c0_19] : memref<1x342x4xf32, #tpu.memory_space<vmem>>, vector<1x288x4xf32>
    %23 = vector.shape_cast %22 : vector<1x288x4xf32> to vector<288x4xf32>
    %24 = arith.truncf %23 : vector<288x4xf32> to vector<288x4xbf16>
    %c3 = arith.constant 3 : index
    %c0_20 = arith.constant 0 : index
    %c0_21 = arith.constant 0 : index
    %25 = vector.load %arg2[%c3, %c0_20, %c0_21] : memref<9x4x8xbf16, #tpu.memory_space<vmem>>, vector<1x4x8xbf16>
    %26 = vector.shape_cast %25 : vector<1x4x8xbf16> to vector<4x8xbf16>
    %cst_22 = arith.constant dense<0.000000e+00> : vector<288x8xf32>
    %27 = tpu.matmul %24, %26, %cst_22 {dimension_numbers = #tpu.dot_dimension_numbers<[1], [0], [0], [1], [0, 0, 1, 1], [], []>} : vector<288x4xbf16>, vector<4x8xbf16>, vector<288x8xf32> -> vector<288x8xf32>
    %28 = arith.addf %21, %27 : vector<288x8xf32>
    %c0_23 = arith.constant 0 : index
    %c19 = arith.constant 19 : index
    %c0_24 = arith.constant 0 : index
    %29 = vector.load %arg1[%c0_23, %c19, %c0_24] : memref<1x342x4xf32, #tpu.memory_space<vmem>>, vector<1x288x4xf32>
    %30 = vector.shape_cast %29 : vector<1x288x4xf32> to vector<288x4xf32>
    %31 = arith.truncf %30 : vector<288x4xf32> to vector<288x4xbf16>
    %c4 = arith.constant 4 : index
    %c0_25 = arith.constant 0 : index
    %c0_26 = arith.constant 0 : index
    %32 = vector.load %arg2[%c4, %c0_25, %c0_26] : memref<9x4x8xbf16, #tpu.memory_space<vmem>>, vector<1x4x8xbf16>
    %33 = vector.shape_cast %32 : vector<1x4x8xbf16> to vector<4x8xbf16>
    %cst_27 = arith.constant dense<0.000000e+00> : vector<288x8xf32>
    %34 = tpu.matmul %31, %33, %cst_27 {dimension_numbers = #tpu.dot_dimension_numbers<[1], [0], [0], [1], [0, 0, 1, 1], [], []>} : vector<288x4xbf16>, vector<4x8xbf16>, vector<288x8xf32> -> vector<288x8xf32>
    %35 = arith.addf %28, %34 : vector<288x8xf32>
    %c0_28 = arith.constant 0 : index
    %c20 = arith.constant 20 : index
    %c0_29 = arith.constant 0 : index
    %36 = vector.load %arg1[%c0_28, %c20, %c0_29] : memref<1x342x4xf32, #tpu.memory_space<vmem>>, vector<1x288x4xf32>
    %37 = vector.shape_cast %36 : vector<1x288x4xf32> to vector<288x4xf32>
    %38 = arith.truncf %37 : vector<288x4xf32> to vector<288x4xbf16>
    %c5 = arith.constant 5 : index
    %c0_30 = arith.constant 0 : index
    %c0_31 = arith.constant 0 : index
    %39 = vector.load %arg2[%c5, %c0_30, %c0_31] : memref<9x4x8xbf16, #tpu.memory_space<vmem>>, vector<1x4x8xbf16>
    %40 = vector.shape_cast %39 : vector<1x4x8xbf16> to vector<4x8xbf16>
    %cst_32 = arith.constant dense<0.000000e+00> : vector<288x8xf32>
    %41 = tpu.matmul %38, %40, %cst_32 {dimension_numbers = #tpu.dot_dimension_numbers<[1], [0], [0], [1], [0, 0, 1, 1], [], []>} : vector<288x4xbf16>, vector<4x8xbf16>, vector<288x8xf32> -> vector<288x8xf32>
    %42 = arith.addf %35, %41 : vector<288x8xf32>
    %c0_33 = arith.constant 0 : index
    %c36 = arith.constant 36 : index
    %c0_34 = arith.constant 0 : index
    %43 = vector.load %arg1[%c0_33, %c36, %c0_34] : memref<1x342x4xf32, #tpu.memory_space<vmem>>, vector<1x288x4xf32>
    %44 = vector.shape_cast %43 : vector<1x288x4xf32> to vector<288x4xf32>
    %45 = arith.truncf %44 : vector<288x4xf32> to vector<288x4xbf16>
    %c6 = arith.constant 6 : index
    %c0_35 = arith.constant 0 : index
    %c0_36 = arith.constant 0 : index
    %46 = vector.load %arg2[%c6, %c0_35, %c0_36] : memref<9x4x8xbf16, #tpu.memory_space<vmem>>, vector<1x4x8xbf16>
    %47 = vector.shape_cast %46 : vector<1x4x8xbf16> to vector<4x8xbf16>
    %cst_37 = arith.constant dense<0.000000e+00> : vector<288x8xf32>
    %48 = tpu.matmul %45, %47, %cst_37 {dimension_numbers = #tpu.dot_dimension_numbers<[1], [0], [0], [1], [0, 0, 1, 1], [], []>} : vector<288x4xbf16>, vector<4x8xbf16>, vector<288x8xf32> -> vector<288x8xf32>
    %49 = arith.addf %42, %48 : vector<288x8xf32>
    %c0_38 = arith.constant 0 : index
    %c37 = arith.constant 37 : index
    %c0_39 = arith.constant 0 : index
    %50 = vector.load %arg1[%c0_38, %c37, %c0_39] : memref<1x342x4xf32, #tpu.memory_space<vmem>>, vector<1x288x4xf32>
    %51 = vector.shape_cast %50 : vector<1x288x4xf32> to vector<288x4xf32>
    %52 = arith.truncf %51 : vector<288x4xf32> to vector<288x4xbf16>
    %c7 = arith.constant 7 : index
    %c0_40 = arith.constant 0 : index
    %c0_41 = arith.constant 0 : index
    %53 = vector.load %arg2[%c7, %c0_40, %c0_41] : memref<9x4x8xbf16, #tpu.memory_space<vmem>>, vector<1x4x8xbf16>
    %54 = vector.shape_cast %53 : vector<1x4x8xbf16> to vector<4x8xbf16>
    %cst_42 = arith.constant dense<0.000000e+00> : vector<288x8xf32>
    %55 = tpu.matmul %52, %54, %cst_42 {dimension_numbers = #tpu.dot_dimension_numbers<[1], [0], [0], [1], [0, 0, 1, 1], [], []>} : vector<288x4xbf16>, vector<4x8xbf16>, vector<288x8xf32> -> vector<288x8xf32>
    %56 = arith.addf %49, %55 : vector<288x8xf32>
    %c0_43 = arith.constant 0 : index
    %c38 = arith.constant 38 : index
    %c0_44 = arith.constant 0 : index
    %57 = vector.load %arg1[%c0_43, %c38, %c0_44] : memref<1x342x4xf32, #tpu.memory_space<vmem>>, vector<1x288x4xf32>
    %58 = vector.shape_cast %57 : vector<1x288x4xf32> to vector<288x4xf32>
    %59 = arith.truncf %58 : vector<288x4xf32> to vector<288x4xbf16>
    %c8 = arith.constant 8 : index
    %c0_45 = arith.constant 0 : index
    %c0_46 = arith.constant 0 : index
    %60 = vector.load %arg2[%c8, %c0_45, %c0_46] : memref<9x4x8xbf16, #tpu.memory_space<vmem>>, vector<1x4x8xbf16>
    %61 = vector.shape_cast %60 : vector<1x4x8xbf16> to vector<4x8xbf16>
    %cst_47 = arith.constant dense<0.000000e+00> : vector<288x8xf32>
    %62 = tpu.matmul %59, %61, %cst_47 {dimension_numbers = #tpu.dot_dimension_numbers<[1], [0], [0], [1], [0, 0, 1, 1], [], []>} : vector<288x4xbf16>, vector<4x8xbf16>, vector<288x8xf32> -> vector<288x8xf32>
    %63 = arith.addf %56, %62 : vector<288x8xf32>
    %c0_48 = arith.constant 0 : index
    %c0_49 = arith.constant 0 : index
    %64 = vector.load %arg3[%c0_48, %c0_49] : memref<1x8xf32, #tpu.memory_space<vmem>>, vector<1x8xf32>
    %65 = vector.broadcast %64 : vector<1x8xf32> to vector<288x8xf32>
    %66 = arith.mulf %63, %65 : vector<288x8xf32>
    %c0_50 = arith.constant 0 : index
    %c0_51 = arith.constant 0 : index
    %67 = vector.load %arg4[%c0_50, %c0_51] : memref<1x8xf32, #tpu.memory_space<vmem>>, vector<1x8xf32>
    %68 = vector.broadcast %67 : vector<1x8xf32> to vector<288x8xf32>
    %69 = arith.addf %66, %68 : vector<288x8xf32>
    %cst_52 = arith.constant 0.000000e+00 : f32
    %70 = vector.broadcast %cst_52 : f32 to vector<288x8xf32>
    %71 = arith.maximumf %69, %70 : vector<288x8xf32>
    %72 = tpu.iota {dimensions = array<i32: 0>} : vector<288x1xi32>
    %c18_i32 = arith.constant 18 : i32
    %c0_i32 = arith.constant 0 : i32
    %73 = arith.cmpi eq, %c18_i32, %c0_i32 : i32
    %c1_i32 = arith.constant 1 : i32
    %74 = arith.select %73, %c1_i32, %c18_i32 : i32
    %75 = vector.broadcast %74 : i32 to vector<288x1xi32>
    %76 = arith.remsi %72, %75 : vector<288x1xi32>
    %c0_i32_53 = arith.constant 0 : i32
    %77 = vector.broadcast %c0_i32_53 : i32 to vector<288x1xi32>
    %78 = arith.cmpi ne, %76, %77 : vector<288x1xi32>
    %c0_i32_54 = arith.constant 0 : i32
    %79 = vector.broadcast %c0_i32_54 : i32 to vector<288x1xi32>
    %80 = arith.cmpi slt, %76, %79 : vector<288x1xi32>
    %c0_i32_55 = arith.constant 0 : i32
    %81 = arith.cmpi slt, %74, %c0_i32_55 : i32
    %82 = vector.broadcast %81 : i1 to vector<288x1xi1>
    %83 = vector.broadcast %82 : vector<288x1xi1> to vector<288x1xi1>
    %84 = arith.xori %80, %83 : vector<288x1xi1>
    %85 = arith.andi %84, %78 : vector<288x1xi1>
    %86 = vector.broadcast %74 : i32 to vector<288x1xi32>
    %87 = arith.addi %76, %86 : vector<288x1xi32>
    %88 = arith.select %85, %87, %76 : vector<288x1xi1>, vector<288x1xi32>
    %c16_i32 = arith.constant 16 : i32
    %89 = vector.broadcast %c16_i32 : i32 to vector<288x1xi32>
    %90 = arith.cmpi slt, %88, %89 : vector<288x1xi32>
    %cst_56 = arith.constant 0.000000e+00 : f32
    %91 = vector.shape_cast %90 : vector<288x1xi1> to vector<288x1xi1>
    %92 = vector.broadcast %91 : vector<288x1xi1> to vector<288x8xi1>
    %93 = vector.broadcast %cst_56 : f32 to vector<288x8xf32>
    %94 = arith.select %92, %71, %93 : vector<288x8xi1>, vector<288x8xf32>
    %cst_57 = arith.constant 0.000000e+00 : f32
    %95 = vector.broadcast %cst_57 : f32 to vector<19x8xf32>
    %c0_58 = arith.constant 0 : index
    %c0_59 = arith.constant 0 : index
    %96 = vector.load %arg9[%c0_58, %c0_59] : memref<342x8xf32, #tpu.memory_space<vmem>>, vector<19x8xf32>
    tpu.vector_store %arg9[%c0_58, %c0_59], %95 {strides = array<i32>} : memref<342x8xf32, #tpu.memory_space<vmem>>, vector<19x8xf32>,
    %cst_60 = arith.constant 0.000000e+00 : f32
    %97 = vector.broadcast %cst_60 : f32 to vector<35x8xf32>
    %c307 = arith.constant 307 : index
    %c0_61 = arith.constant 0 : index
    %98 = vector.load %arg9[%c307, %c0_61] : memref<342x8xf32, #tpu.memory_space<vmem>>, vector<35x8xf32>
    tpu.vector_store %arg9[%c307, %c0_61], %97 {strides = array<i32>} : memref<342x8xf32, #tpu.memory_space<vmem>>, vector<35x8xf32>,
    %c19_62 = arith.constant 19 : index
    %c0_63 = arith.constant 0 : index
    %99 = vector.load %arg9[%c19_62, %c0_63] : memref<342x8xf32, #tpu.memory_space<vmem>>, vector<288x8xf32>
    tpu.vector_store %arg9[%c19_62, %c0_63], %94 {strides = array<i32>} : memref<342x8xf32, #tpu.memory_space<vmem>>, vector<288x8xf32>,
    %cst_64 = arith.constant 0.000000e+00 : f32
    %100 = vector.broadcast %cst_64 : f32 to vector<288x8xf32>
    %c0_65 = arith.constant 0 : index
    %c0_66 = arith.constant 0 : index
    %101 = vector.load %arg9[%c0_65, %c0_66] : memref<342x8xf32, #tpu.memory_space<vmem>>, vector<288x8xf32>
    %102 = arith.truncf %101 : vector<288x8xf32> to vector<288x8xbf16>
    %c0_67 = arith.constant 0 : index
    %c0_68 = arith.constant 0 : index
    %c0_69 = arith.constant 0 : index
    %103 = vector.load %arg5[%c0_67, %c0_68, %c0_69] : memref<9x8x8xbf16, #tpu.memory_space<vmem>>, vector<1x8x8xbf16>
    %104 = vector.shape_cast %103 : vector<1x8x8xbf16> to vector<8x8xbf16>
    %cst_70 = arith.constant dense<0.000000e+00> : vector<288x8xf32>
    %105 = tpu.matmul %102, %104, %cst_70 {dimension_numbers = #tpu.dot_dimension_numbers<[1], [0], [0], [1], [0, 0, 1, 1], [], []>} : vector<288x8xbf16>, vector<8x8xbf16>, vector<288x8xf32> -> vector<288x8xf32>
    %106 = arith.addf %100, %105 : vector<288x8xf32>
    %c1_71 = arith.constant 1 : index
    %c0_72 = arith.constant 0 : index
    %107 = vector.load %arg9[%c1_71, %c0_72] : memref<342x8xf32, #tpu.memory_space<vmem>>, vector<288x8xf32>
    %108 = arith.truncf %107 : vector<288x8xf32> to vector<288x8xbf16>
    %c1_73 = arith.constant 1 : index
    %c0_74 = arith.constant 0 : index
    %c0_75 = arith.constant 0 : index
    %109 = vector.load %arg5[%c1_73, %c0_74, %c0_75] : memref<9x8x8xbf16, #tpu.memory_space<vmem>>, vector<1x8x8xbf16>
    %110 = vector.shape_cast %109 : vector<1x8x8xbf16> to vector<8x8xbf16>
    %cst_76 = arith.constant dense<0.000000e+00> : vector<288x8xf32>
    %111 = tpu.matmul %108, %110, %cst_76 {dimension_numbers = #tpu.dot_dimension_numbers<[1], [0], [0], [1], [0, 0, 1, 1], [], []>} : vector<288x8xbf16>, vector<8x8xbf16>, vector<288x8xf32> -> vector<288x8xf32>
    %112 = arith.addf %106, %111 : vector<288x8xf32>
    %c2_77 = arith.constant 2 : index
    %c0_78 = arith.constant 0 : index
    %113 = vector.load %arg9[%c2_77, %c0_78] : memref<342x8xf32, #tpu.memory_space<vmem>>, vector<288x8xf32>
    %114 = arith.truncf %113 : vector<288x8xf32> to vector<288x8xbf16>
    %c2_79 = arith.constant 2 : index
    %c0_80 = arith.constant 0 : index
    %c0_81 = arith.constant 0 : index
    %115 = vector.load %arg5[%c2_79, %c0_80, %c0_81] : memref<9x8x8xbf16, #tpu.memory_space<vmem>>, vector<1x8x8xbf16>
    %116 = vector.shape_cast %115 : vector<1x8x8xbf16> to vector<8x8xbf16>
    %cst_82 = arith.constant dense<0.000000e+00> : vector<288x8xf32>
    %117 = tpu.matmul %114, %116, %cst_82 {dimension_numbers = #tpu.dot_dimension_numbers<[1], [0], [0], [1], [0, 0, 1, 1], [], []>} : vector<288x8xbf16>, vector<8x8xbf16>, vector<288x8xf32> -> vector<288x8xf32>
    %118 = arith.addf %112, %117 : vector<288x8xf32>
    %c18_83 = arith.constant 18 : index
    %c0_84 = arith.constant 0 : index
    %119 = vector.load %arg9[%c18_83, %c0_84] : memref<342x8xf32, #tpu.memory_space<vmem>>, vector<288x8xf32>
    %120 = arith.truncf %119 : vector<288x8xf32> to vector<288x8xbf16>
    %c3_85 = arith.constant 3 : index
    %c0_86 = arith.constant 0 : index
    %c0_87 = arith.constant 0 : index
    %121 = vector.load %arg5[%c3_85, %c0_86, %c0_87] : memref<9x8x8xbf16, #tpu.memory_space<vmem>>, vector<1x8x8xbf16>
    %122 = vector.shape_cast %121 : vector<1x8x8xbf16> to vector<8x8xbf16>
    %cst_88 = arith.constant dense<0.000000e+00> : vector<288x8xf32>
    %123 = tpu.matmul %120, %122, %cst_88 {dimension_numbers = #tpu.dot_dimension_numbers<[1], [0], [0], [1], [0, 0, 1, 1], [], []>} : vector<288x8xbf16>, vector<8x8xbf16>, vector<288x8xf32> -> vector<288x8xf32>
    %124 = arith.addf %118, %123 : vector<288x8xf32>
    %c19_89 = arith.constant 19 : index
    %c0_90 = arith.constant 0 : index
    %125 = vector.load %arg9[%c19_89, %c0_90] : memref<342x8xf32, #tpu.memory_space<vmem>>, vector<288x8xf32>
    %126 = arith.truncf %125 : vector<288x8xf32> to vector<288x8xbf16>
    %c4_91 = arith.constant 4 : index
    %c0_92 = arith.constant 0 : index
    %c0_93 = arith.constant 0 : index
    %127 = vector.load %arg5[%c4_91, %c0_92, %c0_93] : memref<9x8x8xbf16, #tpu.memory_space<vmem>>, vector<1x8x8xbf16>
    %128 = vector.shape_cast %127 : vector<1x8x8xbf16> to vector<8x8xbf16>
    %cst_94 = arith.constant dense<0.000000e+00> : vector<288x8xf32>
    %129 = tpu.matmul %126, %128, %cst_94 {dimension_numbers = #tpu.dot_dimension_numbers<[1], [0], [0], [1], [0, 0, 1, 1], [], []>} : vector<288x8xbf16>, vector<8x8xbf16>, vector<288x8xf32> -> vector<288x8xf32>
    %130 = arith.addf %124, %129 : vector<288x8xf32>
    %c20_95 = arith.constant 20 : index
    %c0_96 = arith.constant 0 : index
    %131 = vector.load %arg9[%c20_95, %c0_96] : memref<342x8xf32, #tpu.memory_space<vmem>>, vector<288x8xf32>
    %132 = arith.truncf %131 : vector<288x8xf32> to vector<288x8xbf16>
    %c5_97 = arith.constant 5 : index
    %c0_98 = arith.constant 0 : index
    %c0_99 = arith.constant 0 : index
    %133 = vector.load %arg5[%c5_97, %c0_98, %c0_99] : memref<9x8x8xbf16, #tpu.memory_space<vmem>>, vector<1x8x8xbf16>
    %134 = vector.shape_cast %133 : vector<1x8x8xbf16> to vector<8x8xbf16>
    %cst_100 = arith.constant dense<0.000000e+00> : vector<288x8xf32>
    %135 = tpu.matmul %132, %134, %cst_100 {dimension_numbers = #tpu.dot_dimension_numbers<[1], [0], [0], [1], [0, 0, 1, 1], [], []>} : vector<288x8xbf16>, vector<8x8xbf16>, vector<288x8xf32> -> vector<288x8xf32>
    %136 = arith.addf %130, %135 : vector<288x8xf32>
    %c36_101 = arith.constant 36 : index
    %c0_102 = arith.constant 0 : index
    %137 = vector.load %arg9[%c36_101, %c0_102] : memref<342x8xf32, #tpu.memory_space<vmem>>, vector<288x8xf32>
    %138 = arith.truncf %137 : vector<288x8xf32> to vector<288x8xbf16>
    %c6_103 = arith.constant 6 : index
    %c0_104 = arith.constant 0 : index
    %c0_105 = arith.constant 0 : index
    %139 = vector.load %arg5[%c6_103, %c0_104, %c0_105] : memref<9x8x8xbf16, #tpu.memory_space<vmem>>, vector<1x8x8xbf16>
    %140 = vector.shape_cast %139 : vector<1x8x8xbf16> to vector<8x8xbf16>
    %cst_106 = arith.constant dense<0.000000e+00> : vector<288x8xf32>
    %141 = tpu.matmul %138, %140, %cst_106 {dimension_numbers = #tpu.dot_dimension_numbers<[1], [0], [0], [1], [0, 0, 1, 1], [], []>} : vector<288x8xbf16>, vector<8x8xbf16>, vector<288x8xf32> -> vector<288x8xf32>
    %142 = arith.addf %136, %141 : vector<288x8xf32>
    %c37_107 = arith.constant 37 : index
    %c0_108 = arith.constant 0 : index
    %143 = vector.load %arg9[%c37_107, %c0_108] : memref<342x8xf32, #tpu.memory_space<vmem>>, vector<288x8xf32>
    %144 = arith.truncf %143 : vector<288x8xf32> to vector<288x8xbf16>
    %c7_109 = arith.constant 7 : index
    %c0_110 = arith.constant 0 : index
    %c0_111 = arith.constant 0 : index
    %145 = vector.load %arg5[%c7_109, %c0_110, %c0_111] : memref<9x8x8xbf16, #tpu.memory_space<vmem>>, vector<1x8x8xbf16>
    %146 = vector.shape_cast %145 : vector<1x8x8xbf16> to vector<8x8xbf16>
    %cst_112 = arith.constant dense<0.000000e+00> : vector<288x8xf32>
    %147 = tpu.matmul %144, %146, %cst_112 {dimension_numbers = #tpu.dot_dimension_numbers<[1], [0], [0], [1], [0, 0, 1, 1], [], []>} : vector<288x8xbf16>, vector<8x8xbf16>, vector<288x8xf32> -> vector<288x8xf32>
    %148 = arith.addf %142, %147 : vector<288x8xf32>
    %c38_113 = arith.constant 38 : index
    %c0_114 = arith.constant 0 : index
    %149 = vector.load %arg9[%c38_113, %c0_114] : memref<342x8xf32, #tpu.memory_space<vmem>>, vector<288x8xf32>
    %150 = arith.truncf %149 : vector<288x8xf32> to vector<288x8xbf16>
    %c8_115 = arith.constant 8 : index
    %c0_116 = arith.constant 0 : index
    %c0_117 = arith.constant 0 : index
    %151 = vector.load %arg5[%c8_115, %c0_116, %c0_117] : memref<9x8x8xbf16, #tpu.memory_space<vmem>>, vector<1x8x8xbf16>
    %152 = vector.shape_cast %151 : vector<1x8x8xbf16> to vector<8x8xbf16>
    %cst_118 = arith.constant dense<0.000000e+00> : vector<288x8xf32>
    %153 = tpu.matmul %150, %152, %cst_118 {dimension_numbers = #tpu.dot_dimension_numbers<[1], [0], [0], [1], [0, 0, 1, 1], [], []>} : vector<288x8xbf16>, vector<8x8xbf16>, vector<288x8xf32> -> vector<288x8xf32>
    %154 = arith.addf %148, %153 : vector<288x8xf32>
    %c0_119 = arith.constant 0 : index
    %c0_120 = arith.constant 0 : index
    %155 = vector.load %arg6[%c0_119, %c0_120] : memref<1x8xf32, #tpu.memory_space<vmem>>, vector<1x8xf32>
    %156 = vector.broadcast %155 : vector<1x8xf32> to vector<288x8xf32>
    %157 = arith.mulf %154, %156 : vector<288x8xf32>
    %c0_121 = arith.constant 0 : index
    %c0_122 = arith.constant 0 : index
    %158 = vector.load %arg7[%c0_121, %c0_122] : memref<1x8xf32, #tpu.memory_space<vmem>>, vector<1x8xf32>
    %159 = vector.broadcast %158 : vector<1x8xf32> to vector<288x8xf32>
    %160 = arith.addf %157, %159 : vector<288x8xf32>
    %cst_123 = arith.constant 0.000000e+00 : f32
    %161 = vector.broadcast %cst_123 : f32 to vector<288x8xf32>
    %162 = arith.maximumf %160, %161 : vector<288x8xf32>
    %c0_124 = arith.constant 0 : index
    %c0_125 = arith.constant 0 : index
    %c0_126 = arith.constant 0 : index
    %163 = vector.load %arg8[%c0_124, %c0_125, %c0_126] : memref<1x288x8xf32, #tpu.memory_space<vmem>>, vector<1x288x8xf32>
    %164 = vector.shape_cast %163 : vector<1x288x8xf32> to vector<288x8xf32>
    %165 = vector.shape_cast %162 : vector<288x8xf32> to vector<1x288x8xf32>
    tpu.vector_store %arg8[%c0_124, %c0_125, %c0_126], %165 {strides = array<i32>} : memref<1x288x8xf32, #tpu.memory_space<vmem>>, vector<1x288x8xf32>,
    return
  }
  func.func @transform_0(%arg0: i32) -> (i32, i32, i32) {
    %c0_i32 = arith.constant 0 : i32
    %c0_i32_0 = arith.constant 0 : i32
    %c0_i32_1 = arith.constant 0 : i32
    return %arg0, %c0_i32, %c0_i32_0 : i32, i32, i32
  }
  func.func @transform_1(%arg0: i32) -> (i32, i32, i32) {
    %c0_i32 = arith.constant 0 : i32
    %c0_i32_0 = arith.constant 0 : i32
    %c0_i32_1 = arith.constant 0 : i32
    %c0_i32_2 = arith.constant 0 : i32
    return %c0_i32, %c0_i32_0, %c0_i32_1 : i32, i32, i32
  }
  func.func @transform_2(%arg0: i32) -> (i32, i32) {
    %c0_i32 = arith.constant 0 : i32
    %c0_i32_0 = arith.constant 0 : i32
    %c0_i32_1 = arith.constant 0 : i32
    return %c0_i32, %c0_i32_0 : i32, i32
  }
  func.func @transform_3(%arg0: i32) -> (i32, i32) {
    %c0_i32 = arith.constant 0 : i32
    %c0_i32_0 = arith.constant 0 : i32
    %c0_i32_1 = arith.constant 0 : i32
    return %c0_i32, %c0_i32_0 : i32, i32
  }
  func.func @transform_4(%arg0: i32) -> (i32, i32, i32) {
    %c0_i32 = arith.constant 0 : i32
    %c0_i32_0 = arith.constant 0 : i32
    %c0_i32_1 = arith.constant 0 : i32
    %c0_i32_2 = arith.constant 0 : i32
    return %c0_i32, %c0_i32_0, %c0_i32_1 : i32, i32, i32
  }
  func.func @transform_5(%arg0: i32) -> (i32, i32) {
    %c0_i32 = arith.constant 0 : i32
    %c0_i32_0 = arith.constant 0 : i32
    %c0_i32_1 = arith.constant 0 : i32
    return %c0_i32, %c0_i32_0 : i32, i32
  }
  func.func @transform_6(%arg0: i32) -> (i32, i32) {
    %c0_i32 = arith.constant 0 : i32
    %c0_i32_0 = arith.constant 0 : i32
    %c0_i32_1 = arith.constant 0 : i32
    return %c0_i32, %c0_i32_0 : i32, i32
  }
  func.func @transform_7(%arg0: i32) -> (i32, i32, i32) {
    %c0_i32 = arith.constant 0 : i32
    %c0_i32_0 = arith.constant 0 : i32
    %c0_i32_1 = arith.constant 0 : i32
    return %arg0, %c0_i32, %c0_i32_0 : i32, i32, i32
  }
}

</mosaic_0001>

<bundles_post_ra>
// kernel: tpu_custom_call.1
= control target key start
LH: loop header
LB: loop body
LE: loop exit
PB: predicated region body
PF: predicated region fallthrough
CT: control target
= control target key end

     0   :  { %s8672_s24 = smov 0   ;;  %s12435_s0 = inlined_call_operand.vmem [shape: f32[2,342,4], index: 0, kind: input, shape index: {}]   ;;  %s12436_s1 = inlined_call_operand.vmem [shape: bf16[9,4,8], index: 1, kind: input, shape index: {}]   ;;  %s12437_s2 = inlined_call_operand.vmem [shape: f32[1,8], index: 2, kind: input, shape index: {}]   ;;  %s12438_s3 = inlined_call_operand.vmem [shape: f32[1,8], index: 3, kind: input, shape index: {}]   ;;  %s12439_s4 = inlined_call_operand.vmem [shape: bf16[9,8,8], index: 4, kind: input, shape index: {}]   ;;  %s12440_s5 = inlined_call_operand.vmem [shape: f32[1,8], index: 5, kind: input, shape index: {}]   ;;  %s12441_s6 = inlined_call_operand.vmem [shape: f32[1,8], index: 6, kind: input, shape index: {}]   ;;  %s12442_s7 = inlined_call_operand.vmem [shape: f32[2,288,8], index: 7, kind: output, shape index: {}]  }
   0x1 LB: > { %s7143_s25 = sadd.s32 4294967295, %s8629_s24   ;;  %p7147_p0 = scmp.ge.s32.totalorder %s8629_s24, 1  ;;  %s8629_s24 = sphi %s8672_s24, %s17_s24  }
   0x2   : > { %p237_p1 = scmp.lt.s32.totalorder %s8629_s24, 3 }
   0x4   : > { %p238_p2 = pnand %p7147_p0, %p237_p1 }
   0x6   : > { %241 = sbr.rel (%p238_p2) target bundleno = 1114 (0x45a), region = 48 }
   0xb   : > { %v7150_v0 = vld [vmem:[%s12436_s1 + $0x2] sm:$0x3]  ;;  %vm446_vm0 = vcmask 1041408   ;;  %v334_v1 = vld [vmem:[%s12436_s1] sm:$0x3]  ;;  %p269_p3 = scmp.lt.s32.totalorder %s7143_s25, 1 }
   0xc   : > { %8522 = vmatprep.subr.msk.bf16.mxu0 %vm446_vm0, %v7150_v0  ;;  %v448_v2 = vsel %vm446_vm0, %v7150_v0, 0  ;;  %8523 = vmatprep.subr.msk.bf16.mxu1 %vm446_vm0, %v334_v1  ;;  %v682_v3 = vsel %vm446_vm0, %v334_v1, 0  ;;  %v7187_v4 = vld [vmem:[%s12436_s1 + $0x4] sm:$0x3]  ;;  %v7206_v5 = vld [vmem:[%s12436_s1 + $0x6] sm:$0x3] }
   0xd   : > { %7839 = vmatpush3.bf16.msra.mxu0 %v448_v2  ;;  %7877 = vmatpush3.bf16.msra.mxu1 %v682_v3  ;;  %s13259_s25 = smov (!%p269_p3, %s7143_s25), 1  ;;  %vm391_vm1 = vcmask 31744   ;;  %v972_v17 = vsel %vm446_vm0, %v7187_v4, 0  ;;  %v1298_v25 = vsel %vm446_vm0, %v7206_v5, 0  ;;  %v8726_v26 = vld [vmem:[%s12436_s1 + $0x8] sm:$0x3] }
   0xe   : > { %8524 = vmatprep.subr.msk.bf16.mxu0 %vm446_vm0, %v7187_v4  ;;  %8525 = vmatprep.subr.msk.bf16.mxu1 %vm446_vm0, %v7206_v5  ;;  %s8540_s11 = smul.u32 344, %s13259_s25  ;;  %vm12470_vm2 = vcmask 1043456   ;;  %vm12466_vm3 = vcmask 64512   ;;  %vm4025_vm4 = vcmask 59392  }
   0xf   : > { %s8541_s30 = smul.u32 288, %s13259_s25 }
  0x10   : > { %s8704_s14 = scalar_lea.vmem %s12435_s0, %s8540_s11 }
  0x11   : > { %v335_v6 = vld [vmem:[%s8704_s14 + $0x1] sm:$0xff]  ;;  %v336_v7 = vld [vmem:[%s8704_s14 + $0x9] sm:$0xff]  ;;  %v337_v11 = vld [vmem:[%s8704_s14 + $0x11] sm:$0xff]  ;;  %s12219_s11 = scalar_lea.vmem %s12442_s7, %s8541_s30 }
  0x12   : > { %v280_v8 = vld [vmem:[%s8704_s14] sm:$0xff]  ;;  %v371_v9 = vpack.c.bf16 %v336_v7, %v335_v6  ;;  %v281_v10 = vld [vmem:[%s8704_s14 + $0x8] sm:$0xff]  ;;  %v282_v15 = vld [vmem:[%s8704_s14 + $0x10] sm:$0xff] }
  0x13   : > { %v338_v12 = vld [vmem:[%s8704_s14 + $0x19] sm:$0xff]  ;;  %v316_v13 = vpack.c.bf16 %v281_v10, %v280_v8  ;;  %v339_v18 = vld [vmem:[%s8704_s14 + $0x21] sm:$0xff]  ;;  %v340_v20 = vld [vmem:[%s8704_s14 + $0x29] sm:$0xff] }
  0x14   : > { %v372_v14 = vpack.c.bf16 %v338_v12, %v337_v11  ;;  %v283_v16 = vld [vmem:[%s8704_s14 + $0x18] sm:$0xff]  ;;  %7840 = vmatprep.mubr.msk.bf16.mxu0 %vm391_vm1, %v371_v9  ;;  %v284_v21 = vld [vmem:[%s8704_s14 + $0x20] sm:$0xff]  ;;  %v285_v22 = vld [vmem:[%s8704_s14 + $0x28] sm:$0xff]  ;;  %v373_v23 = vpack.c.bf16 %v340_v20, %v339_v18 }
  0x15   : > { %v317_v19 = vpack.c.bf16 %v283_v16, %v282_v15  ;;  %7878 = vmatprep.mubr.msk.bf16.mxu1 %vm391_vm1, %v316_v13  ;;  %v318_v24 = vpack.c.bf16 %v285_v22, %v284_v21  ;;  %v341_v27 = vld [vmem:[%s8704_s14 + $0x31] sm:$0xff]  ;;  %v342_v28 = vld [vmem:[%s8704_s14 + $0x39] sm:$0xff]  ;;  %v343_v31 = vld [vmem:[%s8704_s14 + $0x41] sm:$0xff] }
  0x16   : > { %7841 = vmatmul.mubr.msk.bf16.vlgmr.msra.gmra.mxu0 %vm391_vm1, %v372_v14  ;;  %v286_v29 = vld [vmem:[%s8704_s14 + $0x30] sm:$0xff]  ;;  %v287_v30 = vld [vmem:[%s8704_s14 + $0x38] sm:$0xff]  ;;  %v288_v33 = vld [vmem:[%s8704_s14 + $0x40] sm:$0xff]  ;;  %v374_v35 = vpack.c.bf16 %v342_v28, %v341_v27 }
  0x17   : > { %7879 = vmatmul.mubr.msk.bf16.vlgmr.msra.gmra.mxu1 %vm391_vm1, %v317_v19  ;;  %7915 = vmatpush3.bf16.msra.mxu0 %v972_v17  ;;  %v344_v32 = vld [vmem:[%s8704_s14 + $0x49] sm:$0xff]  ;;  %v319_v36 = vpack.c.bf16 %v287_v30, %v286_v29  ;;  %v345_v39 = vld [vmem:[%s8704_s14 + $0x51] sm:$0xff]  ;;  %v346_v40 = vld [vmem:[%s8704_s14 + $0x59] sm:$0xff] }
  0x18   : > { %7844 = vmatprep.mubr.msk.bf16.mxu0 %vm391_vm1, %v373_v23  ;;  %7882 = vmatprep.mubr.msk.bf16.mxu1 %vm391_vm1, %v318_v24  ;;  %v289_v34 = vld [vmem:[%s8704_s14 + $0x48] sm:$0xff]  ;;  %v375_v37 = vpack.c.bf16 %v344_v32, %v343_v31  ;;  %v290_v41 = vld [vmem:[%s8704_s14 + $0x50] sm:$0xff]  ;;  %v291_v42 = vld [vmem:[%s8704_s14 + $0x58] sm:$0xff]  ;;  %v376_v47 = vpack.c.bf16 %v346_v40, %v345_v39 }
  0x19   : > { %7953 = vmatpush3.bf16.msra.mxu1 %v1298_v25  ;;  %8526 = vmatprep.subr.msk.bf16.mxu0 %vm446_vm0, %v8726_v26  ;;  %v320_v38 = vpack.c.bf16 %v289_v34, %v288_v33  ;;  %v347_v43 = vld [vmem:[%s8704_s14 + $0x61] sm:$0xff]  ;;  %v348_v44 = vld [vmem:[%s8704_s14 + $0x69] sm:$0xff]  ;;  %v321_v48 = vpack.c.bf16 %v291_v42, %v290_v41  ;;  %v349_v51 = vld [vmem:[%s8704_s14 + $0x71] sm:$0xff] }
  0x1a   : > { %v292_v45 = vld [vmem:[%s8704_s14 + $0x60] sm:$0xff]  ;;  %v293_v46 = vld [vmem:[%s8704_s14 + $0x68] sm:$0xff]  ;;  %v377_v49 = vpack.c.bf16 %v348_v44, %v347_v43  ;;  %v294_v53 = vld [vmem:[%s8704_s14 + $0x70] sm:$0xff] }
  0x1b   : > { %v322_v50 = vpack.c.bf16 %v293_v46, %v292_v45  ;;  %v350_v52 = vld [vmem:[%s8704_s14 + $0x79] sm:$0xff]  ;;  %v351_v55 = vld [vmem:[%s8704_s14 + $0x81] sm:$0xff]  ;;  %v352_v56 = vld [vmem:[%s8704_s14 + $0x89] sm:$0xff] }
  0x1c   : > { %v295_v54 = vld [vmem:[%s8704_s14 + $0x78] sm:$0xff]  ;;  %v296_v57 = vld [vmem:[%s8704_s14 + $0x80] sm:$0xff]  ;;  %v297_v58 = vld [vmem:[%s8704_s14 + $0x88] sm:$0xff]  ;;  %v378_v59 = vpack.c.bf16 %v350_v52, %v349_v51  ;;  %v379_v61 = vpack.c.bf16 %v352_v56, %v351_v55 }
  0x1d   : > { %v323_v60 = vpack.c.bf16 %v295_v54, %v294_v53  ;;  %v324_v62 = vpack.c.bf16 %v297_v58, %v296_v57  ;;  %v353_v63 = vld [vmem:[%s8704_s14 + $0x91] sm:$0xff]  ;;  %v354_v0 = vld [vmem:[%s8704_s14 + $0x99] sm:$0xff]  ;;  %v355_v3 = vld [vmem:[%s8704_s14 + $0xa1] sm:$0xff] }
  0x1e   : > { %7845 = vmatmul.mubr.msk.bf16.gmra.mxu0 %vm391_vm1, %v374_v35  ;;  %v298_v1 = vld [vmem:[%s8704_s14 + $0x90] sm:$0xff]  ;;  %v299_v2 = vld [vmem:[%s8704_s14 + $0x98] sm:$0xff]  ;;  %v300_v5 = vld [vmem:[%s8704_s14 + $0xa0] sm:$0xff]  ;;  %v380_v7 = vpack.c.bf16 %v354_v0, %v353_v63 }
  0x1f   : > { %7883 = vmatmul.mubr.msk.bf16.gmra.mxu1 %vm391_vm1, %v319_v36  ;;  %7848 = vmatprep.mubr.msk.bf16.mxu0 %vm391_vm1, %v375_v37  ;;  %v356_v4 = vld [vmem:[%s8704_s14 + $0xa9] sm:$0xff]  ;;  %v325_v8 = vpack.c.bf16 %v299_v2, %v298_v1  ;;  %v357_v12 = vld [vmem:[%s8704_s14 + $0xb1] sm:$0xff]  ;;  %v358_v13 = vld [vmem:[%s8704_s14 + $0xb9] sm:$0xff]  ;;  %v1624_v2 = vsel %vm446_vm0, %v8726_v26, 0 }
  0x20   : > { %7886 = vmatprep.mubr.msk.bf16.mxu1 %vm391_vm1, %v320_v38  ;;  %v301_v6 = vld [vmem:[%s8704_s14 + $0xa8] sm:$0xff]  ;;  %v381_v9 = vpack.c.bf16 %v356_v4, %v355_v3  ;;  %v302_v14 = vld [vmem:[%s8704_s14 + $0xb0] sm:$0xff]  ;;  %v303_v15 = vld [vmem:[%s8704_s14 + $0xb8] sm:$0xff]  ;;  %v382_v20 = vpack.c.bf16 %v358_v13, %v357_v12 }
  0x21   : > { %v326_v10 = vpack.c.bf16 %v301_v6, %v300_v5  ;;  %v8781_v11 = vld [vmem:[%s12436_s1 + $0xa] sm:$0x3]  ;;  %v359_v16 = vld [vmem:[%s8704_s14 + $0xc1] sm:$0xff]  ;;  %v327_v21 = vpack.c.bf16 %v303_v15, %v302_v14  ;;  %v361_v24 = vld [vmem:[%s8704_s14 + $0xd1] sm:$0xff] }
  0x22   : > { %v360_v17 = vld [vmem:[%s8704_s14 + $0xc9] sm:$0xff]  ;;  %8527 = vmatprep.subr.msk.bf16.mxu1 %vm446_vm0, %v8781_v11  ;;  %v304_v18 = vld [vmem:[%s8704_s14 + $0xc0] sm:$0xff]  ;;  %v307_v28 = vld [vmem:[%s8704_s14 + $0xd8] sm:$0xff]  ;;  %v1950_v4 = vsel %vm446_vm0, %v8781_v11, 0 }
  0x23   : > { %v305_v19 = vld [vmem:[%s8704_s14 + $0xc8] sm:$0xff]  ;;  %v383_v22 = vpack.c.bf16 %v360_v17, %v359_v16  ;;  %v362_v25 = vld [vmem:[%s8704_s14 + $0xd9] sm:$0xff]  ;;  %v306_v27 = vld [vmem:[%s8704_s14 + $0xd0] sm:$0xff] }
  0x24   : > { %v328_v23 = vpack.c.bf16 %v305_v19, %v304_v18  ;;  %v363_v29 = vld [vmem:[%s8704_s14 + $0xe1] sm:$0xff]  ;;  %v364_v30 = vld [vmem:[%s8704_s14 + $0xe9] sm:$0xff]  ;;  %v384_v33 = vpack.c.bf16 %v362_v25, %v361_v24  ;;  %v329_v34 = vpack.c.bf16 %v307_v28, %v306_v27  ;;  %v365_v37 = vld [vmem:[%s8704_s14 + $0xf1] sm:$0xff] }
  0x25   : > { %v308_v31 = vld [vmem:[%s8704_s14 + $0xe0] sm:$0xff]  ;;  %v309_v32 = vld [vmem:[%s8704_s14 + $0xe8] sm:$0xff]  ;;  %v385_v35 = vpack.c.bf16 %v364_v30, %v363_v29  ;;  %v310_v39 = vld [vmem:[%s8704_s14 + $0xf0] sm:$0xff] }
  0x26   : > { %7849 = vmatmul.mubr.msk.bf16.gmra.mxu0 %vm391_vm1, %v376_v47  ;;  %v330_v36 = vpack.c.bf16 %v309_v32, %v308_v31  ;;  %v366_v38 = vld [vmem:[%s8704_s14 + $0xf9] sm:$0xff]  ;;  %v367_v41 = vld [vmem:[%s8704_s14 + $0x101] sm:$0xff]  ;;  %v368_v42 = vld [vmem:[%s8704_s14 + $0x109] sm:$0xff] }
  0x27   : > { %7887 = vmatmul.mubr.msk.bf16.gmra.mxu1 %vm391_vm1, %v321_v48  ;;  %7852 = vmatprep.mubr.msk.bf16.mxu0 %vm391_vm1, %v377_v49  ;;  %v311_v40 = vld [vmem:[%s8704_s14 + $0xf8] sm:$0xff]  ;;  %v312_v43 = vld [vmem:[%s8704_s14 + $0x100] sm:$0xff]  ;;  %v313_v44 = vld [vmem:[%s8704_s14 + $0x108] sm:$0xff]  ;;  %v386_v45 = vpack.c.bf16 %v366_v38, %v365_v37  ;;  %v387_v47 = vpack.c.bf16 %v368_v42, %v367_v41 }
  0x28   : > { %7890 = vmatprep.mubr.msk.bf16.mxu1 %vm391_vm1, %v322_v50  ;;  %v331_v46 = vpack.c.bf16 %v311_v40, %v310_v39  ;;  %v332_v48 = vpack.c.bf16 %v313_v44, %v312_v43  ;;  %v369_v49 = vld [vmem:[%s8704_s14 + $0x111] sm:$0xff]  ;;  %v370_v50 = vld [vmem:[%s8704_s14 + $0x119] sm:$0xff]  ;;  %v861_v53 = vld [vmem:[%s8704_s14 + $0x2] sm:$0xff] }
  0x29   : > { %v314_v51 = vld [vmem:[%s8704_s14 + $0x110] sm:$0xff]  ;;  %v315_v52 = vld [vmem:[%s8704_s14 + $0x118] sm:$0xff]  ;;  %v388_v57 = vpack.c.bf16 %v370_v50, %v369_v49  ;;  %v8848_v5 = vld [vmem:[%s12436_s1 + $0xc] sm:$0x3] }
  0x2a   : > { %v862_v54 = vld [vmem:[%s8704_s14 + $0xa] sm:$0xff]  ;;  %v863_v55 = vld [vmem:[%s8704_s14 + $0x12] sm:$0xff]  ;;  %v864_v56 = vld [vmem:[%s8704_s14 + $0x1a] sm:$0xff]  ;;  %v333_v58 = vpack.c.bf16 %v315_v52, %v314_v51 }
  0x2b   : > { %v867_v63 = vld [vmem:[%s8704_s14 + $0x32] sm:$0xff]  ;;  %v868_v0 = vld [vmem:[%s8704_s14 + $0x3a] sm:$0xff]  ;;  %v1193_v26 = vld [vmem:[%s8704_s14 + $0x42] sm:$0xff] }
  0x2c   : > { %v900_v3 = vpack.c.bf16 %v868_v0, %v867_v63  ;;  %v1194_v6 = vld [vmem:[%s8704_s14 + $0x4a] sm:$0xff]  ;;  %v1197_v11 = vld [vmem:[%s8704_s14 + $0x62] sm:$0xff]  ;;  %v875_v13 = vld [vmem:[%s8704_s14 + $0x72] sm:$0xff] }
  0x2d   : > { %v1198_v12 = vld [vmem:[%s8704_s14 + $0x6a] sm:$0xff]  ;;  %v876_v14 = vld [vmem:[%s8704_s14 + $0x7a] sm:$0xff]  ;;  %v1201_v18 = vld [vmem:[%s8704_s14 + $0x82] sm:$0xff] }
  0x2e   : > { %7853 = vmatmul.mubr.msk.bf16.gmra.mxu0 %vm391_vm1, %v378_v59  ;;  %v897_v59 = vpack.c.bf16 %v862_v54, %v861_v53  ;;  %v1228_v15 = vpack.c.bf16 %v1198_v12, %v1197_v11  ;;  %v904_v16 = vpack.c.bf16 %v876_v14, %v875_v13  ;;  %v8870_v17 = vld [vmem:[%s12436_s1 + $0xe] sm:$0x3]  ;;  %v1205_v24 = vld [vmem:[%s8704_s14 + $0xa2] sm:$0xff]  ;;  %v883_v27 = vld [vmem:[%s8704_s14 + $0xb2] sm:$0xff] }
  0x2f   : > { %7891 = vmatmul.mubr.msk.bf16.gmra.mxu1 %vm391_vm1, %v323_v60  ;;  %7856 = vmatprep.mubr.msk.bf16.mxu0 %vm391_vm1, %v379_v61  ;;  %v898_v60 = vpack.c.bf16 %v864_v56, %v863_v55  ;;  %v1189_v61 = vld [vmem:[%s8704_s14 + $0x22] sm:$0xff]  ;;  %v1202_v19 = vld [vmem:[%s8704_s14 + $0x8a] sm:$0xff]  ;;  %v884_v28 = vld [vmem:[%s8704_s14 + $0xba] sm:$0xff] }
  0x30   : > { %7894 = vmatprep.mubr.msk.bf16.mxu1 %vm391_vm1, %v324_v62  ;;  %v1190_v62 = vld [vmem:[%s8704_s14 + $0x2a] sm:$0xff]  ;;  %v908_v30 = vpack.c.bf16 %v884_v28, %v883_v27  ;;  %v1209_v31 = vld [vmem:[%s8704_s14 + $0xc2] sm:$0xff]  ;;  %v891_v39 = vld [vmem:[%s8704_s14 + $0xf2] sm:$0xff] }
  0x31   : > { %v1224_v1 = vpack.c.bf16 %v1190_v62, %v1189_v61  ;;  %v1206_v25 = vld [vmem:[%s8704_s14 + $0xaa] sm:$0xff]  ;;  %v1213_v37 = vld [vmem:[%s8704_s14 + $0xe2] sm:$0xff]  ;;  %v892_v40 = vld [vmem:[%s8704_s14 + $0xfa] sm:$0xff] }
  0x32   : > { %v1232_v29 = vpack.c.bf16 %v1206_v25, %v1205_v24  ;;  %v1210_v32 = vld [vmem:[%s8704_s14 + $0xca] sm:$0xff]  ;;  %v912_v42 = vpack.c.bf16 %v892_v40, %v891_v39  ;;  %v1217_v43 = vld [vmem:[%s8704_s14 + $0x102] sm:$0xff]  ;;  %v1513_v51 = vld [vmem:[%s8704_s14 + $0x13] sm:$0xff] }
  0x33   : > { %v1214_v38 = vld [vmem:[%s8704_s14 + $0xea] sm:$0xff]  ;;  %v1221_v49 = vld [vmem:[%s8704_s14 + $0x122] sm:$0xff]  ;;  %v1839_v53 = vld [vmem:[%s8704_s14 + $0x14] sm:$0xff] }
  0x34   : > { %v1236_v41 = vpack.c.bf16 %v1214_v38, %v1213_v37  ;;  %v1218_v44 = vld [vmem:[%s8704_s14 + $0x10a] sm:$0xff]  ;;  %v1514_v52 = vld [vmem:[%s8704_s14 + $0x1b] sm:$0xff]  ;;  %v1517_v62 = vld [vmem:[%s8704_s14 + $0x33] sm:$0xff] }
  0x35   : > { %v1222_v50 = vld [vmem:[%s8704_s14 + $0x12a] sm:$0xff]  ;;  %v1840_v54 = vld [vmem:[%s8704_s14 + $0x1c] sm:$0xff]  ;;  %v1549_v56 = vpack.c.bf16 %v1514_v52, %v1513_v51  ;;  %v1843_v0 = vld [vmem:[%s8704_s14 + $0x34] sm:$0xff] }
  0x36   : > { %7857 = vmatmul.mubr.msk.bf16.gmra.mxu0 %vm391_vm1, %v380_v7  ;;  %v871_v7 = vld [vmem:[%s8704_s14 + $0x52] sm:$0xff]  ;;  %v1240_v55 = vpack.c.bf16 %v1222_v50, %v1221_v49  ;;  %v1518_v63 = vld [vmem:[%s8704_s14 + $0x3b] sm:$0xff] }
  0x37   : > { %7895 = vmatmul.mubr.msk.bf16.gmra.mxu1 %vm391_vm1, %v325_v8  ;;  %7860 = vmatprep.mubr.msk.bf16.mxu0 %vm391_vm1, %v381_v9  ;;  %v872_v8 = vld [vmem:[%s8704_s14 + $0x5a] sm:$0xff]  ;;  %v1226_v9 = vpack.c.bf16 %v1194_v6, %v1193_v26  ;;  %v1842_v61 = vld [vmem:[%s8704_s14 + $0x2c] sm:$0xff]  ;;  %v1551_v26 = vpack.c.bf16 %v1518_v63, %v1517_v62 }
  0x38   : > { %7898 = vmatprep.mubr.msk.bf16.mxu1 %vm391_vm1, %v326_v10  ;;  %v902_v10 = vpack.c.bf16 %v872_v8, %v871_v7  ;;  %v2602_v7 = vsel %vm446_vm0, %v8870_v17, 0  ;;  %v8948_v8 = vld [vmem:[%s12436_s1 + $0x10] sm:$0x3]  ;;  %v1521_v12 = vld [vmem:[%s8704_s14 + $0x53] sm:$0xff]  ;;  %v1522_v13 = vld [vmem:[%s8704_s14 + $0x5b] sm:$0xff] }
  0x39   : > { %v1846_v11 = vld [vmem:[%s8704_s14 + $0x4c] sm:$0xff]  ;;  %v1847_v14 = vld [vmem:[%s8704_s14 + $0x54] sm:$0xff]  ;;  %v1852_v28 = vld [vmem:[%s8704_s14 + $0x7c] sm:$0xff] }
  0x3a   : > { %v1525_v24 = vld [vmem:[%s8704_s14 + $0x73] sm:$0xff]  ;;  %v1526_v25 = vld [vmem:[%s8704_s14 + $0x7b] sm:$0xff] }
  0x3b   : > { %v1851_v27 = vld [vmem:[%s8704_s14 + $0x74] sm:$0xff]  ;;  %v1856_v40 = vld [vmem:[%s8704_s14 + $0x9c] sm:$0xff] }
  0x3c   : > { %v1529_v37 = vld [vmem:[%s8704_s14 + $0x93] sm:$0xff]  ;;  %v1530_v38 = vld [vmem:[%s8704_s14 + $0x9b] sm:$0xff] }
  0x3d   : > { %v1855_v39 = vld [vmem:[%s8704_s14 + $0x94] sm:$0xff]  ;;  %v1860_v52 = vld [vmem:[%s8704_s14 + $0xbc] sm:$0xff] }
  0x3e   : > { %7861 = vmatmul.mubr.msk.bf16.gmra.mxu0 %vm391_vm1, %v382_v20  ;;  %v879_v20 = vld [vmem:[%s8704_s14 + $0x92] sm:$0xff]  ;;  %v1534_v50 = vld [vmem:[%s8704_s14 + $0xbb] sm:$0xff] }
  0x3f   : > { %7899 = vmatmul.mubr.msk.bf16.gmra.mxu1 %vm391_vm1, %v327_v21  ;;  %7864 = vmatprep.mubr.msk.bf16.mxu0 %vm391_vm1, %v383_v22  ;;  %v880_v21 = vld [vmem:[%s8704_s14 + $0x9a] sm:$0xff]  ;;  %v1230_v22 = vpack.c.bf16 %v1202_v19, %v1201_v18  ;;  %v1553_v18 = vpack.c.bf16 %v1522_v13, %v1521_v12 }
  0x40   : > { %7902 = vmatprep.mubr.msk.bf16.mxu1 %vm391_vm1, %v328_v23  ;;  %v906_v23 = vpack.c.bf16 %v880_v21, %v879_v20  ;;  %v1523_v20 = vld [vmem:[%s8704_s14 + $0x63] sm:$0xff]  ;;  %v1524_v21 = vld [vmem:[%s8704_s14 + $0x6b] sm:$0xff]  ;;  %v1533_v49 = vld [vmem:[%s8704_s14 + $0xb3] sm:$0xff] }
  0x41   : > { %v1859_v51 = vld [vmem:[%s8704_s14 + $0xb4] sm:$0xff] }
  0x42   : > { %v1538_v62 = vld [vmem:[%s8704_s14 + $0xdb] sm:$0xff] }
  0x43   : > { %v1863_v63 = vld [vmem:[%s8704_s14 + $0xd4] sm:$0xff] }
  0x44   : > { %v1542_v12 = vld [vmem:[%s8704_s14 + $0xfb] sm:$0xff] }
  0x45   : > { %v1867_v13 = vld [vmem:[%s8704_s14 + $0xf4] sm:$0xff] }
  0x46   : > { %7865 = vmatmul.mubr.msk.bf16.gmra.mxu0 %vm391_vm1, %v384_v33  ;;  %v887_v33 = vld [vmem:[%s8704_s14 + $0xd2] sm:$0xff] }
  0x47   : > { %7903 = vmatmul.mubr.msk.bf16.gmra.mxu1 %vm391_vm1, %v329_v34  ;;  %7868 = vmatprep.mubr.msk.bf16.mxu0 %vm391_vm1, %v385_v35  ;;  %v888_v34 = vld [vmem:[%s8704_s14 + $0xda] sm:$0xff]  ;;  %v1234_v35 = vpack.c.bf16 %v1210_v32, %v1209_v31  ;;  %v1555_v31 = vpack.c.bf16 %v1526_v25, %v1525_v24  ;;  %v8985_v32 = vpack.c.bf16 %v1852_v28, %v1851_v27  ;;  %v1544_v24 = vld [vmem:[%s8704_s14 + $0x10b] sm:$0xff] }
  0x48   : > { %7906 = vmatprep.mubr.msk.bf16.mxu1 %vm391_vm1, %v330_v36  ;;  %v910_v36 = vpack.c.bf16 %v888_v34, %v887_v33  ;;  %v1527_v33 = vld [vmem:[%s8704_s14 + $0x83] sm:$0xff]  ;;  %v1528_v34 = vld [vmem:[%s8704_s14 + $0x8b] sm:$0xff] }
  0x49   : > { %v1869_v25 = vld [vmem:[%s8704_s14 + $0x104] sm:$0xff] }
  0x4e   : > { %7869 = vmatmul.mubr.msk.bf16.gmra.mxu0 %vm391_vm1, %v386_v45  ;;  %v895_v45 = vld [vmem:[%s8704_s14 + $0x112] sm:$0xff] }
  0x4f   : > { %7907 = vmatmul.mubr.msk.bf16.gmra.mxu1 %vm391_vm1, %v331_v46  ;;  %7872 = vmatprep.mubr.msk.bf16.mxu0 %vm391_vm1, %v387_v47  ;;  %v896_v46 = vld [vmem:[%s8704_s14 + $0x11a] sm:$0xff]  ;;  %v1238_v47 = vpack.c.bf16 %v1218_v44, %v1217_v43  ;;  %v1557_v43 = vpack.c.bf16 %v1530_v38, %v1529_v37  ;;  %v9003_v44 = vpack.c.bf16 %v1856_v40, %v1855_v39 }
  0x50   : > { %7910 = vmatprep.mubr.msk.bf16.mxu1 %vm391_vm1, %v332_v48  ;;  %v914_v48 = vpack.c.bf16 %v896_v46, %v895_v45  ;;  %v1531_v45 = vld [vmem:[%s8704_s14 + $0xa3] sm:$0xff]  ;;  %v1532_v46 = vld [vmem:[%s8704_s14 + $0xab] sm:$0xff] }
  0x56   : > { %7873 = vmatmul.mubr.msk.bf16.gmra.mxu0 %vm391_vm1, %v388_v57  ;;  %v1875_v57 = vpack.c.bf16 %v1840_v54, %v1839_v53  ;;  %v1558_v53 = vpack.c.bf16 %v1532_v46, %v1531_v45 }
  0x57   : > { %7911 = vmatmul.mubr.msk.bf16.gmra.mxu1 %vm391_vm1, %v333_v58  ;;  %7916 = vmatprep.mubr.msk.bf16.mxu0 %vm391_vm1, %v897_v59  ;;  %v1515_v58 = vld [vmem:[%s8704_s14 + $0x23] sm:$0xff]  ;;  %v1516_v59 = vld [vmem:[%s8704_s14 + $0x2b] sm:$0xff] }
  0x58   : > { %7954 = vmatprep.mubr.msk.bf16.mxu1 %vm391_vm1, %v898_v60 }
  0x5e   : > { %7917 = vmatmul.mubr.msk.bf16.vlgmr.msra.gmra.mxu0 %vm391_vm1, %v898_v60  ;;  %v1841_v60 = vld [vmem:[%s8704_s14 + $0x24] sm:$0xff] }
  0x5f   : > { %7991 = vmatpush3.bf16.msra.mxu0 %v1624_v2  ;;  %7955 = vmatmul.mubr.msk.bf16.vlgmr.msra.gmra.mxu1 %vm391_vm1, %v1224_v1  ;;  %v1550_v2 = vpack.c.bf16 %v1516_v59, %v1515_v58  ;;  %v1536_v58 = vld [vmem:[%s8704_s14 + $0xcb] sm:$0xff] }
  0x60   : > { %7920 = vmatprep.mubr.msk.bf16.mxu0 %vm391_vm1, %v1224_v1  ;;  %7958 = vmatprep.mubr.msk.bf16.mxu1 %vm391_vm1, %v900_v3  ;;  %v1844_v1 = vld [vmem:[%s8704_s14 + $0x3c] sm:$0xff]  ;;  %v1861_v59 = vld [vmem:[%s8704_s14 + $0xc4] sm:$0xff] }
  0x61   : > { %8029 = vmatpush3.bf16.msra.mxu1 %v1950_v4  ;;  %8528 = vmatprep.subr.msk.bf16.mxu0 %vm446_vm0, %v8848_v5  ;;  %v2276_v4 = vsel %vm446_vm0, %v8848_v5, 0  ;;  %v8940_v6 = vpack.c.bf16 %v1844_v1, %v1843_v0  ;;  %v1519_v5 = vld [vmem:[%s8704_s14 + $0x43] sm:$0xff] }
  0x62   : > { %8529 = vmatprep.subr.msk.bf16.mxu1 %vm446_vm0, %v8870_v17  ;;  %v1864_v0 = vld [vmem:[%s8704_s14 + $0xdc] sm:$0xff] }
  0x66   : > { %7921 = vmatmul.mubr.msk.bf16.gmra.mxu0 %vm391_vm1, %v900_v3  ;;  %v8936_v3 = vpack.c.bf16 %v1842_v61, %v1841_v60  ;;  %v1862_v60 = vld [vmem:[%s8704_s14 + $0xcc] sm:$0xff] }
  0x67   : > { %7959 = vmatmul.mubr.msk.bf16.gmra.mxu1 %vm391_vm1, %v1226_v9  ;;  %7924 = vmatprep.mubr.msk.bf16.mxu0 %vm391_vm1, %v1226_v9  ;;  %v1520_v9 = vld [vmem:[%s8704_s14 + $0x4b] sm:$0xff]  ;;  %v1537_v61 = vld [vmem:[%s8704_s14 + $0xd3] sm:$0xff] }
  0x68   : > { %7962 = vmatprep.mubr.msk.bf16.mxu1 %vm391_vm1, %v902_v10 }
  0x6e   : > { %7925 = vmatmul.mubr.msk.bf16.gmra.mxu0 %vm391_vm1, %v902_v10  ;;  %v1845_v10 = vld [vmem:[%s8704_s14 + $0x44] sm:$0xff] }
  0x6f   : > { %7963 = vmatmul.mubr.msk.bf16.gmra.mxu1 %vm391_vm1, %v1228_v15  ;;  %7928 = vmatprep.mubr.msk.bf16.mxu0 %vm391_vm1, %v1228_v15  ;;  %v1848_v15 = vld [vmem:[%s8704_s14 + $0x5c] sm:$0xff]  ;;  %v8965_v17 = vpack.c.bf16 %v1846_v11, %v1845_v10  ;;  %v1866_v10 = vld [vmem:[%s8704_s14 + $0xec] sm:$0xff] }
  0x70   : > { %7966 = vmatprep.mubr.msk.bf16.mxu1 %vm391_vm1, %v904_v16  ;;  %v8967_v19 = vpack.c.bf16 %v1848_v15, %v1847_v14  ;;  %v1541_v11 = vld [vmem:[%s8704_s14 + $0xf3] sm:$0xff]  ;;  %v1868_v14 = vld [vmem:[%s8704_s14 + $0xfc] sm:$0xff] }
  0x76   : > { %7929 = vmatmul.mubr.msk.bf16.gmra.mxu0 %vm391_vm1, %v904_v16  ;;  %v1552_v16 = vpack.c.bf16 %v1520_v9, %v1519_v5  ;;  %v1540_v5 = vld [vmem:[%s8704_s14 + $0xeb] sm:$0xff] }
  0x77   : > { %7967 = vmatmul.mubr.msk.bf16.gmra.mxu1 %vm391_vm1, %v1230_v22  ;;  %7932 = vmatprep.mubr.msk.bf16.mxu0 %vm391_vm1, %v1230_v22  ;;  %v1849_v22 = vld [vmem:[%s8704_s14 + $0x64] sm:$0xff] }
  0x78   : > { %7970 = vmatprep.mubr.msk.bf16.mxu1 %vm391_vm1, %v906_v23  ;;  %v1865_v9 = vld [vmem:[%s8704_s14 + $0xe4] sm:$0xff] }
  0x7e   : > { %7933 = vmatmul.mubr.msk.bf16.gmra.mxu0 %vm391_vm1, %v906_v23  ;;  %v1850_v23 = vld [vmem:[%s8704_s14 + $0x6c] sm:$0xff] }
  0x7f   : > { %7971 = vmatmul.mubr.msk.bf16.gmra.mxu1 %vm391_vm1, %v1232_v29  ;;  %7936 = vmatprep.mubr.msk.bf16.mxu0 %vm391_vm1, %v1232_v29  ;;  %v1554_v29 = vpack.c.bf16 %v1524_v21, %v1523_v20  ;;  %v9057_v20 = vpack.c.bf16 %v1868_v14, %v1867_v13 }
  0x80   : > { %7974 = vmatprep.mubr.msk.bf16.mxu1 %vm391_vm1, %v908_v30 }
  0x86   : > { %7937 = vmatmul.mubr.msk.bf16.gmra.mxu0 %vm391_vm1, %v908_v30  ;;  %v8983_v30 = vpack.c.bf16 %v1850_v23, %v1849_v22  ;;  %v1543_v23 = vld [vmem:[%s8704_s14 + $0x103] sm:$0xff] }
  0x87   : > { %7975 = vmatmul.mubr.msk.bf16.gmra.mxu1 %vm391_vm1, %v1234_v35  ;;  %7940 = vmatprep.mubr.msk.bf16.mxu0 %vm391_vm1, %v1234_v35  ;;  %v1853_v35 = vld [vmem:[%s8704_s14 + $0x84] sm:$0xff]  ;;  %v1564_v39 = vpack.c.bf16 %v1544_v24, %v1543_v23 }
  0x88   : > { %7978 = vmatprep.mubr.msk.bf16.mxu1 %vm391_vm1, %v910_v36  ;;  %v2495_v24 = vld [vmem:[%s8704_s14 + $0x45] sm:$0xff] }
  0x8e   : > { %7941 = vmatmul.mubr.msk.bf16.gmra.mxu0 %vm391_vm1, %v910_v36  ;;  %v1854_v36 = vld [vmem:[%s8704_s14 + $0x8c] sm:$0xff] }
  0x8f   : > { %7979 = vmatmul.mubr.msk.bf16.gmra.mxu1 %vm391_vm1, %v1236_v41  ;;  %7944 = vmatprep.mubr.msk.bf16.mxu0 %vm391_vm1, %v1236_v41  ;;  %v1556_v41 = vpack.c.bf16 %v1528_v34, %v1527_v33  ;;  %v1546_v33 = vld [vmem:[%s8704_s14 + $0x11b] sm:$0xff] }
  0x90   : > { %7982 = vmatprep.mubr.msk.bf16.mxu1 %vm391_vm1, %v912_v42 }
  0x96   : > { %7945 = vmatmul.mubr.msk.bf16.gmra.mxu0 %vm391_vm1, %v912_v42  ;;  %v9001_v42 = vpack.c.bf16 %v1854_v36, %v1853_v35  ;;  %v1871_v35 = vld [vmem:[%s8704_s14 + $0x114] sm:$0xff]  ;;  %v1872_v36 = vld [vmem:[%s8704_s14 + $0x11c] sm:$0xff] }
  0x97   : > { %7983 = vmatmul.mubr.msk.bf16.gmra.mxu1 %vm391_vm1, %v1238_v47  ;;  %7948 = vmatprep.mubr.msk.bf16.mxu0 %vm391_vm1, %v1238_v47  ;;  %v1857_v47 = vld [vmem:[%s8704_s14 + $0xa4] sm:$0xff] }
  0x98   : > { %7986 = vmatprep.mubr.msk.bf16.mxu1 %vm391_vm1, %v914_v48 }
  0x9e   : > { %7949 = vmatmul.mubr.msk.bf16.gmra.mxu0 %vm391_vm1, %v914_v48  ;;  %v1858_v48 = vld [vmem:[%s8704_s14 + $0xac] sm:$0xff] }
  0x9f   : > { %7987 = vmatmul.mubr.msk.bf16.gmra.mxu1 %vm391_vm1, %v1240_v55  ;;  %7992 = vmatprep.mubr.msk.bf16.mxu0 %vm391_vm1, %v1549_v56  ;;  %v9019_v54 = vpack.c.bf16 %v1858_v48, %v1857_v47  ;;  %v1559_v55 = vpack.c.bf16 %v1534_v50, %v1533_v49  ;;  %v9021_v56 = vpack.c.bf16 %v1860_v52, %v1859_v51  ;;  %v1547_v52 = vld [vmem:[%s8704_s14 + $0x123] sm:$0xff] }
  0xa0   : > { %8030 = vmatprep.mubr.msk.bf16.mxu1 %vm391_vm1, %v1875_v57  ;;  %v1535_v57 = vld [vmem:[%s8704_s14 + $0xc3] sm:$0xff]  ;;  %v9081_v47 = vpack.c.bf16 %v1872_v36, %v1871_v35  ;;  %v2928_v35 = vsel %vm446_vm0, %v8948_v8, 0 }
  0xa1   : > { %v1560_v1 = vpack.c.bf16 %v1536_v58, %v1535_v57  ;;  %v1873_v58 = vld [vmem:[%s8704_s14 + $0x124] sm:$0xff] }
  0xa6   : > { %7993 = vmatmul.mubr.msk.bf16.vlgmr.msra.gmra.mxu0 %vm391_vm1, %v1550_v2  ;;  %v9037_v2 = vpack.c.bf16 %v1862_v60, %v1861_v59  ;;  %v1874_v59 = vld [vmem:[%s8704_s14 + $0x12c] sm:$0xff] }
  0xa7   : > { %8067 = vmatpush3.bf16.msra.mxu0 %v2276_v4  ;;  %8031 = vmatmul.mubr.msk.bf16.vlgmr.msra.gmra.mxu1 %vm391_vm1, %v8936_v3  ;;  %v1561_v4 = vpack.c.bf16 %v1538_v62, %v1537_v61  ;;  %v2491_v61 = vld [vmem:[%s8704_s14 + $0x25] sm:$0xff]  ;;  %v2492_v62 = vld [vmem:[%s8704_s14 + $0x2d] sm:$0xff] }
  0xa8   : > { %7996 = vmatprep.mubr.msk.bf16.mxu0 %vm391_vm1, %v1551_v26  ;;  %8034 = vmatprep.mubr.msk.bf16.mxu1 %vm391_vm1, %v8940_v6  ;;  %v9039_v26 = vpack.c.bf16 %v1864_v0, %v1863_v63 }
  0xa9   : > { %8105 = vmatpush3.bf16.msra.mxu1 %v2602_v7  ;;  %8530 = vmatprep.subr.msk.bf16.mxu0 %vm446_vm0, %v8948_v8  ;;  %v1539_v7 = vld [vmem:[%s8704_s14 + $0xe3] sm:$0xff]  ;;  %v2497_v8 = vld [vmem:[%s8704_s14 + $0x55] sm:$0xff] }
  0xaa   : > { %v1562_v15 = vpack.c.bf16 %v1540_v5, %v1539_v7  ;;  %v9101_v7 = vpack.c.bf16 %v1874_v59, %v1873_v58 }
  0xae   : > { %7997 = vmatmul.mubr.msk.bf16.gmra.mxu0 %vm391_vm1, %v1552_v16  ;;  %v9055_v16 = vpack.c.bf16 %v1866_v10, %v1865_v9  ;;  %v2527_v10 = vpack.c.bf16 %v2492_v62, %v2491_v61 }
  0xaf   : > { %8035 = vmatmul.mubr.msk.bf16.gmra.mxu1 %vm391_vm1, %v8965_v17  ;;  %8000 = vmatprep.mubr.msk.bf16.mxu0 %vm391_vm1, %v1553_v18  ;;  %v1563_v18 = vpack.c.bf16 %v1542_v12, %v1541_v11 }
  0xb0   : > { %8038 = vmatprep.mubr.msk.bf16.mxu1 %vm391_vm1, %v8967_v19 }
  0xb6   : > { %8001 = vmatmul.mubr.msk.bf16.gmra.mxu0 %vm391_vm1, %v1554_v29  ;;  %v1870_v29 = vld [vmem:[%s8704_s14 + $0x10c] sm:$0xff] }
  0xb7   : > { %8039 = vmatmul.mubr.msk.bf16.gmra.mxu1 %vm391_vm1, %v8983_v30  ;;  %8004 = vmatprep.mubr.msk.bf16.mxu0 %vm391_vm1, %v1555_v31  ;;  %v1545_v31 = vld [vmem:[%s8704_s14 + $0x113] sm:$0xff] }
  0xb8   : > { %8042 = vmatprep.mubr.msk.bf16.mxu1 %vm391_vm1, %v8985_v32 }
  0xbe   : > { %8005 = vmatmul.mubr.msk.bf16.gmra.mxu0 %vm391_vm1, %v1556_v41  ;;  %v9077_v41 = vpack.c.bf16 %v1870_v29, %v1869_v25  ;;  %v2496_v25 = vld [vmem:[%s8704_s14 + $0x4d] sm:$0xff] }
  0xbf   : > { %8043 = vmatmul.mubr.msk.bf16.gmra.mxu1 %vm391_vm1, %v9001_v42  ;;  %8008 = vmatprep.mubr.msk.bf16.mxu0 %vm391_vm1, %v1557_v43  ;;  %v1565_v43 = vpack.c.bf16 %v1546_v33, %v1545_v31  ;;  %v2529_v36 = vpack.c.bf16 %v2496_v25, %v2495_v24 }
  0xc0   : > { %8046 = vmatprep.mubr.msk.bf16.mxu1 %vm391_vm1, %v9003_v44 }
  0xc6   : > { %8009 = vmatmul.mubr.msk.bf16.gmra.mxu0 %vm391_vm1, %v1558_v53  ;;  %v1548_v53 = vld [vmem:[%s8704_s14 + $0x12b] sm:$0xff] }
  0xc7   : > { %8047 = vmatmul.mubr.msk.bf16.gmra.mxu1 %vm391_vm1, %v9019_v54  ;;  %8012 = vmatprep.mubr.msk.bf16.mxu0 %vm391_vm1, %v1559_v55 }
  0xc8   : > { %8050 = vmatprep.mubr.msk.bf16.mxu1 %vm391_vm1, %v9021_v56 }
  0xce   : > { %8013 = vmatmul.mubr.msk.bf16.gmra.mxu0 %vm391_vm1, %v1560_v1  ;;  %v1566_v1 = vpack.c.bf16 %v1548_v53, %v1547_v52  ;;  %v2499_v52 = vld [vmem:[%s8704_s14 + $0x65] sm:$0xff]  ;;  %v2500_v53 = vld [vmem:[%s8704_s14 + $0x6d] sm:$0xff] }
  0xcf   : > { %8051 = vmatmul.mubr.msk.bf16.gmra.mxu1 %vm391_vm1, %v9037_v2  ;;  %8016 = vmatprep.mubr.msk.bf16.mxu0 %vm391_vm1, %v1561_v4 }
  0xd0   : > { %8054 = vmatprep.mubr.msk.bf16.mxu1 %vm391_vm1, %v9039_v26 }
  0xd6   : > { %v7842_v21 = vpop.f32.mrf.mxu0  ;;  %8017 = vmatmul.mubr.msk.bf16.gmra.mxu0 %vm391_vm1, %v1562_v15 }
  0xd7   : > { %v7880_v22 = vpop.f32.mrf.mxu1  ;;  %8055 = vmatmul.mubr.msk.bf16.gmra.mxu1 %vm391_vm1, %v9055_v16  ;;  %8020 = vmatprep.mubr.msk.bf16.mxu0 %vm391_vm1, %v1563_v18 }
  0xd8   : > { %v9066_v27 = vadd.f32 %v7880_v22, %v7842_v21  ;;  %v484_v28 = vpop.f32.mrf.mxu0  ;;  %8058 = vmatprep.mubr.msk.bf16.mxu1 %vm391_vm1, %v9057_v20  ;;  %v2493_v21 = vld [vmem:[%s8704_s14 + $0x35] sm:$0xff]  ;;  %v2494_v22 = vld [vmem:[%s8704_s14 + $0x3d] sm:$0xff] }
  0xd9   : > { %v718_v34 = vpop.f32.mrf.mxu1  ;;  %v2528_v33 = vpack.c.bf16 %v2494_v22, %v2493_v21  ;;  %v2504_v21 = vld [vmem:[%s8704_s14 + $0x8d] sm:$0xff] }
  0xda   : > { %v9075_v37 = vadd.f32 %v718_v34, %v484_v28  ;;  %v7843_v38 = vpop.f32.mrf.mxu0 }
  0xdb   : > { %v7881_v40 = vpop.f32.mrf.mxu1 }
  0xdc   : > { %v9079_v45 = vadd.f32 %v7881_v40, %v7843_v38  ;;  %v487_v46 = vpop.f32.mrf.mxu0 }
  0xdd   : > { %v721_v48 = vpop.f32.mrf.mxu1 }
  0xde   : > { %v9083_v49 = vadd.f32 %v721_v48, %v487_v46  ;;  %v7846_v50 = vpop.f32.mrf.mxu0  ;;  %8021 = vmatmul.mubr.msk.bf16.gmra.mxu0 %vm391_vm1, %v1564_v39 }
  0xdf   : > { %v7884_v51 = vpop.f32.mrf.mxu1  ;;  %8059 = vmatmul.mubr.msk.bf16.gmra.mxu1 %vm391_vm1, %v9077_v41  ;;  %8024 = vmatprep.mubr.msk.bf16.mxu0 %vm391_vm1, %v1565_v43 }
  0xe0   : > { %v9091_v55 = vadd.f32 %v7884_v51, %v7846_v50  ;;  %v500_v57 = vpop.f32.mrf.mxu0  ;;  %8062 = vmatprep.mubr.msk.bf16.mxu1 %vm391_vm1, %v9081_v47  ;;  %v2498_v50 = vld [vmem:[%s8704_s14 + $0x5d] sm:$0xff] }
  0xe1   : > { %v734_v60 = vpop.f32.mrf.mxu1  ;;  %v2530_v59 = vpack.c.bf16 %v2498_v50, %v2497_v8  ;;  %v2507_v8 = vld [vmem:[%s8704_s14 + $0xa5] sm:$0xff]  ;;  %v2508_v50 = vld [vmem:[%s8704_s14 + $0xad] sm:$0xff] }
  0xe2   : > { %v9099_v63 = vadd.f32 %v734_v60, %v500_v57  ;;  %v7847_v0 = vpop.f32.mrf.mxu0 }
  0xe3   : > { %v7885_v4 = vpop.f32.mrf.mxu1 }
  0xe4   : > { %v9103_v5 = vadd.f32 %v7885_v4, %v7847_v0  ;;  %v503_v9 = vpop.f32.mrf.mxu0 }
  0xe5   : > { %v737_v11 = vpop.f32.mrf.mxu1 }
  0xe6   : > { %v9105_v12 = vadd.f32 %v737_v11, %v503_v9  ;;  %v7850_v13 = vpop.f32.mrf.mxu0  ;;  %8025 = vmatmul.mubr.msk.bf16.gmra.mxu0 %vm391_vm1, %v1566_v1  ;;  %v2501_v11 = vld [vmem:[%s8704_s14 + $0x75] sm:$0xff] }
  0xe7   : > { %v7888_v14 = vpop.f32.mrf.mxu1  ;;  %8063 = vmatmul.mubr.msk.bf16.gmra.mxu1 %vm391_vm1, %v9101_v7  ;;  %8068 = vmatprep.mubr.msk.bf16.mxu0 %vm391_vm1, %v8936_v3 }
  0xe8   : > { %v9112_v15 = vadd.f32 %v7888_v14, %v7850_v13  ;;  %v516_v18 = vpop.f32.mrf.mxu0  ;;  %8106 = vmatprep.mubr.msk.bf16.mxu1 %vm391_vm1, %v2527_v10  ;;  %v2502_v13 = vld [vmem:[%s8704_s14 + $0x7d] sm:$0xff] }
  0xe9   : > { %v750_v23 = vpop.f32.mrf.mxu1  ;;  %v2532_v24 = vpack.c.bf16 %v2502_v13, %v2501_v11  ;;  %v2510_v11 = vld [vmem:[%s8704_s14 + $0xbd] sm:$0xff] }
  0xea   : > { %v9119_v28 = vadd.f32 %v750_v23, %v516_v18  ;;  %v7851_v29 = vpop.f32.mrf.mxu0  ;;  %v2503_v18 = vld [vmem:[%s8704_s14 + $0x85] sm:$0xff] }
  0xeb   : > { %v7889_v31 = vpop.f32.mrf.mxu1 }
  0xec   : > { %v9121_v34 = vadd.f32 %v7889_v31, %v7851_v29  ;;  %v519_v3 = vpop.f32.mrf.mxu0  ;;  %v2533_v29 = vpack.c.bf16 %v2504_v21, %v2503_v18  ;;  %v2512_v18 = vld [vmem:[%s8704_s14 + $0xcd] sm:$0xff] }
  0xed   : > { %v753_v38 = vpop.f32.mrf.mxu1 }
  0xee   : > { %v9125_v39 = vadd.f32 %v753_v38, %v519_v3  ;;  %v7854_v40 = vpop.f32.mrf.mxu0  ;;  %8069 = vmatmul.mubr.msk.bf16.vlgmr.msra.gmra.mxu0 %vm391_vm1, %v8940_v6 }
  0xef   : > { %v7892_v43 = vpop.f32.mrf.mxu1  ;;  %8143 = vmatpush3.bf16.msra.mxu0 %v2928_v35  ;;  %8107 = vmatmul.mubr.msk.bf16.vlgmr.msra.gmra.mxu1 %vm391_vm1, %v2528_v33 }
  0xf0   : > { %v9130_v46 = vadd.f32 %v7892_v43, %v7854_v40  ;;  %v532_v48 = vpop.f32.mrf.mxu0  ;;  %8072 = vmatprep.mubr.msk.bf16.mxu0 %vm391_vm1, %v8965_v17  ;;  %8110 = vmatprep.mubr.msk.bf16.mxu1 %vm391_vm1, %v2529_v36  ;;  %v2531_v17 = vpack.c.bf16 %v2500_v53, %v2499_v52  ;;  %v2505_v40 = vld [vmem:[%s8704_s14 + $0x95] sm:$0xff]  ;;  %v2506_v43 = vld [vmem:[%s8704_s14 + $0x9d] sm:$0xff] }
  0xf1   : > { %v766_v51 = vpop.f32.mrf.mxu1  ;;  %v2534_v53 = vpack.c.bf16 %v2506_v43, %v2505_v40  ;;  %v2513_v43 = vld [vmem:[%s8704_s14 + $0xd5] sm:$0xff] }
  0xf2   : > { %v9139_v57 = vadd.f32 %v766_v51, %v532_v48  ;;  %v7855_v6 = vpop.f32.mrf.mxu0 }
  0xf3   : > { %v7893_v58 = vpop.f32.mrf.mxu1 }
  0xf4   : > { %v9141_v60 = vadd.f32 %v7893_v58, %v7855_v6  ;;  %v535_v61 = vpop.f32.mrf.mxu0  ;;  %v2535_v58 = vpack.c.bf16 %v2508_v50, %v2507_v8  ;;  %v2515_v50 = vld [vmem:[%s8704_s14 + $0xe5] sm:$0xff] }
  0xf5   : > { %v769_v62 = vpop.f32.mrf.mxu1 }
  0xf6   : > { %v9143_v0 = vadd.f32 %v769_v62, %v535_v61  ;;  %v7858_v1 = vpop.f32.mrf.mxu0  ;;  %8073 = vmatmul.mubr.msk.bf16.gmra.mxu0 %vm391_vm1, %v8967_v19 }
  0xf7   : > { %v7896_v4 = vpop.f32.mrf.mxu1  ;;  %8111 = vmatmul.mubr.msk.bf16.gmra.mxu1 %vm391_vm1, %v2530_v59  ;;  %8076 = vmatprep.mubr.msk.bf16.mxu0 %vm391_vm1, %v8983_v30 }
  0xf8   : > { %v9150_v9 = vadd.f32 %v7896_v4, %v7858_v1  ;;  %v548_v10 = vpop.f32.mrf.mxu0  ;;  %8114 = vmatprep.mubr.msk.bf16.mxu1 %vm391_vm1, %v2531_v17 }
  0xf9   : > { %v782_v14 = vpop.f32.mrf.mxu1 }
  0xfa   : > { %v9157_v22 = vadd.f32 %v782_v14, %v548_v10  ;;  %v7859_v23 = vpop.f32.mrf.mxu0  ;;  %v2509_v10 = vld [vmem:[%s8704_s14 + $0xb5] sm:$0xff]  ;;  %v2511_v14 = vld [vmem:[%s8704_s14 + $0xc5] sm:$0xff] }
  0xfb   : > { %v7897_v19 = vpop.f32.mrf.mxu1 }
  0xfc   : > { %v9159_v25 = vadd.f32 %v7897_v19, %v7859_v23  ;;  %v551_v30 = vpop.f32.mrf.mxu0  ;;  %v2536_v19 = vpack.c.bf16 %v2510_v11, %v2509_v10 }
  0xfd   : > { %v785_v31 = vpop.f32.mrf.mxu1 }
  0xfe   : > { %v9161_v33 = vadd.f32 %v785_v31, %v551_v30  ;;  %v7862_v3 = vpop.f32.mrf.mxu0  ;;  %8077 = vmatmul.mubr.msk.bf16.gmra.mxu0 %vm391_vm1, %v8985_v32  ;;  %v2537_v30 = vpack.c.bf16 %v2512_v18, %v2511_v14  ;;  %v2517_v14 = vld [vmem:[%s8704_s14 + $0xf5] sm:$0xff]  ;;  %v2518_v18 = vld [vmem:[%s8704_s14 + $0xfd] sm:$0xff] }
  0xff   : > { %v7900_v35 = vpop.f32.mrf.mxu1  ;;  %8115 = vmatmul.mubr.msk.bf16.gmra.mxu1 %vm391_vm1, %v2532_v24  ;;  %8080 = vmatprep.mubr.msk.bf16.mxu0 %vm391_vm1, %v9001_v42 }
 0x100   : > { %v9168_v36 = vadd.f32 %v7900_v35, %v7862_v3  ;;  %v564_v38 = vpop.f32.mrf.mxu0  ;;  %8118 = vmatprep.mubr.msk.bf16.mxu1 %vm391_vm1, %v2533_v29 }
 0x101   : > { %v798_v48 = vpop.f32.mrf.mxu1 }
 0x102   : > { %v9175_v51 = vadd.f32 %v798_v48, %v564_v38  ;;  %v7863_v52 = vpop.f32.mrf.mxu0  ;;  %v2514_v48 = vld [vmem:[%s8704_s14 + $0xdd] sm:$0xff] }
 0x103   : > { %v7901_v32 = vpop.f32.mrf.mxu1 }
 0x104   : > { %v9177_v6 = vadd.f32 %v7901_v32, %v7863_v52  ;;  %v567_v42 = vpop.f32.mrf.mxu0  ;;  %v2516_v52 = vld [vmem:[%s8704_s14 + $0xed] sm:$0xff] }
 0x105   : > { %v801_v59 = vpop.f32.mrf.mxu1 }
 0x106   : > { %v9179_v61 = vadd.f32 %v801_v59, %v567_v42  ;;  %v7866_v17 = vpop.f32.mrf.mxu0  ;;  %8081 = vmatmul.mubr.msk.bf16.gmra.mxu0 %vm391_vm1, %v9003_v44  ;;  %v2538_v42 = vpack.c.bf16 %v2514_v48, %v2513_v43  ;;  %v2539_v59 = vpack.c.bf16 %v2516_v52, %v2515_v50  ;;  %v2521_v52 = vld [vmem:[%s8704_s14 + $0x115] sm:$0xff] }
 0x107   : > { %v7904_v62 = vpop.f32.mrf.mxu1  ;;  %8119 = vmatmul.mubr.msk.bf16.gmra.mxu1 %vm391_vm1, %v2534_v53  ;;  %8084 = vmatprep.mubr.msk.bf16.mxu0 %vm391_vm1, %v9019_v54 }
 0x108   : > { %v9186_v1 = vadd.f32 %v7904_v62, %v7866_v17  ;;  %v580_v4 = vpop.f32.mrf.mxu0  ;;  %8122 = vmatprep.mubr.msk.bf16.mxu1 %vm391_vm1, %v2535_v58 }
 0x109   : > { %v814_v13 = vpop.f32.mrf.mxu1 }
 0x10a   : > { %v9193_v21 = vadd.f32 %v814_v13, %v580_v4  ;;  %v7867_v23 = vpop.f32.mrf.mxu0 }
 0x10b   : > { %v7905_v44 = vpop.f32.mrf.mxu1 }
 0x10c   : > { %v9195_v24 = vadd.f32 %v7905_v44, %v7867_v23  ;;  %v583_v54 = vpop.f32.mrf.mxu0  ;;  %v2519_v44 = vld [vmem:[%s8704_s14 + $0x105] sm:$0xff] }
 0x10d   : > { %v817_v29 = vpop.f32.mrf.mxu1 }
 0x10e   : > { %v9197_v31 = vadd.f32 %v817_v29, %v583_v54  ;;  %v7870_v3 = vpop.f32.mrf.mxu0  ;;  %8085 = vmatmul.mubr.msk.bf16.gmra.mxu0 %vm391_vm1, %v9021_v56  ;;  %v2540_v29 = vpack.c.bf16 %v2518_v18, %v2517_v14 }
 0x10f   : > { %v7908_v35 = vpop.f32.mrf.mxu1  ;;  %8123 = vmatmul.mubr.msk.bf16.gmra.mxu1 %vm391_vm1, %v2536_v19  ;;  %8088 = vmatprep.mubr.msk.bf16.mxu0 %vm391_vm1, %v9037_v2  ;;  %v2520_v19 = vld [vmem:[%s8704_s14 + $0x10d] sm:$0xff] }
 0x110   : > { %v9204_v38 = vadd.f32 %v7908_v35, %v7870_v3  ;;  %v596_v40 = vpop.f32.mrf.mxu0  ;;  %8126 = vmatprep.mubr.msk.bf16.mxu1 %vm391_vm1, %v2537_v30  ;;  %v2541_v35 = vpack.c.bf16 %v2520_v19, %v2519_v44 }
 0x111   : > { %v830_v8 = vpop.f32.mrf.mxu1 }
 0x112   : > { %v9211_v32 = vadd.f32 %v830_v8, %v596_v40  ;;  %v7871_v53 = vpop.f32.mrf.mxu0 }
 0x113   : > { %v7909_v56 = vpop.f32.mrf.mxu1 }
 0x114   : > { %v9213_v58 = vadd.f32 %v7909_v56, %v7871_v53  ;;  %v599_v2 = vpop.f32.mrf.mxu0  ;;  %v2522_v53 = vld [vmem:[%s8704_s14 + $0x11d] sm:$0xff] }
 0x115   : > { %v833_v17 = vpop.f32.mrf.mxu1 }
 0x116   : > { %v9215_v62 = vadd.f32 %v833_v17, %v599_v2  ;;  %v7874_v4 = vpop.f32.mrf.mxu0  ;;  %8089 = vmatmul.mubr.msk.bf16.gmra.mxu0 %vm391_vm1, %v9039_v26 }
 0x117   : > { %v7912_v10 = vpop.f32.mrf.mxu1  ;;  %8127 = vmatmul.mubr.msk.bf16.gmra.mxu1 %vm391_vm1, %v2538_v42  ;;  %8092 = vmatprep.mubr.msk.bf16.mxu0 %vm391_vm1, %v9055_v16 }
 0x118   : > { %v9222_v11 = vadd.f32 %v7912_v10, %v7874_v4  ;;  %v612_v13 = vpop.f32.mrf.mxu0  ;;  %8130 = vmatprep.mubr.msk.bf16.mxu1 %vm391_vm1, %v2539_v59  ;;  %v2523_v59 = vld [vmem:[%s8704_s14 + $0x125] sm:$0xff]  ;;  %v2542_v10 = vpack.c.bf16 %v2522_v53, %v2521_v52 }
 0x119   : > { %v846_v23 = vpop.f32.mrf.mxu1 }
 0x11a   : > { %v9229_v54 = vadd.f32 %v846_v23, %v612_v13  ;;  %v7875_v26 = vpop.f32.mrf.mxu0 }
 0x11b   : > { %v7913_v30 = vpop.f32.mrf.mxu1 }
 0x11c   : > { %v9231_v3 = vadd.f32 %v7913_v30, %v7875_v26  ;;  %v9233_v16 = vpop.f32.mrf.mxu0  ;;  %v2199_v26 = vld [vmem:[%s8704_s14 + $0x134] sm:$0xff] }
 0x11d   : > { %v9235_v40 = vpop.f32.mrf.mxu1  ;;  %v2525_v30 = vld [vmem:[%s8704_s14 + $0x135] sm:$0xff] }
 0x11e   : > { %v7918_v43 = vpop.f32.mrf.mxu0  ;;  %8093 = vmatmul.mubr.msk.bf16.gmra.mxu0 %vm391_vm1, %v9057_v20  ;;  %v2524_v20 = vld [vmem:[%s8704_s14 + $0x12d] sm:$0xff] }
 0x11f   : > { %v1153_v48 = vadd.f32 %v7918_v43, %v9066_v27  ;;  %v7956_v8 = vpop.f32.mrf.mxu1  ;;  %8131 = vmatmul.mubr.msk.bf16.gmra.mxu1 %vm391_vm1, %v2540_v29  ;;  %8096 = vmatprep.mubr.msk.bf16.mxu0 %vm391_vm1, %v9077_v41  ;;  %v2543_v14 = vpack.c.bf16 %v2524_v20, %v2523_v59  ;;  %v2817_v43 = vld [vmem:[%s8704_s14 + $0x26] sm:$0xff] }
 0x120   : > { %v1008_v50 = vpop.f32.mrf.mxu0  ;;  %8134 = vmatprep.mubr.msk.bf16.mxu1 %vm391_vm1, %v2541_v35  ;;  %v2526_v35 = vld [vmem:[%s8704_s14 + $0x13d] sm:$0xff] }
 0x121   : > { %v1151_v56 = vadd.f32 %v1008_v50, %v9075_v37  ;;  %v9247_v42 = vadd.f32 %v7956_v8, %v1153_v48  ;;  %v1334_v2 = vpop.f32.mrf.mxu1  ;;  %v2818_v48 = vld [vmem:[%s8704_s14 + $0x2e] sm:$0xff] }
 0x122   : > { %v7919_v17 = vpop.f32.mrf.mxu0  ;;  %v2853_v59 = vpack.c.bf16 %v2818_v48, %v2817_v43 }
 0x123   : > { %v1154_v27 = vadd.f32 %v7919_v17, %v9079_v45  ;;  %v9252_v4 = vadd.f32 %v1334_v2, %v1151_v56  ;;  %v7957_v41 = vpop.f32.mrf.mxu1  ;;  %v2544_v2 = vpack.c.bf16 %v2526_v35, %v2525_v30 }
 0x124   : > { %v1011_v13 = vpop.f32.mrf.mxu0 }
 0x125   : > { %v9255_v37 = vadd.f32 %v1011_v13, %v9083_v49  ;;  %v9257_v18 = vadd.f32 %v7957_v41, %v1154_v27  ;;  %v9259_v23 = vpop.f32.mrf.mxu1  ;;  %v2200_v49 = vld [vmem:[%s8704_s14 + $0x13c] sm:$0xff] }
 0x126   : > { %v7922_v44 = vpop.f32.mrf.mxu0  ;;  %8097 = vmatmul.mubr.msk.bf16.gmra.mxu0 %vm391_vm1, %v9081_v47  ;;  %v2218_v52 = vpack.c.bf16 %v2200_v49, %v2199_v26  ;;  %v2819_v13 = vld [vmem:[%s8704_s14 + $0x36] sm:$0xff] }
 0x127   : > { %v1157_v45 = vadd.f32 %v7922_v44, %v9091_v55  ;;  %v7960_v19 = vpop.f32.mrf.mxu1  ;;  %8135 = vmatmul.mubr.msk.bf16.gmra.mxu1 %vm391_vm1, %v2542_v10  ;;  %8100 = vmatprep.mubr.msk.bf16.mxu0 %vm391_vm1, %v9101_v7 }
 0x128   : > { %v1024_v29 = vpop.f32.mrf.mxu0  ;;  %8138 = vmatprep.mubr.msk.bf16.mxu1 %vm391_vm1, %v2543_v14  ;;  %v2820_v14 = vld [vmem:[%s8704_s14 + $0x3e] sm:$0xff] }
 0x129   : > { %v1155_v8 = vadd.f32 %v1024_v29, %v9099_v63  ;;  %v9275_v47 = vadd.f32 %v7960_v19, %v1157_v45  ;;  %v1350_v55 = vpop.f32.mrf.mxu1  ;;  %v2821_v45 = vld [vmem:[%s8704_s14 + $0x46] sm:$0xff]  ;;  %v2854_v29 = vpack.c.bf16 %v2820_v14, %v2819_v13 }
 0x12a   : > { %v7923_v50 = vpop.f32.mrf.mxu0 }
 0x12b   : > { %v1158_v53 = vadd.f32 %v7923_v50, %v9103_v5  ;;  %v9278_v7 = vadd.f32 %v1350_v55, %v1155_v8  ;;  %v7961_v56 = vpop.f32.mrf.mxu1 }
 0x12c   : > { %v1027_v20 = vpop.f32.mrf.mxu0 }
 0x12d   : > { %v9281_v17 = vadd.f32 %v1027_v20, %v9105_v12  ;;  %v9283_v63 = vadd.f32 %v7961_v56, %v1158_v53  ;;  %v9285_v27 = vpop.f32.mrf.mxu1  ;;  %v2822_v12 = vld [vmem:[%s8704_s14 + $0x4e] sm:$0xff]  ;;  %v2823_v56 = vld [vmem:[%s8704_s14 + $0x56] sm:$0xff]  ;;  %v2825_v20 = vld [vmem:[%s8704_s14 + $0x66] sm:$0xff] }
 0x12e   : > { %v7926_v41 = vpop.f32.mrf.mxu0  ;;  %8101 = vmatmul.mubr.msk.bf16.gmra.mxu0 %vm391_vm1, %v2218_v52  ;;  %v2855_v48 = vpack.c.bf16 %v2822_v12, %v2821_v45 }
 0x12f   : > { %v1161_v5 = vadd.f32 %v7926_v41, %v9112_v15  ;;  %v7964_v10 = vpop.f32.mrf.mxu1  ;;  %8139 = vmatmul.mubr.msk.bf16.gmra.mxu1 %vm391_vm1, %v2544_v2  ;;  %8144 = vmatprep.mubr.msk.bf16.mxu0 %vm391_vm1, %v2853_v59  ;;  %v2824_v2 = vld [vmem:[%s8704_s14 + $0x5e] sm:$0xff]  ;;  %v2826_v41 = vld [vmem:[%s8704_s14 + $0x6e] sm:$0xff] }
 0x130   : > { %v1040_v44 = vpop.f32.mrf.mxu0  ;;  %v2856_v14 = vpack.c.bf16 %v2824_v2, %v2823_v56  ;;  %v2857_v12 = vpack.c.bf16 %v2826_v41, %v2825_v20 }
 0x131   : > { %v1159_v19 = vadd.f32 %v1040_v44, %v9119_v28  ;;  %v9296_v26 = vadd.f32 %v7964_v10, %v1161_v5  ;;  %v1366_v49 = vpop.f32.mrf.mxu1 }
 0x132   : > { %v7927_v30 = vpop.f32.mrf.mxu0 }
 0x133   : > { %v1162_v15 = vadd.f32 %v7927_v30, %v9121_v34  ;;  %v9299_v35 = vadd.f32 %v1366_v49, %v1159_v19  ;;  %v7965_v43 = vpop.f32.mrf.mxu1 }
 0x134   : > { %v1043_v8 = vpop.f32.mrf.mxu0 }
 0x135   : > { %v9302_v55 = vadd.f32 %v1043_v8, %v9125_v39  ;;  %v9304_v28 = vadd.f32 %v7965_v43, %v1162_v15  ;;  %v9306_v50 = vpop.f32.mrf.mxu1  ;;  %v2827_v43 = vld [vmem:[%s8704_s14 + $0x76] sm:$0xff] }
 0x136   : > { %v7930_v52 = vpop.f32.mrf.mxu0  ;;  %8145 = vmatmul.mubr.msk.bf16.vlgmr.msra.gmra.mxu0 %vm391_vm1, %v2854_v29 }
 0x137   : > { %v1165_v53 = vadd.f32 %v7930_v52, %v9130_v46  ;;  %v7968_v34 = vpop.f32.mrf.mxu1  ;;  %8148 = vmatprep.mubr.msk.bf16.mxu0 %vm391_vm1, %v2855_v48  ;;  %v2828_v48 = vld [vmem:[%s8704_s14 + $0x7e] sm:$0xff]  ;;  %v2829_v52 = vld [vmem:[%s8704_s14 + $0x86] sm:$0xff] }
 0x138   : > { %v1056_v59 = vpop.f32.mrf.mxu0 }
 0x139   : > { %v1163_v39 = vadd.f32 %v1056_v59, %v9139_v57  ;;  %v9316_v5 = vadd.f32 %v7968_v34, %v1165_v53  ;;  %v1382_v10 = vpop.f32.mrf.mxu1  ;;  %v2830_v53 = vld [vmem:[%s8704_s14 + $0x8e] sm:$0xff]  ;;  %v2858_v59 = vpack.c.bf16 %v2828_v48, %v2827_v43 }
 0x13a   : > { %v7931_v13 = vpop.f32.mrf.mxu0 }
 0x13b   : > { %v1166_v44 = vadd.f32 %v7931_v13, %v9141_v60  ;;  %v9319_v46 = vadd.f32 %v1382_v10, %v1163_v39  ;;  %v7969_v45 = vpop.f32.mrf.mxu1  ;;  %v2859_v39 = vpack.c.bf16 %v2830_v53, %v2829_v52 }
 0x13c   : > { %v1059_v19 = vpop.f32.mrf.mxu0 }
 0x13d   : > { %v9322_v49 = vadd.f32 %v1059_v19, %v9143_v0  ;;  %v9324_v57 = vadd.f32 %v7969_v45, %v1166_v44  ;;  %v9326_v30 = vpop.f32.mrf.mxu1  ;;  %v2832_v19 = vld [vmem:[%s8704_s14 + $0x9e] sm:$0xff] }
 0x13e   : > { %v7934_v29 = vpop.f32.mrf.mxu0  ;;  %8149 = vmatmul.mubr.msk.bf16.gmra.mxu0 %vm391_vm1, %v2856_v14 }
 0x13f   : > { %v1169_v15 = vadd.f32 %v7934_v29, %v9150_v9  ;;  %v7972_v60 = vpop.f32.mrf.mxu1  ;;  %8152 = vmatprep.mubr.msk.bf16.mxu0 %vm391_vm1, %v2857_v12  ;;  %v2831_v12 = vld [vmem:[%s8704_s14 + $0x96] sm:$0xff]  ;;  %v7322_v29 = vld [vmem:[%s12439_s4 + $0x4] sm:$0xf] }
 0x140   : > { %v1072_v8 = vpop.f32.mrf.mxu0  ;;  %8531 = vmatprep.subr.msk.bf16.mxu1 %vm12470_vm2, %v7322_v29  ;;  %v2860_v53 = vpack.c.bf16 %v2832_v19, %v2831_v12  ;;  %v2837_v19 = vld [vmem:[%s8704_s14 + $0xc6] sm:$0xff] }
 0x141   : > { %v1167_v0 = vadd.f32 %v1072_v8, %v9157_v22  ;;  %v9336_v34 = vadd.f32 %v7972_v60, %v1169_v15  ;;  %v1398_v56 = vpop.f32.mrf.mxu1  ;;  %v2833_v15 = vld [vmem:[%s8704_s14 + $0xa6] sm:$0xff]  ;;  %v2834_v60 = vld [vmem:[%s8704_s14 + $0xae] sm:$0xff]  ;;  %v4235_v8 = vsel %vm12470_vm2, %v7322_v29, 0 }
 0x142   : > { %v7935_v2 = vpop.f32.mrf.mxu0  ;;  %8181 = vmatpush3.bf16.msra.mxu1 %v4235_v8  ;;  %v2838_v29 = vld [vmem:[%s8704_s14 + $0xce] sm:$0xff] }
 0x143   : > { %v1170_v20 = vadd.f32 %v7935_v2, %v9159_v25  ;;  %v9339_v9 = vadd.f32 %v1398_v56, %v1167_v0  ;;  %v7973_v41 = vpop.f32.mrf.mxu1 }
 0x144   : > { %v1075_v10 = vpop.f32.mrf.mxu0 }
 0x145   : > { %v9342_v13 = vadd.f32 %v1075_v10, %v9161_v33  ;;  %v9344_v22 = vadd.f32 %v7973_v41, %v1170_v20  ;;  %v9346_v14 = vpop.f32.mrf.mxu1 }
 0x146   : > { %v7938_v44 = vpop.f32.mrf.mxu0  ;;  %8153 = vmatmul.mubr.msk.bf16.gmra.mxu0 %vm391_vm1, %v2858_v59  ;;  %v2861_v59 = vpack.c.bf16 %v2834_v60, %v2833_v15 }
 0x147   : > { %v1173_v45 = vadd.f32 %v7938_v44, %v9168_v36  ;;  %v7976_v25 = vpop.f32.mrf.mxu1  ;;  %8156 = vmatprep.mubr.msk.bf16.mxu0 %vm391_vm1, %v2859_v39 }
 0x148   : > { %v1088_v33 = vpop.f32.mrf.mxu0 }
 0x149   : > { %v1171_v43 = vadd.f32 %v1088_v33, %v9175_v51  ;;  %v9360_v48 = vadd.f32 %v7976_v25, %v1173_v45  ;;  %v1414_v36 = vpop.f32.mrf.mxu1  ;;  %v2835_v45 = vld [vmem:[%s8704_s14 + $0xb6] sm:$0xff]  ;;  %v2836_v25 = vld [vmem:[%s8704_s14 + $0xbe] sm:$0xff] }
 0x14a   : > { %v7939_v52 = vpop.f32.mrf.mxu0 }
 0x14b   : > { %v1174_v0 = vadd.f32 %v7939_v52, %v9177_v6  ;;  %v9364_v56 = vadd.f32 %v1414_v36, %v1171_v43  ;;  %v7977_v2 = vpop.f32.mrf.mxu1  ;;  %v2862_v43 = vpack.c.bf16 %v2836_v25, %v2835_v45  ;;  %v2863_v52 = vpack.c.bf16 %v2838_v29, %v2837_v19  ;;  %v2841_v45 = vld [vmem:[%s8704_s14 + $0xe6] sm:$0xff]  ;;  %v2842_v25 = vld [vmem:[%s8704_s14 + $0xee] sm:$0xff] }
 0x14c   : > { %v1091_v20 = vpop.f32.mrf.mxu0 }
 0x14d   : > { %v9367_v51 = vadd.f32 %v1091_v20, %v9179_v61  ;;  %v9369_v41 = vadd.f32 %v7977_v2, %v1174_v0  ;;  %v9371_v39 = vpop.f32.mrf.mxu1 }
 0x14e   : > { %v7942_v10 = vpop.f32.mrf.mxu0  ;;  %8157 = vmatmul.mubr.msk.bf16.gmra.mxu0 %vm391_vm1, %v2860_v53 }
 0x14f   : > { %v1177_v44 = vadd.f32 %v7942_v10, %v9186_v1  ;;  %v7980_v6 = vpop.f32.mrf.mxu1  ;;  %8160 = vmatprep.mubr.msk.bf16.mxu0 %vm391_vm1, %v2861_v59  ;;  %v2839_v10 = vld [vmem:[%s8704_s14 + $0xd6] sm:$0xff] }
 0x150   : > { %v1104_v12 = vpop.f32.mrf.mxu0 }
 0x151   : > { %v1175_v61 = vadd.f32 %v1104_v12, %v9193_v21  ;;  %v9381_v33 = vadd.f32 %v7980_v6, %v1177_v44  ;;  %v1430_v15 = vpop.f32.mrf.mxu1  ;;  %v2840_v44 = vld [vmem:[%s8704_s14 + $0xde] sm:$0xff] }
 0x152   : > { %v7943_v60 = vpop.f32.mrf.mxu0 }
 0x153   : > { %v1178_v36 = vadd.f32 %v7943_v60, %v9195_v24  ;;  %v9384_v1 = vadd.f32 %v1430_v15, %v1175_v61  ;;  %v7981_v8 = vpop.f32.mrf.mxu1  ;;  %v2864_v61 = vpack.c.bf16 %v2840_v44, %v2839_v10  ;;  %v2845_v44 = vld [vmem:[%s8704_s14 + $0x106] sm:$0xff] }
 0x154   : > { %v1107_v53 = vpop.f32.mrf.mxu0 }
 0x155   : > { %v9387_v0 = vadd.f32 %v1107_v53, %v9197_v31  ;;  %v9389_v21 = vadd.f32 %v7981_v8, %v1178_v36  ;;  %v9391_v2 = vpop.f32.mrf.mxu1 }
 0x156   : > { %v7946_v59 = vpop.f32.mrf.mxu0  ;;  %8161 = vmatmul.mubr.msk.bf16.gmra.mxu0 %vm391_vm1, %v2862_v43  ;;  %v2865_v43 = vpack.c.bf16 %v2842_v25, %v2841_v45 }
 0x157   : > { %v1181_v20 = vadd.f32 %v7946_v59, %v9204_v38  ;;  %v7984_v24 = vpop.f32.mrf.mxu1  ;;  %8164 = vmatprep.mubr.msk.bf16.mxu0 %vm391_vm1, %v2863_v52 }
 0x158   : > { %v1120_v6 = vpop.f32.mrf.mxu0 }
 0x159   : > { %v1179_v31 = vadd.f32 %v1120_v6, %v9211_v32  ;;  %v9401_v12 = vadd.f32 %v7984_v24, %v1181_v20  ;;  %v1446_v19 = vpop.f32.mrf.mxu1  ;;  %v2843_v20 = vld [vmem:[%s8704_s14 + $0xf6] sm:$0xff]  ;;  %v2844_v24 = vld [vmem:[%s8704_s14 + $0xfe] sm:$0xff]  ;;  %v2846_v6 = vld [vmem:[%s8704_s14 + $0x10e] sm:$0xff] }
 0x15a   : > { %v7947_v29 = vpop.f32.mrf.mxu0 }
 0x15b   : > { %v1182_v15 = vadd.f32 %v7947_v29, %v9213_v58  ;;  %v9404_v38 = vadd.f32 %v1446_v19, %v1179_v31  ;;  %v7985_v60 = vpop.f32.mrf.mxu1  ;;  %v2866_v19 = vpack.c.bf16 %v2844_v24, %v2843_v20  ;;  %v2849_v24 = vld [vmem:[%s8704_s14 + $0x126] sm:$0xff] }
 0x15c   : > { %v1123_v36 = vpop.f32.mrf.mxu0 }
 0x15d   : > { %v9407_v8 = vadd.f32 %v1123_v36, %v9215_v62  ;;  %v9409_v32 = vadd.f32 %v7985_v60, %v1182_v15  ;;  %v9411_v52 = vpop.f32.mrf.mxu1  ;;  %v2867_v15 = vpack.c.bf16 %v2846_v6, %v2845_v44 }
 0x15e   : > { %v7950_v53 = vpop.f32.mrf.mxu0  ;;  %8165 = vmatmul.mubr.msk.bf16.gmra.mxu0 %vm391_vm1, %v2864_v61 }
 0x15f   : > { %v1185_v59 = vadd.f32 %v7950_v53, %v9222_v11  ;;  %v7988_v58 = vpop.f32.mrf.mxu1  ;;  %8168 = vmatprep.mubr.msk.bf16.mxu0 %vm391_vm1, %v2865_v43 }
 0x160   : > { %v1136_v10 = vpop.f32.mrf.mxu0 }
 0x161   : > { %v1183_v62 = vadd.f32 %v1136_v10, %v9229_v54  ;;  %v9421_v45 = vadd.f32 %v7988_v58, %v1185_v59  ;;  %v1462_v25 = vpop.f32.mrf.mxu1  ;;  %v2848_v58 = vld [vmem:[%s8704_s14 + $0x11e] sm:$0xff]  ;;  %v2850_v10 = vld [vmem:[%s8704_s14 + $0x12e] sm:$0xff] }
 0x162   : > { %v7951_v31 = vpop.f32.mrf.mxu0 }
 0x163   : > { %v1186_v11 = vadd.f32 %v7951_v31, %v9231_v3  ;;  %v9424_v29 = vadd.f32 %v1462_v25, %v1183_v62  ;;  %v7989_v61 = vpop.f32.mrf.mxu1  ;;  %v2847_v3 = vld [vmem:[%s8704_s14 + $0x116] sm:$0xff] }
 0x164   : > { %v9426_v60 = vpop.f32.mrf.mxu0  ;;  %v2868_v31 = vpack.c.bf16 %v2848_v58, %v2847_v3  ;;  %v2851_v3 = vld [vmem:[%s8704_s14 + $0x136] sm:$0xff] }
 0x165   : > { %v9428_v43 = vadd.f32 %v7989_v61, %v1186_v11  ;;  %v9430_v54 = vpop.f32.mrf.mxu1  ;;  %v2869_v61 = vpack.c.bf16 %v2850_v10, %v2849_v24 }
 0x166   : > { %v7994_v36 = vpop.f32.mrf.mxu0  ;;  %8169 = vmatmul.mubr.msk.bf16.gmra.mxu0 %vm391_vm1, %v2866_v19 }
 0x167   : > { %12542 = vst [vmem:[#allocation3_spill] sm:$0xff] %v9428_v43  ;;  %v1805_v53 = vadd.f32 %v7994_v36, %v9247_v42  ;;  %v8032_v59 = vpop.f32.mrf.mxu1  ;;  %8172 = vmatprep.mubr.msk.bf16.mxu0 %vm391_vm1, %v2867_v15 }
 0x168   : > { %v1660_v20 = vpop.f32.mrf.mxu0 }
 0x169   : > { %v1803_v44 = vadd.f32 %v1660_v20, %v9252_v4  ;;  %v9440_v6 = vadd.f32 %v8032_v59, %v1805_v53  ;;  %v1986_v62 = vpop.f32.mrf.mxu1 }
 0x16a   : > { %v7995_v25 = vpop.f32.mrf.mxu0 }
 0x16b   : > { %v1806_v19 = vadd.f32 %v7995_v25, %v9257_v18  ;;  %v9443_v42 = vadd.f32 %v1986_v62, %v1803_v44  ;;  %v8033_v11 = vpop.f32.mrf.mxu1  ;;  %v2852_v18 = vld [vmem:[%s8704_s14 + $0x13e] sm:$0xff] }
 0x16c   : > { %v9445_v15 = vpop.f32.mrf.mxu0  ;;  %v2870_v62 = vpack.c.bf16 %v2852_v18, %v2851_v3 }
 0x16d   : > { %v9447_v36 = vadd.f32 %v8033_v11, %v1806_v19  ;;  %v9449_v43 = vpop.f32.mrf.mxu1 }
 0x16e   : > { %v7998_v4 = vpop.f32.mrf.mxu0  ;;  %8173 = vmatmul.mubr.msk.bf16.gmra.mxu0 %vm391_vm1, %v2868_v31 }
 0x16f   : > { %v1809_v53 = vadd.f32 %v7998_v4, %v9275_v47  ;;  %v8036_v59 = vpop.f32.mrf.mxu1  ;;  %8176 = vmatprep.mubr.msk.bf16.mxu0 %vm391_vm1, %v2869_v61 }
 0x170   : > { %v1676_v58 = vpop.f32.mrf.mxu0 }
 0x171   : > { %v1807_v20 = vadd.f32 %v1676_v58, %v9278_v7  ;;  %v9457_v24 = vadd.f32 %v8036_v59, %v1809_v53  ;;  %v2002_v10 = vpop.f32.mrf.mxu1 }
 0x172   : > { %v7999_v44 = vpop.f32.mrf.mxu0 }
 0x173   : > { %v1810_v25 = vadd.f32 %v7999_v44, %v9283_v63  ;;  %v9460_v19 = vadd.f32 %v2002_v10, %v1807_v20  ;;  %v8037_v31 = vpop.f32.mrf.mxu1 }
 0x174   : > { %v9462_v11 = vpop.f32.mrf.mxu0 }
 0x175   : > { %12543 = vst [vmem:[#allocation4_spill] sm:$0xff] %v9460_v19  ;;  %v9464_v47 = vadd.f32 %v8037_v31, %v1810_v25  ;;  %v9466_v61 = vpop.f32.mrf.mxu1 }
 0x176   : > { %v8002_v4 = vpop.f32.mrf.mxu0  ;;  %8177 = vmatmul.mubr.msk.bf16.gmra.mxu0 %vm391_vm1, %v2870_v62 }
 0x177   : > { %12544 = vst [vmem:[#allocation5_spill] sm:$0xff] %v9464_v47  ;;  %v1813_v7 = vadd.f32 %v8002_v4, %v9296_v26  ;;  %v8040_v53 = vpop.f32.mrf.mxu1 }
 0x178   : > { %v1692_v59 = vpop.f32.mrf.mxu0 }
 0x179   : > { %v1811_v3 = vadd.f32 %v1692_v59, %v9299_v35  ;;  %v9471_v18 = vadd.f32 %v8040_v53, %v1813_v7  ;;  %v2018_v63 = vpop.f32.mrf.mxu1  ;;  %v3265_v35 = vlaneseq }
 0x17a   : > { %v8003_v58 = vpop.f32.mrf.mxu0 }
 0x17b   : > { %12545 = vst [vmem:[#allocation6_spill] sm:$0xff] %v9471_v18  ;;  %v1814_v20 = vadd.f32 %v8003_v58, %v9304_v28  ;;  %v9474_v10 = vadd.f32 %v2018_v63, %v1811_v3  ;;  %v8041_v44 = vpop.f32.mrf.mxu1 }
 0x17c   : > { %v9476_v25 = vpop.f32.mrf.mxu0 }
 0x17d   : > { %12546 = vst [vmem:[#allocation7_spill] sm:$0xff] %v9474_v10  ;;  %v9478_v31 = vadd.f32 %v8041_v44, %v1814_v20  ;;  %v9480_v62 = vpop.f32.mrf.mxu1  ;;  %v9489_v44 = vshrl.u32 %v3265_v35, 7 }
 0x17e   : > { %v8006_v26 = vpop.f32.mrf.mxu0 }
 0x17f   : > { %12547 = vst [vmem:[#allocation8_spill] sm:$0xff] %v9478_v31  ;;  %v1817_v4 = vadd.f32 %v8006_v26, %v9316_v5  ;;  %v8044_v47 = vpop.f32.mrf.mxu1 }
 0x180   : > { %v1708_v7 = vpop.f32.mrf.mxu0 }
 0x181   : > { %v1815_v53 = vadd.f32 %v1708_v7, %v9319_v46  ;;  %v9484_v59 = vadd.f32 %v8044_v47, %v1817_v4  ;;  %v2034_v28 = vpop.f32.mrf.mxu1  ;;  %v9499_v4 = vadd.s32 16, %v9489_v44 }
 0x182   : > { %v8007_v3 = vpop.f32.mrf.mxu0 }
 0x183   : > { %12548 = vst [vmem:[#allocation9_spill] sm:$0xff] %v9484_v59  ;;  %v1818_v63 = vadd.f32 %v8007_v3, %v9324_v57  ;;  %v9487_v58 = vadd.f32 %v2034_v28, %v1815_v53  ;;  %v8045_v20 = vpop.f32.mrf.mxu1 }
 0x184   : > { %v9491_v31 = vpop.f32.mrf.mxu0 }
 0x185   : > { %12549 = vst [vmem:[#allocation10_spill] sm:$0xff] %v9487_v58  ;;  %v9493_v10 = vadd.f32 %v8045_v20, %v1818_v63  ;;  %v9495_v5 = vpop.f32.mrf.mxu1 }
 0x186   : > { %v8010_v26 = vpop.f32.mrf.mxu0 }
 0x187   : > { %12550 = vst [vmem:[#allocation11_spill] sm:$0xff] %v9493_v10  ;;  %v1821_v46 = vadd.f32 %v8010_v26, %v9336_v34  ;;  %v8048_v47 = vpop.f32.mrf.mxu1  ;;  %v9508_v10 = vmul.u32.u64.low 3817748708, %v9499_v4  ;;  %v9509_v58 = vmul.u32.u64.high 3817748708, %v9499_v4, %v9508_v10  ;;  %v4122_v26 = vld [vmem:[%s12439_s4] sm:$0xf] }
 0x188   : > { %v1724_v7 = vpop.f32.mrf.mxu0  ;;  %8532 = vmatprep.subr.msk.bf16.mxu0 %vm12470_vm2, %v4122_v26 }
 0x189   : > { %v1819_v57 = vadd.f32 %v1724_v7, %v9339_v9  ;;  %v9502_v53 = vadd.f32 %v8048_v47, %v1821_v46  ;;  %v2050_v35 = vpop.f32.mrf.mxu1  ;;  %v3330_v18 = vshrl.u32 %v9509_v58, 4 }
 0x18a   : > { %v8011_v28 = vpop.f32.mrf.mxu0 }
 0x18b   : > { %12551 = vst [vmem:[#allocation12_spill] sm:$0xff] %v9502_v53  ;;  %v1822_v3 = vadd.f32 %v8011_v28, %v9344_v22  ;;  %v9505_v63 = vadd.f32 %v2050_v35, %v1819_v57  ;;  %v8049_v20 = vpop.f32.mrf.mxu1  ;;  %v4469_v22 = vsel %vm12470_vm2, %v4122_v26, 0  ;;  %v9524_v35 = vadd.s32 24, %v9489_v44 }
 0x18c   : > { %v9511_v34 = vpop.f32.mrf.mxu0  ;;  %8219 = vmatpush3.bf16.msra.mxu0 %v4469_v22  ;;  %v8631_v28 = vmov 0.0  }
 0x18d   : > { %12552 = vst [vmem:[#allocation13_spill] sm:$0xff] %v9505_v63  ;;  %v9516_v9 = vadd.f32 %v8049_v20, %v1822_v3  ;;  %v9518_v46 = vpop.f32.mrf.mxu1  ;;  %4023 = vst.msk [vmem:[#allocation2] sm:$0xff] %vm12466_vm3, %v8631_v28 }
 0x18e   : > { %12554 = vst [vmem:[#allocation15_spill] sm:$0xff] %v9518_v46  ;;  %v8014_v47 = vpop.f32.mrf.mxu0  ;;  %4024 = vst.msk [vmem:[#allocation2 + $0x8] sm:$0xff] %vm12466_vm3, %v8631_v28 }
 0x18f   : > { %12553 = vst [vmem:[#allocation14_spill] sm:$0xff] %v9516_v9  ;;  %v1825_v7 = vadd.f32 %v8014_v47, %v9360_v48  ;;  %v8052_v57 = vpop.f32.mrf.mxu1  ;;  %4027 = vst.msk [vmem:[#allocation2 + $0x133] sm:$0xff] %vm12466_vm3, %v8631_v28  ;;  %v9535_v22 = vmul.u32.u64.low 3817748708, %v9489_v44  ;;  %v9536_v47 = vmul.u32.u64.high 3817748708, %v9489_v44, %v9535_v22  ;;  %v9539_v9 = vadd.s32 8, %v9489_v44 }
 0x190   : > { %v1740_v10 = vpop.f32.mrf.mxu0  ;;  %4028 = vst.msk [vmem:[#allocation2 + $0x13b] sm:$0xff] %vm12466_vm3, %v8631_v28  ;;  %4029 = vst.msk [vmem:[#allocation2 + $0x143] sm:$0xff] %vm12466_vm3, %v8631_v28 }
 0x191   : > { %v1823_v3 = vadd.f32 %v1740_v10, %v9364_v56  ;;  %v9532_v48 = vadd.f32 %v8052_v57, %v1825_v7  ;;  %v2066_v20 = vpop.f32.mrf.mxu1  ;;  %v9548_v56 = vmul.u32.u64.low 3817748708, %v9524_v35  ;;  %v9549_v7 = vmul.u32.u64.high 3817748708, %v9524_v35, %v9548_v56  ;;  %4026 = vst.msk [vmem:[#allocation2 + $0x10] sm:$0x7] %vm4025_vm4, %v8631_v28 }
 0x192   : > { %v8015_v26 = vpop.f32.mrf.mxu0  ;;  %v9552_v57 = vadd.s32 48, %v9489_v44  ;;  %v850_v56 = vadd.f32 %v9235_v40, %v9233_v16  ;;  %v1482_v40 = vadd.f32 %v9285_v27, %v9281_v17 }
 0x193   : > { %12555 = vst [vmem:[#allocation16_spill] sm:$0xff] %v9532_v48  ;;  %v1826_v63 = vadd.f32 %v8015_v26, %v9369_v41  ;;  %v9542_v53 = vadd.f32 %v2066_v20, %v1823_v3  ;;  %v8053_v59 = vpop.f32.mrf.mxu1  ;;  %v9559_v3 = vmul.u32.u64.low 3817748708, %v9539_v9  ;;  %v9560_v20 = vmul.u32.u64.high 3817748708, %v9539_v9, %v9559_v3 }
 0x194   : > { %v9545_v46 = vpop.f32.mrf.mxu0  ;;  %v4068_v48 = vld [vmem:[#allocation2] sm:$0xff]  ;;  %v1486_v3 = vadd.f32 %v9306_v50, %v9302_v55  ;;  %v9603_v55 = vadd.f32 %v9371_v39, %v9367_v51  ;;  %v9607_v50 = vadd.f32 %v9391_v2, %v9387_v0  ;;  %v9622_v51 = vadd.s32 56, %v9489_v44 }
 0x195   : > { %12556 = vst [vmem:[#allocation17_spill] sm:$0xff] %v9542_v53  ;;  %v9554_v10 = vadd.f32 %v8053_v59, %v1826_v63  ;;  %v9556_v22 = vpop.f32.mrf.mxu1  ;;  %v3331_v53 = vmul.u32 18, %v3330_v18  ;;  %v9566_v59 = vmul.u32.u64.low 3817748708, %v9552_v57  ;;  %v9567_v63 = vmul.u32.u64.high 3817748708, %v9552_v57, %v9566_v59  ;;  %v4123_v27 = vld [vmem:[#allocation2 + $0x1] sm:$0xff] }
 0x196   : > { %12558 = vst [vmem:[#allocation19_spill] sm:$0xff] %v9556_v22  ;;  %v8018_v41 = vpop.f32.mrf.mxu0  ;;  %v9572_v22 = vld [vmem:[%s12439_s4 + $0x8] sm:$0xf]  ;;  %v9587_v59 = vadd.f32 %v9326_v30, %v9322_v49  ;;  %v3341_v30 = vshrl.u32 %v9549_v7, 4  ;;  %v1808_v0 = vadd.f32 %v9462_v11, %v1482_v40  ;;  %v3319_v7 = vshrl.u32 %v9560_v20, 4 }
 0x197   : > { %12557 = vst [vmem:[#allocation18_spill] sm:$0xff] %v9554_v10  ;;  %v1829_v58 = vadd.f32 %v8018_v41, %v9381_v33  ;;  %v8056_v26 = vpop.f32.mrf.mxu1  ;;  %v4069_v10 = vld [vmem:[#allocation2 + $0x8] sm:$0xff]  ;;  %v1478_v33 = vadd.f32 %v9259_v23, %v9255_v37  ;;  %8533 = vmatprep.subr.msk.bf16.mxu1 %vm12470_vm2, %v9572_v22  ;;  %v3308_v23 = vshrl.u32 %v9536_v47, 4  ;;  %v9598_v17 = vsub.s32 %v9499_v4, %v3331_v53 }
 0x198   : > { %v1756_v19 = vpop.f32.mrf.mxu0  ;;  %v4104_v16 = vpack.c.bf16 %v4069_v10, %v4068_v48  ;;  %v4124_v39 = vld [vmem:[#allocation2 + $0x9] sm:$0xff] }
 0x199   : > { %v1827_v18 = vadd.f32 %v1756_v19, %v9384_v1  ;;  %v9577_v28 = vadd.f32 %v8056_v26, %v1829_v58  ;;  %v2082_v41 = vpop.f32.mrf.mxu1  ;;  %v9592_v1 = vadd.f32 %v9346_v14, %v9342_v13  ;;  %12559 = vst [vmem:[#allocation20_spill] sm:$0xff] %v9598_v17  ;;  %v9613_v13 = vadd.s32 32, %v9489_v44 }
 0x19a   : > { %v8019_v37 = vpop.f32.mrf.mxu0  ;;  %8220 = vmatprep.mubr.msk.bf16.mxu0 %vm12466_vm3, %v4104_v16  ;;  %v1184_v14 = vadd.f32 %v9426_v60, %v850_v56  ;;  %v3309_v47 = vmul.u32 18, %v3308_v23  ;;  %v4159_v58 = vpack.c.bf16 %v4124_v39, %v4123_v27  ;;  %vm3700_vm5 = vcmp.ne.s32.totalorder %v9598_v17, 0 }
 0x19b   : > { %v1830_v19 = vadd.f32 %v8019_v37, %v9389_v21  ;;  %v9595_v48 = vadd.f32 %v2082_v41, %v1827_v18  ;;  %v8057_v10 = vpop.f32.mrf.mxu1  ;;  %v1804_v21 = vadd.f32 %v9445_v15, %v1478_v33  ;;  %vm3736_vm6 = vcmp.lt.s32.totalorder %v9598_v17, 0 }
 0x19c   : > { %v9609_v49 = vpop.f32.mrf.mxu0  ;;  %v9630_v15 = vadd.s32 40, %v9489_v44  ;;  %v3342_v33 = vmul.u32 18, %v3341_v30  ;;  %v3374_v18 = vshrl.u32 %v9567_v63, 4  ;;  %8182 = vmatprep.mubr.msk.bf16.mxu1 %vm12466_vm3, %v4159_v58  ;;  %v9649_v63 = vsub.s32 %v9489_v44, %v3309_v47  ;;  %vm9661_vm7 = vmand %vm3736_vm6, %vm3700_vm5 }
 0x19d   : > { %v9617_v4 = vadd.f32 %v8057_v10, %v1830_v19  ;;  %v9619_v53 = vpop.f32.mrf.mxu1  ;;  %v9634_v11 = vmul.u32.u64.low 3817748708, %v9613_v13  ;;  %v9635_v41 = vmul.u32.u64.high 3817748708, %v9613_v13, %v9634_v11  ;;  %v9646_v19 = vadd.s32 18, %v9598_v17 }
 0x19e   : > { %v8022_v2 = vpop.f32.mrf.mxu0  ;;  %v9642_v40 = vmul.u32.u64.low 3817748708, %v9622_v51  ;;  %v9643_v37 = vmul.u32.u64.high 3817748708, %v9622_v51, %v9642_v40  ;;  %12563 = vst [vmem:[#allocation24_spill] sm:$0xff] %v9649_v63  ;;  %v3320_v10 = vmul.u32 18, %v3319_v7  ;;  %v9652_v27 = vadd.s32 80, %v9489_v44 }
 0x19f   : > { %12560 = vst [vmem:[#allocation21_spill] sm:$0xff] %v9617_v4  ;;  %v1833_v26 = vadd.f32 %v8022_v2, %v9401_v12  ;;  %v8060_v60 = vpop.f32.mrf.mxu1  ;;  %12562 = vst [vmem:[#allocation23_spill] sm:$0xff] %v9646_v19  ;;  %v12565_v2 = vmov 0  ;;  %v9666_v47 = vmul.u32.u64.low 3817748708, %v9630_v15  ;;  %v9667_v58 = vmul.u32.u64.high 3817748708, %v9630_v15, %v9666_v47 }
 0x1a0   : > { %v1772_v56 = vpop.f32.mrf.mxu0  ;;  %v12566_v2 = vsel %vm9661_vm7, 4294967295, %v12565_v2  ;;  %v9671_v7 = vadd.f32 %v9411_v52, %v9407_v8  ;;  %v9680_v11 = vadd.f32 %v9430_v54, %v1184_v14  ;;  %vm3698_vm8 = vcmp.ne.s32.totalorder %v9649_v63, 0 }
 0x1a1   : > { %v1831_v12 = vadd.f32 %v1772_v56, %v9404_v38  ;;  %v9639_v20 = vadd.f32 %v8060_v60, %v1833_v26  ;;  %v2098_v16 = vpop.f32.mrf.mxu1  ;;  %12567 = vst [vmem:[#allocation26_spill] sm:$0xff] %v12566_v2  ;;  %v9677_v60 = vsub.s32 %v9524_v35, %v3342_v33  ;;  %v3375_v56 = vmul.u32 18, %v3374_v18 }
 0x1a2   : > { %v8023_v23 = vpop.f32.mrf.mxu0  ;;  %v9697_v35 = vsub.s32 %v9539_v9, %v3320_v10  ;;  %vm3734_vm9 = vcmp.lt.s32.totalorder %v9649_v63, 0  ;;  %v9707_v14 = vadd.s32 18, %v9649_v63  ;;  %v3352_v33 = vshrl.u32 %v9635_v41, 4  ;;  %v12575_v41 = vld [vmem:[#allocation3_spill] sm:$0xff] }
 0x1a3   : > { %12561 = vst [vmem:[#allocation22_spill] sm:$0xff] %v9639_v20  ;;  %v1834_v38 = vadd.f32 %v8023_v23, %v9409_v32  ;;  %v9655_v30 = vadd.f32 %v2098_v16, %v1831_v12  ;;  %v8061_v39 = vpop.f32.mrf.mxu1  ;;  %v1812_v32 = vadd.f32 %v9476_v25, %v1486_v3  ;;  %12568 = vst [vmem:[#allocation27_spill] sm:$0xff] %v9677_v60  ;;  %vm3701_vm10 = vcmp.ne.s32.totalorder %v9677_v60, 0 }
 0x1a4   : > { %v9674_v26 = vpop.f32.mrf.mxu0  ;;  %v9683_v12 = vadd.f32 %v9449_v43, %v1804_v21  ;;  %v9686_v16 = vadd.f32 %v9466_v61, %v1808_v0  ;;  %12570 = vst [vmem:[#allocation29_spill] sm:$0xff] %v9697_v35  ;;  %v9700_v54 = vmul.u32.u64.low 3817748708, %v9652_v27  ;;  %v9701_v43 = vmul.u32.u64.high 3817748708, %v9652_v27, %v9700_v54  ;;  %12571 = vst [vmem:[#allocation30_spill] sm:$0xff] %v9707_v14 }
 0x1a5   : > { %12564 = vst [vmem:[#allocation25_spill] sm:$0xff] %v9655_v30  ;;  %v9688_v40 = vadd.f32 %v8061_v39, %v1834_v38  ;;  %v9690_v8 = vpop.f32.mrf.mxu1  ;;  %v9710_v21 = vadd.f32 %v9480_v62, %v1812_v32  ;;  %v9714_v9 = vsub.s32 %v9552_v57, %v3375_v56  ;;  %vm3737_vm11 = vcmp.lt.s32.totalorder %v9677_v60, 0  ;;  %vm9745_vm14 = vmand %vm3734_vm9, %vm3698_vm8 }
 0x1a6   : > { %v8026_v52 = vpop.f32.mrf.mxu0  ;;  %v3385_v10 = vshrl.u32 %v9643_v37, 4  ;;  %v9723_v62 = vadd.s32 18, %v9677_v60  ;;  %vm3699_vm12 = vcmp.ne.s32.totalorder %v9697_v35, 0  ;;  %vm3735_vm13 = vcmp.lt.s32.totalorder %v9697_v35, 0  ;;  %vm9761_vm0 = vmand %vm3737_vm11, %vm3701_vm10 }
 0x1a7   : > { %12569 = vst [vmem:[#allocation28_spill] sm:$0xff] %v9688_v40  ;;  %v1837_v61 = vadd.f32 %v8026_v52, %v9421_v45  ;;  %v8064_v3 = vpop.f32.mrf.mxu1  ;;  %12572 = vst [vmem:[#allocation31_spill] sm:$0xff] %v9714_v9  ;;  %v9728_v57 = vadd.s32 64, %v9489_v44  ;;  %v3363_v32 = vshrl.u32 %v9667_v58, 4  ;;  %v9735_v37 = vadd.s32 88, %v9489_v44 }
 0x1a8   : > { %v1788_v0 = vpop.f32.mrf.mxu0  ;;  %12574 = vst [vmem:[#allocation33_spill] sm:$0xff] %v9723_v62  ;;  %v1816_v56 = vadd.f32 %v9491_v31, %v9587_v59  ;;  %v12577_v54 = vmov 0  ;;  %vm3704_vm15 = vcmp.ne.s32.totalorder %v9714_v9, 0  ;;  %v3353_v58 = vmul.u32 18, %v3352_v33  ;;  %vm9798_vm4 = vmand %vm3735_vm13, %vm3699_vm12 }
 0x1a9   : > { %v1835_v45 = vadd.f32 %v1788_v0, %v9424_v29  ;;  %v9718_v18 = vadd.f32 %v8064_v3, %v1837_v61  ;;  %v2114_v23 = vpop.f32.mrf.mxu1  ;;  %v12578_v54 = vsel %vm9745_vm14, 4294967295, %v12577_v54  ;;  %v9750_v61 = vadd.s32 18, %v9697_v35 }
 0x1aa   : > { %v8027_v38 = vpop.f32.mrf.mxu0  ;;  %12579 = vst [vmem:[#allocation34_spill] sm:$0xff] %v12578_v54  ;;  %v12582_v31 = vmov 0  ;;  %vm3740_vm1 = vcmp.lt.s32.totalorder %v9714_v9, 0  ;;  %v3386_v59 = vmul.u32 18, %v3385_v10  ;;  %v3418_v33 = vshrl.u32 %v9701_v43, 4 }
 0x1ab   : > { %12573 = vst [vmem:[#allocation32_spill] sm:$0xff] %v9718_v18  ;;  %v1838_v29 = vadd.f32 %v8027_v38, %v12575_v41  ;;  %v9731_v39 = vadd.f32 %v2114_v23, %v1835_v45  ;;  %v8065_v47 = vpop.f32.mrf.mxu1  ;;  %12580 = vst [vmem:[#allocation35_spill] sm:$0xff] %v9750_v61  ;;  %v12583_v31 = vsel %vm9761_vm0, 4294967295, %v12582_v31  ;;  %v9767_v45 = vadd.s32 72, %v9489_v44  ;;  %v12609_v18 = vld [vmem:[#allocation5_spill] sm:$0xff] }
 0x1ac   : > { %v9739_v52 = vpop.f32.mrf.mxu0  ;;  %12584 = vst [vmem:[#allocation37_spill] sm:$0xff] %v12583_v31  ;;  %v9771_v38 = vmul.u32.u64.low 3817748708, %v9728_v57  ;;  %v9772_v41 = vmul.u32.u64.high 3817748708, %v9728_v57, %v9771_v38  ;;  %v3364_v17 = vmul.u32 18, %v3363_v32  ;;  %v9803_v32 = vadd.s32 18, %v9714_v9  ;;  %vm9817_vm5 = vmand %vm3740_vm1, %vm3704_vm15 }
 0x1ad   : > { %12576 = vst [vmem:[#allocation3_spill] sm:$0xff] %v9731_v39  ;;  %v9753_v3 = vadd.f32 %v8065_v47, %v1838_v29  ;;  %v9755_v0 = vpop.f32.mrf.mxu1  ;;  %v9775_v29 = vadd.s32 112, %v9489_v44  ;;  %v9783_v10 = vmul.u32.u64.low 3817748708, %v9735_v37  ;;  %v9784_v19 = vmul.u32.u64.high 3817748708, %v9735_v37, %v9783_v10 }
 0x1ae   : > { %v8070_v23 = vpop.f32.mrf.mxu0  ;;  %12588 = vst [vmem:[#allocation39_spill] sm:$0xff] %v9803_v32  ;;  %v12590_v38 = vmov 0  ;;  %v9822_v60 = vmul.u32.u64.low 3817748708, %v9767_v45  ;;  %v9823_v62 = vmul.u32.u64.high 3817748708, %v9767_v45, %v9822_v60  ;;  %v9836_v14 = vadd.f32 %v9495_v5, %v1816_v56 }
 0x1af   : > { %12581 = vst [vmem:[#allocation36_spill] sm:$0xff] %v9753_v3  ;;  %v9778_v47 = vadd.f32 %v8070_v23, %v9440_v6  ;;  %v9780_v25 = vpop.f32.mrf.mxu1  ;;  %v12585_v6 = vmov 0  ;;  %v9806_v23 = vsub.s32 %v9613_v13, %v3353_v58  ;;  %v12591_v38 = vsel %vm9817_vm5, 4294967295, %v12590_v38 }
 0x1b0   : > { %v2312_v2 = vpop.f32.mrf.mxu0  ;;  %v12586_v6 = vsel %vm9798_vm4, 4294967295, %v12585_v6  ;;  %12592 = vst [vmem:[#allocation41_spill] sm:$0xff] %v12591_v38  ;;  %v9826_v13 = vadd.s32 96, %v9489_v44  ;;  %v9832_v31 = vmul.u32.u64.low 3817748708, %v9775_v29  ;;  %v9833_v63 = vmul.u32.u64.high 3817748708, %v9775_v29, %v9832_v31  ;;  %12594 = vst [vmem:[#allocation43_spill] sm:$0xff] %v9836_v14 }
 0x1b1   : > { %12587 = vst [vmem:[#allocation38_spill] sm:$0xff] %v12586_v6  ;;  %12589 = vst [vmem:[#allocation40_spill] sm:$0xff] %v9806_v23  ;;  %v9809_v10 = vadd.f32 %v2312_v2, %v9443_v42  ;;  %v9811_v43 = vpop.f32.mrf.mxu1  ;;  %v9829_v42 = vsub.s32 %v9622_v51, %v3386_v59  ;;  %v3419_v2 = vmul.u32 18, %v3418_v33  ;;  %v9848_v51 = vsub.s32 %v9630_v15, %v3364_v17 }
 0x1b2   : > { %v8071_v58 = vpop.f32.mrf.mxu0  ;;  %v1820_v59 = vadd.f32 %v9511_v34, %v9592_v1  ;;  %vm3702_vm6 = vcmp.ne.s32.totalorder %v9806_v23, 0  ;;  %v9860_v5 = vadd.s32 120, %v9489_v44  ;;  %vm3738_vm8 = vcmp.lt.s32.totalorder %v9806_v23, 0 }
 0x1b3   : > { %12593 = vst [vmem:[#allocation42_spill] sm:$0xff] %v9829_v42  ;;  %v9839_v54 = vadd.f32 %v8071_v58, %v9447_v36  ;;  %v9841_v3 = vpop.f32.mrf.mxu1  ;;  %12595 = vst [vmem:[#allocation44_spill] sm:$0xff] %v9848_v51  ;;  %v9866_v17 = vadd.s32 18, %v9806_v23  ;;  %v9869_v34 = vmul.u32.u64.low 3817748708, %v9826_v13  ;;  %v9870_v1 = vmul.u32.u64.high 3817748708, %v9826_v13, %v9869_v34 }
 0x1b4   : > { %v9852_v31 = vpop.f32.mrf.mxu0  ;;  %vm3705_vm9 = vcmp.ne.s32.totalorder %v9829_v42, 0  ;;  %vm3741_vm10 = vcmp.lt.s32.totalorder %v9829_v42, 0  ;;  %v9875_v33 = vsub.s32 %v9652_v27, %v3419_v2  ;;  %v3396_v58 = vshrl.u32 %v9772_v41, 4  ;;  %vm9892_vm12 = vmand %vm3738_vm8, %vm3702_vm6 }
 0x1b5   : > { %v9862_v56 = vpop.f32.mrf.mxu1  ;;  %12596 = vst [vmem:[#allocation45_spill] sm:$0xff] %v9866_v17  ;;  %v9884_v9 = vadd.s32 18, %v9829_v42  ;;  %vm3703_vm11 = vcmp.ne.s32.totalorder %v9848_v51, 0  ;;  %v3429_v34 = vshrl.u32 %v9784_v19, 4  ;;  %v12599_v27 = vmov 0  ;;  %vm9915_vm15 = vmand %vm3741_vm10, %vm3705_vm9 }
 0x1b6   : > { %v8074_v15 = vpop.f32.mrf.mxu0  ;;  %12597 = vst [vmem:[#allocation46_spill] sm:$0xff] %v9875_v33  ;;  %v12600_v27 = vsel %vm9892_vm12, 4294967295, %v12599_v27  ;;  %vm3739_vm13 = vcmp.lt.s32.totalorder %v9848_v51, 0  ;;  %v9901_v41 = vmul.u32.u64.low 3817748708, %v9860_v5  ;;  %v9902_v2 = vmul.u32.u64.high 3817748708, %v9860_v5, %v9901_v41 }
 0x1b7   : > { %v9879_v36 = vadd.f32 %v8074_v15, %v9457_v24  ;;  %v9881_v60 = vpop.f32.mrf.mxu1  ;;  %12598 = vst [vmem:[#allocation47_spill] sm:$0xff] %v9884_v9  ;;  %12601 = vst [vmem:[#allocation48_spill] sm:$0xff] %v12600_v27  ;;  %v9898_v24 = vadd.s32 18, %v9848_v51  ;;  %v1824_v19 = vadd.f32 %v9545_v46, %v9603_v55  ;;  %v12603_v15 = vld [vmem:[#allocation4_spill] sm:$0xff]  ;;  %v12604_v61 = vmov 0 }
 0x1b8   : > { %v2328_v32 = vpop.f32.mrf.mxu0  ;;  %v12605_v61 = vsel %vm9915_vm15, 4294967295, %v12604_v61  ;;  %v3407_v6 = vshrl.u32 %v9823_v62, 4  ;;  %v9921_v41 = vadd.s32 104, %v9489_v44  ;;  %vm3708_vm1 = vcmp.ne.s32.totalorder %v9875_v33, 0  ;;  %vm9938_vm8 = vmand %vm3739_vm13, %vm3703_vm11 }
 0x1b9   : > { %12602 = vst [vmem:[#allocation49_spill] sm:$0xff] %v9898_v24  ;;  %v9907_v38 = vadd.f32 %v2328_v32, %v12603_v15  ;;  %v9909_v35 = vpop.f32.mrf.mxu1  ;;  %12606 = vst [vmem:[#allocation4_spill] sm:$0xff] %v12605_v61  ;;  %vm3744_vm6 = vcmp.lt.s32.totalorder %v9875_v33, 0  ;;  %v3397_v46 = vmul.u32 18, %v3396_v58  ;;  %v3462_v55 = vshrl.u32 %v9833_v63, 4  ;;  %v12607_v32 = vld [vmem:[#allocation15_spill] sm:$0xff] }
 0x1ba   : > { %v8075_v39 = vpop.f32.mrf.mxu0  ;;  %v9927_v15 = vadd.f32 %v12607_v32, %v1820_v59  ;;  %v12610_v62 = vmov 0  ;;  %v3430_v14 = vmul.u32 18, %v3429_v34  ;;  %v9943_v58 = vadd.s32 144, %v9489_v44  ;;  %vm9966_vm9 = vmand %vm3744_vm6, %vm3708_vm1 }
 0x1bb   : > { %v9930_v40 = vadd.f32 %v8075_v39, %v12609_v18  ;;  %v9932_v30 = vpop.f32.mrf.mxu1  ;;  %v12611_v62 = vsel %vm9938_vm8, 4294967295, %v12610_v62  ;;  %v1828_v63 = vadd.f32 %v9609_v49, %v9607_v50  ;;  %v9958_v34 = vadd.s32 18, %v9875_v33  ;;  %v12617_v39 = vld [vmem:[#allocation19_spill] sm:$0xff] }
 0x1bc   : > { %12608 = vst [vmem:[#allocation15_spill] sm:$0xff] %v9927_v15  ;;  %12612 = vst [vmem:[#allocation5_spill] sm:$0xff] %v12611_v62  ;;  %v9947_v59 = vpop.f32.mrf.mxu0  ;;  %v12614_v50 = vmov 0  ;;  %v3408_v49 = vmul.u32 18, %v3407_v6  ;;  %v3440_v18 = vshrl.u32 %v9870_v1, 4  ;;  %v9976_v42 = vadd.f32 %v12617_v39, %v1824_v19  ;;  %v12620_v6 = vld [vmem:[#allocation6_spill] sm:$0xff] }
 0x1bd   : > { %12613 = vst [vmem:[#allocation50_spill] sm:$0xff] %v9958_v34  ;;  %v9960_v32 = vpop.f32.mrf.mxu1  ;;  %v12615_v50 = vsel %vm9966_vm9, 4294967295, %v12614_v50  ;;  %v9972_v23 = vmul.u32.u64.low 3817748708, %v9921_v41  ;;  %v9973_v61 = vmul.u32.u64.high 3817748708, %v9921_v41, %v9972_v23  ;;  %v9983_v27 = vsub.s32 %v9728_v57, %v3397_v46 }
 0x1be   : > { %12616 = vst [vmem:[#allocation51_spill] sm:$0xff] %v12615_v50  ;;  %12618 = vst [vmem:[#allocation19_spill] sm:$0xff] %v9976_v42  ;;  %v8078_v9 = vpop.f32.mrf.mxu0  ;;  %v3463_v15 = vmul.u32 18, %v3462_v55  ;;  %v9991_v23 = vsub.s32 %v9735_v37, %v3430_v14  ;;  %v9994_v19 = vmul.u32.u64.low 3817748708, %v9943_v58  ;;  %v9995_v39 = vmul.u32.u64.high 3817748708, %v9943_v58, %v9994_v19  ;;  %v12626_v37 = vld [vmem:[#allocation7_spill] sm:$0xff] }
 0x1bf   : > { %12619 = vst [vmem:[#allocation52_spill] sm:$0xff] %v9983_v27  ;;  %v9986_v20 = vadd.f32 %v8078_v9, %v12620_v6  ;;  %v9988_v1 = vpop.f32.mrf.mxu1  ;;  %v10003_v46 = vsel %vm12470_vm2, %v9572_v22, 0  ;;  %v3473_v9 = vshrl.u32 %v9902_v2, 4  ;;  %v10007_v55 = vadd.s32 128, %v9489_v44  ;;  %v12632_v2 = vld [vmem:[#allocation8_spill] sm:$0xff] }
 0x1c0   : > { %12622 = vst [vmem:[#allocation53_spill] sm:$0xff] %v9988_v1  ;;  %12623 = vst [vmem:[#allocation54_spill] sm:$0xff] %v9991_v23  ;;  %v2344_v42 = vpop.f32.mrf.mxu0  ;;  %v10010_v14 = vadd.f32 %v9619_v53, %v1828_v63  ;;  %v10018_v17 = vsub.s32 %v9767_v45, %v3408_v49  ;;  %v3441_v57 = vmul.u32 18, %v3440_v18  ;;  %vm3706_vm10 = vcmp.ne.s32.totalorder %v9983_v27, 0 }
 0x1c1   : > { %12621 = vst [vmem:[#allocation6_spill] sm:$0xff] %v9986_v20  ;;  %12624 = vst [vmem:[#allocation55_spill] sm:$0xff] %v10003_v46  ;;  %v10013_v6 = vadd.f32 %v2344_v42, %v12626_v37  ;;  %v10015_v19 = vpop.f32.mrf.mxu1  ;;  %vm3742_vm11 = vcmp.lt.s32.totalorder %v9983_v27, 0  ;;  %v10023_v22 = vadd.s32 18, %v9983_v27  ;;  %v10026_v53 = vsub.s32 %v9775_v29, %v3463_v15 }
 0x1c2   : > { %12625 = vst [vmem:[#allocation56_spill] sm:$0xff] %v10010_v14  ;;  %12628 = vst [vmem:[#allocation57_spill] sm:$0xff] %v10015_v19  ;;  %v8079_v33 = vpop.f32.mrf.mxu0  ;;  %vm3709_vm13 = vcmp.ne.s32.totalorder %v9991_v23, 0  ;;  %vm3745_vm1 = vcmp.lt.s32.totalorder %v9991_v23, 0  ;;  %v10036_v45 = vadd.s32 18, %v9991_v23  ;;  %v3474_v49 = vmul.u32 18, %v3473_v9 }
 0x1c3   : > { %12627 = vst [vmem:[#allocation7_spill] sm:$0xff] %v10013_v6  ;;  %12629 = vst [vmem:[#allocation58_spill] sm:$0xff] %v10018_v17  ;;  %v10029_v42 = vadd.f32 %v8079_v33, %v12632_v2  ;;  %v10031_v63 = vpop.f32.mrf.mxu1  ;;  %v10041_v37 = vmul.u32.u64.low 3817748708, %v10007_v55  ;;  %v10042_v46 = vmul.u32.u64.high 3817748708, %v10007_v55, %v10041_v37  ;;  %v10045_v29 = vadd.s32 152, %v9489_v44 }
 0x1c4   : > { %12630 = vst [vmem:[#allocation59_spill] sm:$0xff] %v10023_v22  ;;  %12631 = vst [vmem:[#allocation60_spill] sm:$0xff] %v10026_v53  ;;  %v10038_v18 = vpop.f32.mrf.mxu0  ;;  %v1832_v33 = vadd.f32 %v9674_v26, %v9671_v7  ;;  %v10053_v2 = vsub.s32 %v9826_v13, %v3441_v57  ;;  %v3451_v34 = vshrl.u32 %v9973_v61, 4  ;;  %v10058_v37 = vadd.s32 18, %v10018_v17  ;;  %v12639_v26 = vld [vmem:[#allocation9_spill] sm:$0xff] }
 0x1c5   : > { %12633 = vst [vmem:[#allocation8_spill] sm:$0xff] %v10029_v42  ;;  %12634 = vst [vmem:[#allocation61_spill] sm:$0xff] %v10031_v63  ;;  %v10049_v15 = vpop.f32.mrf.mxu1  ;;  %v10061_v50 = vadd.s32 136, %v9489_v44  ;;  %v10064_v7 = vadd.s32 176, %v9489_v44  ;;  %v12642_v61 = vmov 0  ;;  %vm3712_vm3 = vcmp.ne.s32.totalorder %v10026_v53, 0 }
 0x1c6   : > { %12635 = vst [vmem:[#allocation62_spill] sm:$0xff] %v10036_v45  ;;  %12636 = vst [vmem:[#allocation63_spill] sm:$0xff] %v10049_v15  ;;  %v8082_v9 = vpop.f32.mrf.mxu0  ;;  %v3506_v13 = vshrl.u32 %v9995_v39, 4  ;;  %v10094_v62 = vsub.s32 %v9860_v5, %v3474_v49  ;;  %v12650_v39 = vld [vmem:[#allocation10_spill] sm:$0xff]  ;;  %v12655_v63 = vmov 0  ;;  %vm3746_vm6 = vcmp.lt.s32.totalorder %v10053_v2, 0 }
 0x1c7   : > { %12637 = vst [vmem:[#allocation64_spill] sm:$0xff] %v10053_v2  ;;  %12638 = vst [vmem:[#allocation65_spill] sm:$0xff] %v10058_v37  ;;  %v10067_v51 = vadd.f32 %v8082_v9, %v12639_v26  ;;  %v10069_v24 = vpop.f32.mrf.mxu1  ;;  %v12645_v9 = vmov 0  ;;  %v10091_v26 = vadd.s32 18, %v10026_v53  ;;  %v3452_v5 = vmul.u32 18, %v3451_v34  ;;  %v12662_v42 = vld [vmem:[#allocation11_spill] sm:$0xff] }
 0x1c8   : > { %12641 = vst [vmem:[#allocation66_spill] sm:$0xff] %v10069_v24  ;;  %vm10075_vm2 = vmand %vm3742_vm11, %vm3706_vm10  ;;  %v2360_v57 = vpop.f32.mrf.mxu0  ;;  %v10097_v14 = vmul.u32.u64.low 3817748708, %v10045_v29  ;;  %v10098_v24 = vmul.u32.u64.high 3817748708, %v10045_v29, %v10097_v14  ;;  %vm12653_vm10 = vcmp.ne.s32.totalorder %v10018_v17, 0  ;;  %vm12654_vm11 = vcmp.lt.s32.totalorder %v10018_v17, 0 }
 0x1c9   : > { %12640 = vst [vmem:[#allocation9_spill] sm:$0xff] %v10067_v51  ;;  %v12643_v61 = vsel %vm10075_vm2, 4294967295, %v12642_v61  ;;  %vm10086_vm9 = vmand %vm3745_vm1, %vm3709_vm13  ;;  %v10101_v51 = vadd.f32 %v2360_v57, %v12650_v39  ;;  %v10103_v15 = vpop.f32.mrf.mxu1  ;;  %vm3710_vm1 = vcmp.ne.s32.totalorder %v10053_v2, 0  ;;  %vm12658_vm8 = vcmp.lt.s32.totalorder %v10026_v53, 0  ;;  %v12670_v53 = vld [vmem:[#allocation12_spill] sm:$0xff] }
 0x1ca   : > { %12644 = vst [vmem:[#allocation67_spill] sm:$0xff] %v12643_v61  ;;  %v12646_v9 = vsel %vm10086_vm9, 4294967295, %v12645_v9  ;;  %12648 = vst [vmem:[#allocation69_spill] sm:$0xff] %v10091_v26  ;;  %v8083_v49 = vpop.f32.mrf.mxu0  ;;  %v12659_v14 = vmov 0  ;;  %v10124_v57 = vmul.u32.u64.low 3817748708, %v10061_v50  ;;  %v10125_v39 = vmul.u32.u64.high 3817748708, %v10061_v50, %v10124_v57 }
 0x1cb   : > { %12647 = vst [vmem:[#allocation68_spill] sm:$0xff] %v12646_v9  ;;  %12649 = vst [vmem:[#allocation70_spill] sm:$0xff] %v10094_v62  ;;  %v10132_v19 = vadd.f32 %v8083_v49, %v12662_v42  ;;  %v10134_v34 = vpop.f32.mrf.mxu1  ;;  %v10141_v1 = vadd.s32 18, %v10053_v2  ;;  %v3507_v20 = vmul.u32 18, %v3506_v13  ;;  %v10144_v57 = vadd.f32 %v9690_v8, %v1832_v33 }
 0x1cc   : > { %12651 = vst [vmem:[#allocation10_spill] sm:$0xff] %v10101_v51  ;;  %12652 = vst [vmem:[#allocation71_spill] sm:$0xff] %v10103_v15  ;;  %v10128_v15 = vmul.u32.u64.low 3817748708, %v10064_v7  ;;  %v10129_v51 = vmul.u32.u64.high 3817748708, %v10064_v7, %v10128_v15  ;;  %v10146_v4 = vpop.f32.mrf.mxu0  ;;  %v3484_v49 = vshrl.u32 %v10042_v46, 4  ;;  %v10160_v13 = vadd.s32 160, %v9489_v44 }
 0x1cd   : > { %vm10109_vm13 = vmand %vm12654_vm11, %vm12653_vm10  ;;  %12663 = vst [vmem:[#allocation11_spill] sm:$0xff] %v10141_v1  ;;  %v12665_v15 = vmov 0  ;;  %v10162_v8 = vpop.f32.mrf.mxu1  ;;  %v10174_v6 = vsub.s32 %v9921_v41, %v3452_v5  ;;  %v1836_v46 = vadd.f32 %v9739_v52, %v9680_v11  ;;  %v10180_v45 = vadd.s32 18, %v10094_v62  ;;  %v12676_v11 = vld [vmem:[#allocation14_spill] sm:$0xff]  ;;  %v12733_v22 = vld [vmem:[#allocation63_spill] sm:$0xff] }
 0x1ce   : > { %v12656_v63 = vsel %vm10109_vm13, 4294967295, %v12655_v63  ;;  %vm10119_vm15 = vmand %vm12658_vm8, %vm3712_vm3  ;;  %12664 = vst [vmem:[#allocation74_spill] sm:$0xff] %v10144_v57  ;;  %vm3713_vm8 = vcmp.ne.s32.totalorder %v10094_v62, 0  ;;  %v8086_v23 = vpop.f32.mrf.mxu0  ;;  %v10183_v33 = vadd.s32 184, %v9489_v44  ;;  %v2456_v42 = vadd.f32 %v9852_v31, %v9683_v12  ;;  %v12672_v31 = vld [vmem:[#allocation13_spill] sm:$0xff] }
 0x1cf   : > { %12657 = vst [vmem:[#allocation72_spill] sm:$0xff] %v12656_v63  ;;  %v12660_v14 = vsel %vm10119_vm15, 4294967295, %v12659_v14  ;;  %vm10154_vm3 = vmand %vm3746_vm6, %vm3710_vm1  ;;  %vm3749_vm6 = vcmp.lt.s32.totalorder %v10094_v62, 0  ;;  %v10188_v26 = vadd.f32 %v8086_v23, %v12670_v53  ;;  %v10190_v41 = vpop.f32.mrf.mxu1  ;;  %v10197_v52 = vsub.s32 %v9943_v58, %v3507_v20 }
 0x1d0   : > { %12661 = vst [vmem:[#allocation73_spill] sm:$0xff] %v12660_v14  ;;  %v12666_v15 = vsel %vm10154_vm3, 4294967295, %v12665_v15  ;;  %12668 = vst [vmem:[#allocation76_spill] sm:$0xff] %v10174_v6  ;;  %v2376_v5 = vpop.f32.mrf.mxu0  ;;  %v3485_v14 = vmul.u32 18, %v3484_v49  ;;  %v3517_v17 = vshrl.u32 %v10098_v24, 4  ;;  %v12673_v20 = vmov 0 }
 0x1d1   : > { %12667 = vst [vmem:[#allocation75_spill] sm:$0xff] %v12666_v15  ;;  %12669 = vst [vmem:[#allocation77_spill] sm:$0xff] %v10180_v45  ;;  %v10201_v37 = vmul.u32.u64.low 3817748708, %v10160_v13  ;;  %v10202_v12 = vmul.u32.u64.high 3817748708, %v10160_v13, %v10201_v37  ;;  %v10205_v23 = vadd.f32 %v2376_v5, %v12672_v31  ;;  %v10207_v53 = vpop.f32.mrf.mxu1  ;;  %vm3711_vm11 = vcmp.ne.s32.totalorder %v10174_v6, 0 }
 0x1d2   : > { %12671 = vst [vmem:[#allocation12_spill] sm:$0xff] %v10197_v52  ;;  %vm10213_vm10 = vmand %vm3749_vm6, %vm3713_vm8  ;;  %vm3747_vm1 = vcmp.lt.s32.totalorder %v10174_v6, 0  ;;  %v10220_v24 = vadd.s32 168, %v9489_v44  ;;  %v8087_v58 = vpop.f32.mrf.mxu0  ;;  %v3495_v37 = vshrl.u32 %v10125_v39, 4  ;;  %v3550_v49 = vshrl.u32 %v10129_v51, 4 }
 0x1d3   : > { %v12674_v20 = vsel %vm10213_vm10, 4294967295, %v12673_v20  ;;  %v10225_v5 = vmul.u32.u64.low 3817748708, %v10183_v33  ;;  %v10226_v31 = vmul.u32.u64.high 3817748708, %v10183_v33, %v10225_v5  ;;  %v10229_v2 = vadd.f32 %v8087_v58, %v12676_v11  ;;  %v10239_v39 = vld [vmem:[%s12439_s4 + $0xc] sm:$0xf]  ;;  %vm10252_vm8 = vmand %vm3747_vm1, %vm3711_vm11 }
 0x1d4   : > { %12675 = vst [vmem:[#allocation13_spill] sm:$0xff] %v12674_v20  ;;  %v10232_v1 = vadd.s32 18, %v10174_v6  ;;  %v10242_v51 = vadd.f32 %v9755_v0, %v1836_v46  ;;  %v10244_v15 = vpop.f32.mrf.mxu0  ;;  %v12679_v58 = vmov 0  ;;  %v10257_v5 = vsub.s32 %v10007_v55, %v3485_v14 }
 0x1d5   : > { %v12680_v58 = vsel %vm10252_vm8, 4294967295, %v12679_v58  ;;  %v3518_v63 = vmul.u32 18, %v3517_v17  ;;  %vm12683_vm6 = vcmask 1043456   ;;  %v10263_v0 = vadd.f32 %v9780_v25, %v9778_v47 }
 0x1d6   : > { %12677 = vst [vmem:[#allocation14_spill] sm:$0xff] %v10232_v1  ;;  %12678 = vst [vmem:[#allocation78_spill] sm:$0xff] %v10242_v51  ;;  %8534 = vmatprep.subr.msk.bf16.mxu0 %vm12683_vm6, %v10239_v39  ;;  %v10267_v46 = vadd.f32 %v9811_v43, %v9809_v10  ;;  %v10271_v11 = vadd.f32 %v9841_v3, %v9839_v54  ;;  %v10273_v51 = vpop.f32.mrf.mxu1  ;;  %v10276_v55 = vadd.s32 18, %v10197_v52  ;;  %v8090_v47 = vpop.f32.mrf.mxu0  ;;  %vm12685_vm11 = vcmp.ne.s32.totalorder %v10197_v52, 0  ;;  %v12690_v10 = vld [vmem:[#allocation16_spill] sm:$0xff] }
 0x1d7   : > { %12681 = vst [vmem:[#allocation79_spill] sm:$0xff] %v12680_v58  ;;  %12682 = vst [vmem:[#allocation80_spill] sm:$0xff] %v10257_v5  ;;  %v10279_v17 = vadd.f32 %v9862_v56, %v2456_v42  ;;  %v10283_v25 = vadd.f32 %v9881_v60, %v9879_v36  ;;  %vm12686_vm1 = vcmp.lt.s32.totalorder %v10197_v52, 0  ;;  %v12687_v54 = vmov 0  ;;  %v12696_v52 = vld [vmem:[#allocation18_spill] sm:$0xff] }
 0x1d8   : > { %12684 = vst [vmem:[#allocation81_spill] sm:$0xff] %v10276_v55  ;;  %vm10289_vm6 = vmand %vm12686_vm1, %vm12685_vm11  ;;  %v3496_v3 = vmul.u32 18, %v3495_v37  ;;  %v3551_v43 = vmul.u32 18, %v3550_v49  ;;  %v10294_v14 = vadd.f32 %v8090_v47, %v12690_v10  ;;  %v10306_v42 = vadd.f32 %v9909_v35, %v9907_v38  ;;  %v2392_v62 = vpop.f32.mrf.mxu0  ;;  %v10313_v47 = vpop.f32.mrf.mxu1  ;;  %v12692_v10 = vld [vmem:[#allocation17_spill] sm:$0xff] }
 0x1d9   : > { %v12688_v54 = vsel %vm10289_vm6, 4294967295, %v12687_v54  ;;  %v10301_v36 = vmul.u32.u64.low 3817748708, %v10220_v24  ;;  %v10302_v56 = vmul.u32.u64.high 3817748708, %v10220_v24, %v10301_v36  ;;  %v10310_v37 = vsub.s32 %v10045_v29, %v3518_v63 }
 0x1da   : > { %12689 = vst [vmem:[#allocation82_spill] sm:$0xff] %v12688_v54  ;;  %v3528_v49 = vshrl.u32 %v10202_v12, 4  ;;  %v10316_v60 = vadd.f32 %v2392_v62, %v12692_v10  ;;  %v10324_v35 = vadd.s32 208, %v9489_v44  ;;  %v8091_v38 = vpop.f32.mrf.mxu0  ;;  %v10327_v63 = vadd.s32 18, %v10257_v5 }
 0x1db   : > { %12691 = vst [vmem:[#allocation16_spill] sm:$0xff] %v10310_v37  ;;  %v10330_v29 = vsub.s32 %v10061_v50, %v3496_v3  ;;  %v10333_v62 = vsub.s32 %v10064_v7, %v3551_v43  ;;  %v3561_v12 = vshrl.u32 %v10226_v31, 4  ;;  %v2460_v10 = vadd.f32 %v9947_v59, %v9686_v16  ;;  %v10355_v16 = vpop.f32.mrf.mxu1 }
 0x1dc   : > { %12693 = vst [vmem:[#allocation17_spill] sm:$0xff] %v10327_v63  ;;  %v10340_v36 = vadd.f32 %v9932_v30, %v9930_v40  ;;  %v10343_v55 = vadd.f32 %v8091_v38, %v12696_v52  ;;  %v10346_v54 = vadd.s32 192, %v9489_v44  ;;  %v10348_v50 = vpop.f32.mrf.mxu0  ;;  %v3529_v7 = vmul.u32 18, %v3528_v49 }
 0x1dd   : > { %12694 = vst [vmem:[#allocation83_spill] sm:$0xff] %v10330_v29  ;;  %12695 = vst [vmem:[#allocation84_spill] sm:$0xff] %v10333_v62  ;;  %v10353_v31 = vadd.s32 216, %v9489_v44  ;;  %v10358_v30 = vadd.s32 18, %v10310_v37  ;;  %v10361_v40 = vmul.u32.u64.low 3817748708, %v10324_v35  ;;  %v10362_v59 = vmul.u32.u64.high 3817748708, %v10324_v35, %v10361_v40  ;;  %v10402_v45 = vpop.f32.mrf.mxu1 }
 0x1de   : > { %v10365_v52 = vadd.s32 200, %v9489_v44  ;;  %v8094_v3 = vpop.f32.mrf.mxu0  ;;  %v3562_v43 = vmul.u32 18, %v3561_v12  ;;  %vm12698_vm8 = vcmp.ne.s32.totalorder %v10257_v5, 0  ;;  %vm12699_vm10 = vcmp.lt.s32.totalorder %v10257_v5, 0  ;;  %v12724_v5 = vld [vmem:[#allocation6_spill] sm:$0xff] }
 0x1df   : > { %12697 = vst [vmem:[#allocation18_spill] sm:$0xff] %v10358_v30  ;;  %v10371_v49 = vadd.f32 %v8094_v3, %v9577_v28  ;;  %vm10377_vm3 = vmand %vm12699_vm10, %vm12698_vm8  ;;  %v12700_v38 = vmov 0  ;;  %v3539_v40 = vshrl.u32 %v10302_v56, 4  ;;  %vm12703_vm6 = vcmp.ne.s32.totalorder %v10310_v37, 0  ;;  %v12728_v30 = vld [vmem:[#allocation57_spill] sm:$0xff] }
 0x1e0   : > { %v12701_v38 = vsel %vm10377_vm3, 4294967295, %v12700_v38  ;;  %v10383_v6 = vmul.u32.u64.low 3817748708, %v10346_v54  ;;  %v10384_v1 = vmul.u32.u64.high 3817748708, %v10346_v54, %v10383_v6  ;;  %v2408_v58 = vpop.f32.mrf.mxu0  ;;  %vm12704_vm11 = vcmp.lt.s32.totalorder %v10310_v37, 0  ;;  %v12727_v37 = vld [vmem:[#allocation7_spill] sm:$0xff] }
 0x1e1   : > { %12702 = vst [vmem:[#allocation85_spill] sm:$0xff] %v12701_v38  ;;  %vm10390_vm1 = vmand %vm12704_vm11, %vm12703_vm6  ;;  %v12705_v28 = vmov 0  ;;  %v10396_v12 = vsub.s32 %v10160_v13, %v3529_v7  ;;  %v10399_v56 = vmul.u32.u64.low 3817748708, %v10353_v31  ;;  %v10400_v3 = vmul.u32.u64.high 3817748708, %v10353_v31, %v10399_v56  ;;  %v10471_v38 = vpop.f32.mrf.mxu1 }
 0x1e2   : > { %v12706_v28 = vsel %vm10390_vm1, 4294967295, %v12705_v28  ;;  %v10405_v6 = vadd.f32 %v2408_v58, %v9595_v48  ;;  %v10408_v20 = vadd.s32 18, %v10330_v29  ;;  %v10415_v27 = vadd.f32 %v9960_v32, %v2460_v10  ;;  %v8095_v7 = vpop.f32.mrf.mxu0 }
 0x1e3   : > { %12707 = vst [vmem:[#allocation86_spill] sm:$0xff] %v12706_v28  ;;  %12708 = vst [vmem:[#allocation87_spill] sm:$0xff] %v10396_v12  ;;  %v10411_v9 = vmul.u32.u64.low 3817748708, %v10365_v52  ;;  %v10412_v57 = vmul.u32.u64.high 3817748708, %v10365_v52, %v10411_v9  ;;  %v2464_v13 = vadd.f32 %v10038_v18, %v9710_v21  ;;  %vm12711_vm8 = vcmp.ne.s32.totalorder %v10330_v29, 0 }
 0x1e4   : > { %12709 = vst [vmem:[#allocation88_spill] sm:$0xff] %v10408_v20  ;;  %12710 = vst [vmem:[#allocation89_spill] sm:$0xff] %v10415_v27  ;;  %vm12712_vm6 = vcmp.lt.s32.totalorder %v10330_v29, 0  ;;  %v12713_v58 = vmov 0  ;;  %v10432_v32 = vadd.s32 18, %v10333_v62  ;;  %v12717_v9 = vld [vmem:[#allocation21_spill] sm:$0xff]  ;;  %v10450_v56 = vsub.s32 %v10183_v33, %v3562_v43  ;;  %v10456_v63 = vpop.f32.mrf.mxu0 }
 0x1e5   : > { %vm10427_vm11 = vmand %vm12712_vm6, %vm12711_vm8  ;;  %v10435_v10 = vadd.f32 %v8095_v7, %v12717_v9  ;;  %vm12718_vm10 = vcmp.ne.s32.totalorder %v10333_v62, 0  ;;  %vm12719_vm3 = vcmp.lt.s32.totalorder %v10333_v62, 0  ;;  %v12720_v18 = vmov 0  ;;  %v12725_v7 = vld [vmem:[#allocation53_spill] sm:$0xff]  ;;  %v12730_v33 = vld [vmem:[#allocation8_spill] sm:$0xff] }
 0x1e6   : > { %v12714_v58 = vsel %vm10427_vm11, 4294967295, %v12713_v58  ;;  %12716 = vst [vmem:[#allocation91_spill] sm:$0xff] %v10432_v32  ;;  %vm10445_vm15 = vmand %vm12719_vm3, %vm12718_vm10  ;;  %v3540_v48 = vmul.u32 18, %v3539_v40  ;;  %v10454_v9 = vadd.f32 %v12725_v7, %v12724_v5  ;;  %vm3718_vm8 = vcmp.ne.s32.totalorder %v10396_v12, 0  ;;  %v12731_v43 = vld [vmem:[#allocation61_spill] sm:$0xff]  ;;  %v12741_v62 = vld [vmem:[#allocation43_spill] sm:$0xff] }
 0x1e7   : > { %12715 = vst [vmem:[#allocation90_spill] sm:$0xff] %v12714_v58  ;;  %v12721_v18 = vsel %vm10445_vm15, 4294967295, %v12720_v18  ;;  %12723 = vst [vmem:[#allocation92_spill] sm:$0xff] %v10450_v56  ;;  %vm3754_vm6 = vcmp.lt.s32.totalorder %v10396_v12, 0  ;;  %v10461_v21 = vadd.s32 240, %v9489_v44  ;;  %v10465_v28 = vadd.f32 %v12728_v30, %v12727_v37  ;;  %v12742_v29 = vld [vmem:[#allocation25_spill] sm:$0xff] }
 0x1e8   : > { %12722 = vst [vmem:[#allocation21_spill] sm:$0xff] %v12721_v18  ;;  %12726 = vst [vmem:[#allocation6_spill] sm:$0xff] %v10454_v9  ;;  %v10469_v40 = vadd.f32 %v12731_v43, %v12730_v33  ;;  %v3594_v7 = vshrl.u32 %v10362_v59, 4  ;;  %v10479_v61 = vadd.f32 %v12733_v22, %v2464_v13  ;;  %v8098_v9 = vpop.f32.mrf.mxu0  ;;  %v10486_v30 = vadd.s32 18, %v10396_v12  ;;  %v12736_v43 = vld [vmem:[#allocation22_spill] sm:$0xff]  ;;  %v10515_v18 = vpop.f32.mrf.mxu1 }
 0x1e9   : > { %12729 = vst [vmem:[#allocation53_spill] sm:$0xff] %v10465_v28  ;;  %v10489_v33 = vadd.s32 224, %v9489_v44  ;;  %v10492_v58 = vadd.f32 %v8098_v9, %v12736_v43  ;;  %vm10498_vm3 = vmand %vm3754_vm6, %vm3718_vm8  ;;  %v12737_v22 = vmov 0  ;;  %vm3721_vm10 = vcmp.ne.s32.totalorder %v10450_v56, 0  ;;  %v12746_v28 = vld [vmem:[#allocation71_spill] sm:$0xff] }
 0x1ea   : > { %12732 = vst [vmem:[#allocation7_spill] sm:$0xff] %v10469_v40  ;;  %12734 = vst [vmem:[#allocation57_spill] sm:$0xff] %v10479_v61  ;;  %v12738_v22 = vsel %vm10498_vm3, 4294967295, %v12737_v22  ;;  %v10504_v59 = vsub.s32 %v10220_v24, %v3540_v48  ;;  %v3572_v13 = vshrl.u32 %v10384_v1, 4  ;;  %v2424_v37 = vpop.f32.mrf.mxu0  ;;  %vm3757_vm15 = vcmp.lt.s32.totalorder %v10450_v56, 0  ;;  %v12743_v48 = vld [vmem:[#allocation9_spill] sm:$0xff] }
 0x1eb   : > { %12735 = vst [vmem:[#allocation8_spill] sm:$0xff] %v10486_v30  ;;  %12739 = vst [vmem:[#allocation61_spill] sm:$0xff] %v12738_v22  ;;  %v3605_v9 = vshrl.u32 %v10400_v3, 4  ;;  %v10510_v43 = vmul.u32.u64.low 3817748708, %v10461_v21  ;;  %v10511_v5 = vmul.u32.u64.high 3817748708, %v10461_v21, %v10510_v43  ;;  %v2468_v32 = vadd.f32 %v10146_v4, %v12741_v62  ;;  %v12744_v61 = vld [vmem:[#allocation66_spill] sm:$0xff] }
 0x1ec   : > { %12740 = vst [vmem:[#allocation63_spill] sm:$0xff] %v10504_v59  ;;  %v10518_v20 = vadd.f32 %v2424_v37, %v12742_v29  ;;  %v3595_v24 = vmul.u32 18, %v3594_v7  ;;  %v3583_v1 = vshrl.u32 %v10412_v57, 4  ;;  %v10523_v40 = vadd.f32 %v12744_v61, %v12743_v48  ;;  %v12745_v3 = vld [vmem:[#allocation10_spill] sm:$0xff]  ;;  %v8099_v43 = vpop.f32.mrf.mxu0  ;;  %v12748_v62 = vld [vmem:[#allocation28_spill] sm:$0xff]  ;;  %vm10547_vm8 = vmand %vm3757_vm15, %vm3721_vm10 }
 0x1ed   : > { %v10527_v27 = vadd.f32 %v12746_v28, %v12745_v3  ;;  %v10534_v29 = vadd.s32 18, %v10450_v56  ;;  %v10538_v57 = vadd.f32 %v10134_v34, %v10132_v19  ;;  %v10541_v61 = vadd.f32 %v8099_v43, %v12748_v62  ;;  %v10562_v43 = vpop.f32.mrf.mxu1 }
 0x1ee   : > { %v12749_v28 = vmov 0  ;;  %vm3719_vm6 = vcmp.ne.s32.totalorder %v10504_v59, 0  ;;  %v3573_v7 = vmul.u32 18, %v3572_v13  ;;  %v10552_v37 = vpop.f32.mrf.mxu0  ;;  %vm3755_vm3 = vcmp.lt.s32.totalorder %v10504_v59, 0 }
 0x1ef   : > { %12747 = vst [vmem:[#allocation22_spill] sm:$0xff] %v10534_v29  ;;  %v12750_v28 = vsel %vm10547_vm8, 4294967295, %v12749_v28  ;;  %v3606_v19 = vmul.u32 18, %v3605_v9  ;;  %v10556_v34 = vmul.u32.u64.low 3817748708, %v10489_v33  ;;  %v10557_v48 = vmul.u32.u64.high 3817748708, %v10489_v33, %v10556_v34  ;;  %vm10593_vm15 = vmand %vm3755_vm3, %vm3719_vm6  ;;  %v2734_v29 = vpop.f32.mrf.mxu1 }
 0x1f0   : > { %12751 = vst [vmem:[#allocation43_spill] sm:$0xff] %v12750_v28  ;;  %v10560_v3 = vadd.f32 %v10162_v8, %v2468_v32  ;;  %v10565_v62 = vsub.s32 %v10324_v35, %v3595_v24  ;;  %v3584_v4 = vmul.u32 18, %v3583_v1  ;;  %v10568_v13 = vadd.s32 248, %v9489_v44  ;;  %v8102_v9 = vpop.f32.mrf.mxu0  ;;  %v12754_v24 = vld [vmem:[#allocation15_spill] sm:$0xff]  ;;  %v12755_v34 = vld [vmem:[#allocation32_spill] sm:$0xff] }
 0x1f1   : > { %v10572_v12 = vadd.f32 %v10190_v41, %v10188_v26  ;;  %v10579_v32 = vadd.s32 18, %v10504_v59  ;;  %v10582_v35 = vadd.s32 232, %v9489_v44  ;;  %v2472_v1 = vadd.f32 %v10244_v15, %v12754_v24  ;;  %v12759_v28 = vld [vmem:[#allocation3_spill] sm:$0xff] }
 0x1f2   : > { %12752 = vst [vmem:[#allocation25_spill] sm:$0xff] %v10565_v62  ;;  %v10587_v30 = vadd.f32 %v8102_v9, %v12755_v34  ;;  %v12756_v26 = vmov 0  ;;  %v10598_v41 = vsub.s32 %v10346_v54, %v3573_v7  ;;  %v10601_v8 = vadd.s32 272, %v9489_v44  ;;  %v2440_v9 = vpop.f32.mrf.mxu0 }
 0x1f3   : > { %12753 = vst [vmem:[#allocation9_spill] sm:$0xff] %v10579_v32  ;;  %v12757_v26 = vsel %vm10593_vm15, 4294967295, %v12756_v26  ;;  %v10605_v15 = vadd.f32 %v10207_v53, %v10205_v23  ;;  %v10608_v24 = vsub.s32 %v10353_v31, %v3606_v19  ;;  %v3638_v34 = vshrl.u32 %v10511_v5, 4  ;;  %v12769_v5 = vld [vmem:[#allocation20_spill] sm:$0xff] }
 0x1f4   : > { %12758 = vst [vmem:[#allocation66_spill] sm:$0xff] %v12757_v26  ;;  %v10612_v56 = vadd.s32 256, %v9489_v44  ;;  %v10615_v54 = vadd.f32 %v2440_v9, %v12759_v28  ;;  %vm3724_vm3 = vcmp.ne.s32.totalorder %v10565_v62, 0  ;;  %vm3760_vm10 = vcmp.lt.s32.totalorder %v10565_v62, 0  ;;  %v8103_v31 = vpop.f32.mrf.mxu0  ;;  %v12768_v9 = vld [vmem:[#allocation23_spill] sm:$0xff]  ;;  %v12779_v26 = vld [vmem:[#allocation24_spill] sm:$0xff] }
 0x1f5   : > { %v10620_v23 = vsub.s32 %v10365_v52, %v3584_v4  ;;  %v10624_v53 = vadd.f32 %v10273_v51, %v10229_v2  ;;  %v10631_v28 = vadd.s32 18, %v10565_v62  ;;  %v10634_v7 = vadd.s32 280, %v9489_v44  ;;  %v12764_v52 = vld [vmem:[#allocation36_spill] sm:$0xff]  ;;  %vm10655_vm11 = vmand %vm3760_vm10, %vm3724_vm3  ;;  %v12793_v62 = vld [vmem:[#allocation27_spill] sm:$0xff] }
 0x1f6   : > { %12760 = vst [vmem:[#allocation10_spill] sm:$0xff] %v10615_v54  ;;  %v10637_v19 = vadd.f32 %v10313_v47, %v2472_v1  ;;  %v10640_v4 = vadd.f32 %v8103_v31, %v12764_v52  ;;  %v10644_v2 = vpop.f32.mrf.mxu0  ;;  %v12770_v59 = vsel %vm9661_vm7, %v12768_v9, %v12769_v5  ;;  %v12773_v47 = vmov 0  ;;  %v8133_v52 = vpop.f32.mrf.mxu1  ;;  %v12776_v5 = vld [vmem:[#allocation19_spill] sm:$0xff] }
 0x1f7   : > { %12761 = vst [vmem:[#allocation71_spill] sm:$0xff] %v10620_v23  ;;  %12762 = vst [vmem:[#allocation28_spill] sm:$0xff] %v10631_v28  ;;  %vm10651_vm15 = vcmp.lt.s32.totalorder %v12770_v59, 16  ;;  %v12774_v47 = vsel %vm10655_vm11, 4294967295, %v12773_v47  ;;  %vm3725_vm1 = vcmp.ne.s32.totalorder %v10608_v24, 0  ;;  %vm3761_vm6 = vcmp.lt.s32.totalorder %v10608_v24, 0 }
 0x1f8   : > { %12763 = vst [vmem:[#allocation15_spill] sm:$0xff] %v10637_v19  ;;  %12765 = vst [vmem:[#allocation32_spill] sm:$0xff] %v10640_v4  ;;  %v3639_v1 = vmul.u32 18, %v3638_v34  ;;  %v3616_v31 = vshrl.u32 %v10557_v48, 4  ;;  %v10663_v51 = vadd.s32 18, %v10598_v41  ;;  %v10668_v59 = vadd.s32 264, %v9489_v44  ;;  %v8146_v4 = vpop.f32.mrf.mxu0 }
 0x1f9   : > { %12766 = vst [vmem:[#allocation3_spill] sm:$0xff] %v10644_v2  ;;  %12775 = vst [vmem:[#allocation36_spill] sm:$0xff] %v12774_v47  ;;  %v2476_v9 = vadd.f32 %v10348_v50, %v12776_v5  ;;  %v10675_v34 = vld [vmem:[%s12437_s2] ss:$0 sm:$0xff]  ;;  %v12778_v2 = vld [vmem:[#allocation30_spill] sm:$0xff]  ;;  %vm12783_vm10 = vcmp.ne.s32.totalorder %v10598_v41, 0 }
 0x1fa   : > { %v12780_v54 = vsel %vm9745_vm14, %v12778_v2, %v12779_v26  ;;  %vm12784_vm8 = vcmp.lt.s32.totalorder %v10598_v41, 0  ;;  %v10695_v50 = vadd.s32 18, %v10608_v24  ;;  %v10703_v26 = vadd.f32 %v10355_v16, %v10294_v14  ;;  %vm10714_vm14 = vmand %vm3761_vm6, %vm3725_vm1  ;;  %v2964_v16 = vpop.f32.mrf.mxu0  ;;  %v12792_v2 = vld [vmem:[#allocation33_spill] sm:$0xff] }
 0x1fb   : > { %vm10682_vm3 = vcmp.lt.s32.totalorder %v12780_v54, 16  ;;  %vm10690_vm7 = vmand %vm12784_vm8, %vm12783_vm10  ;;  %v10698_v5 = vmul.u32.u64.low 3817748708, %v10568_v13  ;;  %v10699_v48 = vmul.u32.u64.high 3817748708, %v10568_v13, %v10698_v5  ;;  %v3109_v54 = vadd.f32 %v8146_v4, %v10263_v0  ;;  %v10728_v0 = vld [vmem:[%s12438_s3] ss:$0 sm:$0xff] }
 0x1fc   : > { %12787 = vst [vmem:[#allocation26_spill] sm:$0xff] %v10703_v26  ;;  %v10719_v5 = vadd.s32 18, %v10620_v23  ;;  %v10723_v14 = vadd.f32 %v10402_v45, %v10316_v60  ;;  %v12794_v28 = vsel %vm9761_vm0, %v12792_v2, %v12793_v62  ;;  %vm12797_vm8 = vcmp.ne.s32.totalorder %v10620_v23, 0 }
 0x1fd   : > { %vm10735_vm1 = vcmp.lt.s32.totalorder %v12794_v28, 16  ;;  %vm12798_vm6 = vcmp.lt.s32.totalorder %v10620_v23, 0  ;;  %v12799_v45 = vmov 0  ;;  %v10748_v60 = vsub.s32 %v10461_v21, %v3639_v1  ;;  %v2737_v28 = vpop.f32.mrf.mxu1 }
 0x1fe   : > { %12790 = vst [vmem:[#allocation23_spill] sm:$0xff] %v10723_v14  ;;  %vm10743_vm10 = vmand %vm12798_vm6, %vm12797_vm8  ;;  %v3617_v14 = vmul.u32 18, %v3616_v31  ;;  %vm12801_vm11 = vcmask 1043456   ;;  %v10756_v62 = vadd.f32 %v10471_v38, %v10343_v55  ;;  %v3152_v2 = vmul.f32 %v10675_v34, %v3109_v54  ;;  %v8147_v38 = vpop.f32.mrf.mxu0  ;;  %v12804_v54 = vld [vmem:[#allocation35_spill] sm:$0xff] }
 0x1ff   : > { %v12800_v45 = vsel %vm10743_vm10, 4294967295, %v12799_v45  ;;  %v10752_v4 = vsel %vm12801_vm11, %v10239_v39, 0  ;;  %v3107_v26 = vadd.f32 %v2964_v16, %v10267_v46  ;;  %v10765_v1 = vadd.f32 %v10515_v18, %v2476_v9  ;;  %v12805_v46 = vld [vmem:[#allocation29_spill] sm:$0xff]  ;;  %v12809_v9 = vld [vmem:[#allocation56_spill] sm:$0xff] }
 0x200   : > { %12802 = vst [vmem:[#allocation20_spill] sm:$0xff] %v10756_v62  ;;  %v10769_v39 = vadd.f32 %v10562_v43, %v10371_v49  ;;  %v10772_v55 = vadd.f32 %v2734_v29, %v10405_v6  ;;  %v12806_v16 = vsel %vm9798_vm4, %v12804_v54, %v12805_v46  ;;  %v3195_v49 = vadd.f32 %v10728_v0, %v3152_v2  ;;  %v2967_v46 = vpop.f32.mrf.mxu0 }
 0x201   : > { %vm10779_vm0 = vcmp.lt.s32.totalorder %v12806_v16, 16  ;;  %v3150_v6 = vmul.f32 %v10675_v34, %v3107_v26  ;;  %v3110_v29 = vadd.f32 %v8147_v38, %v10271_v11  ;;  %v2480_v31 = vadd.f32 %v10456_v63, %v12809_v9  ;;  %v8136_v26 = vpop.f32.mrf.mxu1  ;;  %v12813_v63 = vld [vmem:[#allocation39_spill] sm:$0xff] }
 0x202   : > { %v10797_v54 = vadd.f32 %v8133_v52, %v10435_v10  ;;  %v10801_v2 = vsub.s32 %v10489_v33, %v3617_v14  ;;  %v3231_v16 = vmax.f32 %v3195_v49, 0.0  ;;  %v3108_v43 = vadd.f32 %v2967_v46, %v10279_v17  ;;  %v12814_v9 = vld [vmem:[#allocation31_spill] sm:$0xff]  ;;  %v8150_v21 = vpop.f32.mrf.mxu0  ;;  %v12819_v14 = vld [vmem:[#allocation45_spill] sm:$0xff]  ;;  %v12820_v49 = vld [vmem:[#allocation40_spill] sm:$0xff] }
 0x203   : > { %v3193_v11 = vadd.f32 %v10728_v0, %v3150_v6  ;;  %v3153_v38 = vmul.f32 %v10675_v34, %v3110_v29  ;;  %v12815_v10 = vsel %vm9817_vm5, %v12813_v63, %v12814_v9  ;;  %v3649_v17 = vshrl.u32 %v10699_v48, 4  ;;  %v12827_v48 = vld [vmem:[#allocation47_spill] sm:$0xff] }
 0x204   : > { %12810 = vst [vmem:[#allocation19_spill] sm:$0xff] %v10797_v54  ;;  %12811 = vst [vmem:[#allocation34_spill] sm:$0xff] %v10801_v2  ;;  %vm10811_vm11 = vcmp.lt.s32.totalorder %v12815_v10, 16  ;;  %v12821_v54 = vsel %vm9892_vm12, %v12819_v14, %v12820_v49  ;;  %v10827_v18 = vmul.u32.u64.low 3817748708, %v10582_v35  ;;  %v10828_v29 = vmul.u32.u64.high 3817748708, %v10582_v35, %v10827_v18  ;;  %v2980_v33 = vpop.f32.mrf.mxu0  ;;  %v12825_v14 = vld [vmem:[#allocation4_spill] sm:$0xff] }
 0x205   : > { %vm10820_vm8 = vcmp.lt.s32.totalorder %v12821_v54, 16  ;;  %v3988_v46 = vsel %vm10651_vm15, %v3231_v16, 0.0  ;;  %v3229_v63 = vmax.f32 %v3193_v11, 0.0  ;;  %v3196_v9 = vadd.f32 %v10728_v0, %v3153_v38  ;;  %v12828_v49 = vld [vmem:[#allocation42_spill] sm:$0xff] }
 0x206   : > { %v3151_v10 = vmul.f32 %v10675_v34, %v3108_v43  ;;  %vm12824_vm5 = vcmask 64512   ;;  %v3113_v54 = vadd.f32 %v8150_v21, %v10283_v25  ;;  %vm12826_vm12 = vnez %v12825_v14  ;;  %v2750_v43 = vpop.f32.mrf.mxu1  ;;  %v12948_v18 = vld [vmem:[#allocation18_spill] sm:$0xff] }
 0x207   : > { %4034 = vst.msk [vmem:[#allocation2 + $0x23] sm:$0xff] %vm12824_vm5, %v3988_v46  ;;  %v12829_v23 = vsel %vm12826_vm12, %v12827_v48, %v12828_v49  ;;  %v10846_v32 = vadd.s32 18, %v10748_v60  ;;  %v3986_v25 = vsel %vm10682_vm3, %v3229_v63, 0.0  ;;  %v3232_v21 = vmax.f32 %v3196_v9, 0.0  ;;  %v8151_v46 = vpop.f32.mrf.mxu0  ;;  %v12837_v63 = vld [vmem:[#allocation5_spill] sm:$0xff] }
 0x208   : > { %vm10841_vm6 = vcmp.lt.s32.totalorder %v12829_v23, 16  ;;  %v3194_v16 = vadd.f32 %v10728_v0, %v3151_v10  ;;  %v3111_v11 = vadd.f32 %v2980_v33, %v10306_v42  ;;  %vm12832_vm5 = vcmp.ne.s32.totalorder %v10748_v60, 0  ;;  %v12839_v9 = vld [vmem:[#allocation49_spill] sm:$0xff]  ;;  %v12840_v10 = vld [vmem:[#allocation44_spill] sm:$0xff] }
 0x209   : > { %vm12833_vm12 = vcmp.lt.s32.totalorder %v10748_v60, 0  ;;  %v10862_v38 = vadd.f32 %v2737_v28, %v2480_v31  ;;  %vm12836_vm4 = vcmask 64512   ;;  %v3156_v22 = vmul.f32 %v10675_v34, %v3113_v54 }
 0x20a   : > { %vm10858_vm10 = vmand %vm12833_vm12, %vm12832_vm5  ;;  %4032 = vst.msk [vmem:[#allocation2 + $0x13] sm:$0xff] %vm12836_vm4, %v3986_v25  ;;  %vm12838_vm3 = vnez %v12837_v63  ;;  %v10876_v14 = vadd.s32 18, %v10801_v2  ;;  %v3650_v48 = vmul.u32 18, %v3649_v17  ;;  %v3989_v28 = vsel %vm10735_vm1, %v3232_v21, 0.0  ;;  %v2983_v21 = vpop.f32.mrf.mxu0 }
 0x20b   : > { %v12841_v42 = vsel %vm12838_vm3, %v12839_v9, %v12840_v10  ;;  %v3230_v31 = vmax.f32 %v3194_v16, 0.0  ;;  %v3154_v54 = vmul.f32 %v10675_v34, %v3111_v11  ;;  %v3114_v49 = vadd.f32 %v8151_v46, %v10340_v36  ;;  %v12853_v36 = vld [vmem:[#allocation51_spill] sm:$0xff]  ;;  %v12855_v16 = vld [vmem:[#allocation50_spill] sm:$0xff]  ;;  %v12860_v10 = vld [vmem:[#allocation89_spill] sm:$0xff] }
 0x20c   : > { %vm10871_vm15 = vcmp.lt.s32.totalorder %v12841_v42, 16  ;;  %12844 = vst [vmem:[#allocation30_spill] sm:$0xff] %v10876_v14  ;;  %vm12845_vm4 = vcmp.ne.s32.totalorder %v10801_v2, 0  ;;  %vm12846_vm5 = vcmp.lt.s32.totalorder %v10801_v2, 0  ;;  %v12847_v25 = vmov 0  ;;  %v12856_v11 = vld [vmem:[#allocation46_spill] sm:$0xff] }
 0x20d   : > { %vm10886_vm12 = vmand %vm12846_vm5, %vm12845_vm4  ;;  %v10891_v63 = vadd.f32 %v8136_v26, %v10492_v58  ;;  %v10894_v17 = vadd.f32 %v2750_v43, %v10518_v20  ;;  %vm12852_vm1 = vcmask 64512   ;;  %v3199_v47 = vadd.f32 %v10728_v0, %v3156_v22  ;;  %v8137_v58 = vpop.f32.mrf.mxu1  ;;  %v12900_v14 = vld [vmem:[#allocation64_spill] sm:$0xff] }
 0x20e   : > { %v12848_v25 = vsel %vm10886_vm12, 4294967295, %v12847_v25  ;;  %4035 = vst.msk [vmem:[#allocation2 + $0x2b] sm:$0xff] %vm12852_vm1, %v3989_v28  ;;  %vm12854_vm3 = vnez %v12853_v36  ;;  %v3987_v26 = vsel %vm10779_vm0, %v3230_v31, 0.0  ;;  %v3197_v43 = vadd.f32 %v10728_v0, %v3154_v54  ;;  %vm12861_vm5 = vmmov %vm12852_vm1  ;;  %v8154_v36 = vpop.f32.mrf.mxu0 }
 0x20f   : > { %12849 = vst [vmem:[#allocation24_spill] sm:$0xff] %v12848_v25  ;;  %12850 = vst [vmem:[#allocation37_spill] sm:$0xff] %v10891_v63  ;;  %v12857_v46 = vsel %vm12854_vm3, %v12855_v16, %v12856_v11  ;;  %v3157_v22 = vmul.f32 %v10675_v34, %v3114_v49  ;;  %v3112_v42 = vadd.f32 %v2983_v21, %v12860_v10  ;;  %v3235_v28 = vmax.f32 %v3199_v47, 0.0  ;;  %v12862_v21 = vld [vmem:[#allocation6_spill] sm:$0xff]  ;;  %v12864_v47 = vld [vmem:[#allocation59_spill] sm:$0xff] }
 0x210   : > { %12851 = vst [vmem:[#allocation33_spill] sm:$0xff] %v10894_v17  ;;  %vm10903_vm4 = vcmp.lt.s32.totalorder %v12857_v46, 16  ;;  %4033 = vst.msk [vmem:[#allocation2 + $0x1b] sm:$0xff] %vm12861_vm5, %v3987_v26  ;;  %v10922_v11 = vsub.s32 %v10568_v13, %v3650_v48  ;;  %v3627_v62 = vshrl.u32 %v10828_v29, 4  ;;  %v3233_v31 = vmax.f32 %v3197_v43, 0.0  ;;  %v12865_v10 = vld [vmem:[#allocation52_spill] sm:$0xff]  ;;  %v2996_v43 = vpop.f32.mrf.mxu0 }
 0x211   : > { %v3200_v54 = vadd.f32 %v10728_v0, %v3157_v22  ;;  %v3155_v49 = vmul.f32 %v10675_v34, %v3112_v42  ;;  %v3117_v46 = vadd.f32 %v8154_v36, %v12862_v21  ;;  %v12866_v20 = vsel %vm10075_vm2, %v12864_v47, %v12865_v10  ;;  %v12869_v13 = vld [vmem:[#allocation74_spill] sm:$0xff]  ;;  %v2753_v10 = vpop.f32.mrf.mxu1  ;;  %vm12876_vm2 = vmmov %vm12861_vm5  ;;  %v12881_v16 = vld [vmem:[#allocation65_spill] sm:$0xff] }
 0x212   : > { %vm10933_vm0 = vcmp.lt.s32.totalorder %v12866_v20, 16  ;;  %v2484_v48 = vadd.f32 %v10552_v37, %v12869_v13  ;;  %v3992_v29 = vsel %vm10811_vm11, %v3235_v28, 0.0  ;;  %v12871_v42 = vld [vmem:[#allocation62_spill] sm:$0xff]  ;;  %v3990_v37 = vsel %vm10820_vm8, %v3233_v31, 0.0  ;;  %vm12888_vm3 = vmmov %vm12876_vm2 }
 0x213   : > { %v12872_v36 = vld [vmem:[#allocation54_spill] sm:$0xff]  ;;  %v10951_v20 = vmul.u32.u64.low 3817748708, %v10601_v8  ;;  %v10952_v47 = vmul.u32.u64.high 3817748708, %v10601_v8, %v10951_v20  ;;  %4038 = vst.msk [vmem:[#allocation2 + $0x43] sm:$0xff] %vm12876_vm2, %v3992_v29  ;;  %v3236_v52 = vmax.f32 %v3200_v54, 0.0  ;;  %v3198_v28 = vadd.f32 %v10728_v0, %v3155_v49  ;;  %v12886_v49 = vld [vmem:[#allocation7_spill] sm:$0xff] }
 0x214   : > { %v12873_v21 = vsel %vm10086_vm9, %v12871_v42, %v12872_v36  ;;  %v3160_v13 = vmul.f32 %v10675_v34, %v3117_v46  ;;  %v10960_v22 = vadd.f32 %v8137_v58, %v10541_v61  ;;  %vm12878_vm9 = vmmov %vm12876_vm2  ;;  %v12879_v42 = vld [vmem:[#allocation53_spill] sm:$0xff]  ;;  %v12882_v29 = vld [vmem:[#allocation58_spill] sm:$0xff]  ;;  %vm3729_vm8 = vcmp.ne.s32.totalorder %v10922_v11, 0 }
 0x215   : > { %vm10946_vm1 = vcmp.lt.s32.totalorder %v12873_v21, 16  ;;  %4036 = vst.msk [vmem:[#allocation2 + $0x33] sm:$0xff] %vm12878_vm9, %v3990_v37  ;;  %v3115_v36 = vadd.f32 %v2996_v43, %v12879_v42  ;;  %v8155_v21 = vpop.f32.mrf.mxu0  ;;  %v12883_v2 = vsel %vm10109_vm13, %v12881_v16, %v12882_v29  ;;  %v3628_v31 = vmul.u32 18, %v3627_v62  ;;  %v12889_v37 = vld [vmem:[#allocation73_spill] sm:$0xff]  ;;  %v12892_v20 = vld [vmem:[#allocation60_spill] sm:$0xff] }
 0x216   : > { %12877 = vst [vmem:[#allocation27_spill] sm:$0xff] %v10960_v22  ;;  %vm10969_vm11 = vcmp.lt.s32.totalorder %v12883_v2, 16  ;;  %v3993_v61 = vsel %vm10841_vm6, %v3236_v52, 0.0  ;;  %v3234_v58 = vmax.f32 %v3198_v28, 0.0  ;;  %v3203_v54 = vadd.f32 %v10728_v0, %v3160_v13  ;;  %v12891_v42 = vld [vmem:[#allocation69_spill] sm:$0xff]  ;;  %v4125_v52 = vld [vmem:[#allocation2 + $0x11] sm:$0xff] }
 0x217   : > { %v3118_v46 = vadd.f32 %v8155_v21, %v12886_v49  ;;  %v10978_v43 = vadd.f32 %v2753_v10, %v2484_v48  ;;  %4039 = vst.msk [vmem:[#allocation2 + $0x4b] sm:$0xff] %vm12888_vm3, %v3993_v61  ;;  %v3158_v2 = vmul.f32 %v10675_v34, %v3115_v36  ;;  %v2999_v16 = vpop.f32.mrf.mxu0  ;;  %vm12890_vm13 = vnez %v12889_v37  ;;  %v4070_v28 = vld [vmem:[#allocation2 + $0x10] sm:$0xff]  ;;  %v12896_v29 = vld [vmem:[#allocation57_spill] sm:$0xff]  ;;  %v4126_v49 = vld [vmem:[#allocation2 + $0x19] sm:$0xff] }
 0x218   : > { %v12893_v62 = vsel %vm12890_vm13, %v12891_v42, %v12892_v20  ;;  %v4128_v13 = vld [vmem:[#allocation2 + $0x29] sm:$0xff]  ;;  %vm3765_vm6 = vcmp.lt.s32.totalorder %v10922_v11, 0  ;;  %v10993_v48 = vadd.s32 18, %v10922_v11  ;;  %v3991_v10 = vsel %vm10871_vm15, %v3234_v58, 0.0  ;;  %v4071_v37 = vld [vmem:[#allocation2 + $0x18] sm:$0xff]  ;;  %v4127_v42 = vld [vmem:[#allocation2 + $0x21] sm:$0xff] }
 0x219   : > { %12887 = vst [vmem:[#allocation38_spill] sm:$0xff] %v10978_v43  ;;  %vm10987_vm5 = vcmp.lt.s32.totalorder %v12893_v62, 16  ;;  %v3239_v36 = vmax.f32 %v3203_v54, 0.0  ;;  %v3161_v21 = vmul.f32 %v10675_v34, %v3118_v46  ;;  %v3116_v61 = vadd.f32 %v2999_v16, %v12896_v29  ;;  %4037 = vst.msk [vmem:[#allocation2 + $0x3b] sm:$0xff] %vm12876_vm2, %v3991_v10  ;;  %v8158_v62 = vpop.f32.mrf.mxu0  ;;  %v12897_v43 = vld [vmem:[#allocation75_spill] sm:$0xff]  ;;  %v4072_v16 = vld [vmem:[#allocation2 + $0x20] sm:$0xff] }
 0x21a   : > { %v3201_v20 = vadd.f32 %v10728_v0, %v3158_v2  ;;  %vm12898_vm9 = vnez %v12897_v43  ;;  %v12899_v22 = vld [vmem:[#allocation11_spill] sm:$0xff]  ;;  %v4160_v58 = vpack.c.bf16 %v4126_v49, %v4125_v52  ;;  %v4105_v54 = vpack.c.bf16 %v4071_v37, %v4070_v28  ;;  %v4073_v63 = vld [vmem:[#allocation2 + $0x28] sm:$0xff]  ;;  %vm11019_vm15 = vmand %vm3765_vm6, %vm3729_vm8 }
 0x21b   : > { %v12901_v25 = vsel %vm12898_vm9, %v12899_v22, %v12900_v14  ;;  %v4161_v46 = vpack.c.bf16 %v4128_v13, %v4127_v42  ;;  %v3996_v29 = vsel %vm10903_vm4, %v3239_v36, 0.0  ;;  %v3204_v10 = vadd.f32 %v10728_v0, %v3161_v21  ;;  %vm12906_vm13 = vmmov %vm12876_vm2  ;;  %v3012_v9 = vpop.f32.mrf.mxu0  ;;  %v11033_v28 = vld [vmem:[%s12439_s4 + $0x10] sm:$0xf]  ;;  %v12908_v49 = vld [vmem:[#allocation55_spill] sm:$0xff] }
 0x21c   : > { %vm11006_vm3 = vcmp.lt.s32.totalorder %v12901_v25, 16  ;;  %v3159_v2 = vmul.f32 %v10675_v34, %v3116_v61  ;;  %v3121_v43 = vadd.f32 %v8158_v62, %v10523_v40  ;;  %4042 = vst.msk [vmem:[#allocation2 + $0x63] sm:$0xff] %vm12906_vm13, %v3996_v29  ;;  %v3237_v25 = vmax.f32 %v3201_v20, 0.0  ;;  %vm12907_vm4 = vmmov %vm12876_vm2  ;;  %8221 = vmatmul.mubr.msk.bf16.vlgmr.msra.gmra.mxu0 %vm12876_vm2, %v4105_v54  ;;  %v12920_v62 = vld [vmem:[#allocation14_spill] sm:$0xff]  ;;  %v13055_v14 = vld [vmem:[#allocation33_spill] sm:$0xff] }
 0x21d   : > { %8183 = vmatmul.mubr.msk.bf16.vlgmr.msra.gmra.mxu1 %vm12907_vm4, %v4160_v58  ;;  %v4106_v22 = vpack.c.bf16 %v4073_v63, %v4072_v16  ;;  %v11027_v40 = vsub.s32 %v10582_v35, %v3628_v31  ;;  %v3682_v52 = vshrl.u32 %v10952_v47, 4  ;;  %v3240_v13 = vmax.f32 %v3204_v10, 0.0  ;;  %vm12909_vm8 = vmmov %vm12876_vm2  ;;  %v12910_v35 = vld [vmem:[#allocation13_spill] sm:$0xff]  ;;  %v12913_v47 = vld [vmem:[#allocation70_spill] sm:$0xff]  ;;  %v8159_v20 = vpop.f32.mrf.mxu0  ;;  %8295 = vmatpush3.bf16.msra.mxu0 %v10752_v4 }
 0x21e   : > { %v3202_v36 = vadd.f32 %v10728_v0, %v3159_v2  ;;  %v3164_v21 = vmul.f32 %v10675_v34, %v3121_v43  ;;  %v3119_v61 = vadd.f32 %v3012_v9, %v10527_v27  ;;  %8257 = vmatpush3.bf16.msra.mxu1 %v12908_v49  ;;  %8186 = vmatprep.mubr.msk.bf16.mxu1 %vm12909_vm8, %v4161_v46  ;;  %v12912_v63 = vld [vmem:[#allocation77_spill] sm:$0xff]  ;;  %v3994_v42 = vsel %vm10933_vm0, %v3237_v25, 0.0  ;;  %vm12917_vm13 = vmmov %vm12876_vm2  ;;  %v12918_v27 = vld [vmem:[#allocation79_spill] sm:$0xff] }
 0x21f   : > { %vm12911_vm6 = vnez %v12910_v35  ;;  %8224 = vmatprep.mubr.msk.bf16.mxu0 %vm12917_vm13, %v4106_v22  ;;  %vm12919_vm4 = vnez %v12918_v27  ;;  %v12921_v58 = vld [vmem:[#allocation76_spill] sm:$0xff]  ;;  %v3873_v16 = vsel %vm11019_vm15, %v10993_v48, %v10922_v11  ;;  %vm12925_vm0 = vmmov %vm12909_vm8  ;;  %v3997_v10 = vsel %vm10946_vm1, %v3240_v13, 0.0  ;;  %v3015_v22 = vpop.f32.mrf.mxu0  ;;  %v12928_v49 = vld [vmem:[#allocation82_spill] sm:$0xff] }
 0x220   : > { %v12914_v31 = vsel %vm12911_vm6, %v12912_v63, %v12913_v47  ;;  %v12922_v54 = vsel %vm12919_vm4, %v12920_v62, %v12921_v58  ;;  %v11066_v17 = vmul.u32.u64.low 3817748708, %v10612_v56  ;;  %v11067_v29 = vmul.u32.u64.high 3817748708, %v10612_v56, %v11066_v17  ;;  %4040 = vst.msk [vmem:[#allocation2 + $0x53] sm:$0xff] %vm12925_vm0, %v3994_v42  ;;  %vm12927_vm6 = vmmov %vm12925_vm0  ;;  %v12930_v4 = vld [vmem:[#allocation81_spill] sm:$0xff]  ;;  %v12931_v35 = vld [vmem:[#allocation12_spill] sm:$0xff] }
 0x221   : > { %vm11045_vm9 = vcmp.lt.s32.totalorder %v12914_v31, 16  ;;  %vm11057_vm2 = vcmp.lt.s32.totalorder %v12922_v54, 16  ;;  %v3238_v2 = vmax.f32 %v3202_v36, 0.0  ;;  %v3207_v43 = vadd.f32 %v10728_v0, %v3164_v21  ;;  %4043 = vst.msk [vmem:[#allocation2 + $0x6b] sm:$0xff] %vm12927_vm6, %v3997_v10  ;;  %v4129_v13 = vld [vmem:[#allocation2 + $0x31] sm:$0xff]  ;;  %v4132_v21 = vld [vmem:[#allocation2 + $0x49] sm:$0xff]  ;;  %v8162_v54 = vpop.f32.mrf.mxu0 }
 0x222   : > { %v3162_v25 = vmul.f32 %v10675_v34, %v3119_v61  ;;  %vm12926_vm8 = vcmask 1043456   ;;  %v3122_v9 = vadd.f32 %v8159_v20, %v10538_v57  ;;  %vm12929_vm13 = vnez %v12928_v49  ;;  %v4074_v36 = vld [vmem:[#allocation2 + $0x30] sm:$0xff]  ;;  %v4130_v20 = vld [vmem:[#allocation2 + $0x39] sm:$0xff]  ;;  %v4131_v62 = vld [vmem:[#allocation2 + $0x41] sm:$0xff] }
 0x223   : > { %8535 = vmatprep.subr.msk.bf16.mxu1 %vm12926_vm8, %v11033_v28  ;;  %v12932_v63 = vsel %vm12929_vm13, %v12930_v4, %v12931_v35  ;;  %vm3727_vm1 = vcmp.ne.s32.totalorder %v11027_v40, 0  ;;  %v3683_v61 = vmul.u32 18, %v3682_v52  ;;  %v3995_v57 = vsel %vm10969_vm11, %v3238_v2, 0.0  ;;  %v4075_v27 = vld [vmem:[#allocation2 + $0x38] sm:$0xff]  ;;  %vm12935_vm8 = vmmov %vm12925_vm0  ;;  %v12936_v17 = vld [vmem:[#allocation85_spill] sm:$0xff] }
 0x224   : > { %vm11084_vm4 = vcmp.lt.s32.totalorder %v12932_v63, 16  ;;  %v3243_v47 = vmax.f32 %v3207_v43, 0.0  ;;  %v3205_v31 = vadd.f32 %v10728_v0, %v3162_v25  ;;  %v3120_v42 = vadd.f32 %v3015_v22, %v10560_v3  ;;  %4041 = vst.msk [vmem:[#allocation2 + $0x5b] sm:$0xff] %vm12935_vm8, %v3995_v57  ;;  %v12938_v10 = vld [vmem:[#allocation17_spill] sm:$0xff]  ;;  %v12939_v52 = vld [vmem:[#allocation80_spill] sm:$0xff]  ;;  %vm12943_vm11 = vmmov %vm12925_vm0 }
 0x225   : > { %v3165_v58 = vmul.f32 %v10675_v34, %v3122_v9  ;;  %vm12937_vm6 = vnez %v12936_v17  ;;  %v4162_v2 = vpack.c.bf16 %v4130_v20, %v4129_v13  ;;  %v4107_v43 = vpack.c.bf16 %v4075_v27, %v4074_v36  ;;  %v4076_v25 = vld [vmem:[#allocation2 + $0x40] sm:$0xff]  ;;  %v4077_v63 = vld [vmem:[#allocation2 + $0x48] sm:$0xff]  ;;  %v3028_v17 = vpop.f32.mrf.mxu0  ;;  %vm12944_vm8 = vmmov %vm12925_vm0  ;;  %v8140_v20 = vpop.f32.mrf.mxu1 }
 0x226   : > { %v12940_v49 = vsel %vm12937_vm6, %v12938_v10, %v12939_v52  ;;  %v4163_v3 = vpack.c.bf16 %v4132_v21, %v4131_v62  ;;  %v4000_v22 = vsel %vm10987_vm5, %v3243_v47, 0.0  ;;  %v3241_v4 = vmax.f32 %v3205_v31, 0.0  ;;  %vm12945_vm6 = vmmov %vm12925_vm0  ;;  %v12946_v36 = vld [vmem:[#allocation86_spill] sm:$0xff]  ;;  %v12949_v21 = vld [vmem:[#allocation16_spill] sm:$0xff] }
 0x227   : > { %vm11101_vm13 = vcmp.lt.s32.totalorder %v12940_v49, 16  ;;  %v3163_v9 = vmul.f32 %v10675_v34, %v3120_v42  ;;  %v3125_v35 = vadd.f32 %v8162_v54, %v10572_v12  ;;  %4046 = vst.msk [vmem:[#allocation2 + $0x83] sm:$0xff] %vm12943_vm11, %v4000_v22  ;;  %v3208_v57 = vadd.f32 %v10728_v0, %v3165_v58  ;;  %8187 = vmatmul.mubr.msk.bf16.gmra.mxu1 %vm12944_vm8, %v4162_v2  ;;  %v8163_v52 = vpop.f32.mrf.mxu0  ;;  %v12956_v22 = vld [vmem:[#allocation90_spill] sm:$0xff]  ;;  %v12976_v46 = vld [vmem:[#allocation8_spill] sm:$0xff] }
 0x228   : > { %8225 = vmatmul.mubr.msk.bf16.gmra.mxu0 %vm12945_vm6, %v4107_v43  ;;  %v4108_v13 = vpack.c.bf16 %v4077_v63, %v4076_v25  ;;  %vm12947_vm0 = vnez %v12946_v36  ;;  %v11123_v12 = vmul.u32.u64.low 3817748708, %v10634_v7  ;;  %v11124_v42 = vmul.u32.u64.high 3817748708, %v10634_v7, %v11123_v12  ;;  %v11175_v37 = vld [vmem:[%s12439_s4 + $0x14] sm:$0xf] }
 0x229   : > { %v12950_v47 = vsel %vm12947_vm0, %v12948_v18, %v12949_v21  ;;  %v3998_v27 = vsel %vm11006_vm3, %v3241_v4, 0.0  ;;  %v3206_v62 = vadd.f32 %v10728_v0, %v3163_v9  ;;  %v3168_v58 = vmul.f32 %v10675_v34, %v3125_v35  ;;  %vm12953_vm0 = vmmov %vm12945_vm6  ;;  %v12958_v4 = vld [vmem:[#allocation88_spill] sm:$0xff]  ;;  %v12959_v9 = vld [vmem:[#allocation83_spill] sm:$0xff]  ;;  %v3031_v36 = vpop.f32.mrf.mxu0 }
 0x22a   : > { %vm11118_vm5 = vcmp.lt.s32.totalorder %v12950_v47, 16  ;;  %v3123_v54 = vadd.f32 %v3028_v17, %v10605_v15  ;;  %8190 = vmatprep.mubr.msk.bf16.mxu1 %vm12953_vm0, %v4163_v3  ;;  %vm12954_vm11 = vmmov %vm12953_vm0  ;;  %v3244_v10 = vmax.f32 %v3208_v57, 0.0  ;;  %v11136_v49 = vadd.s32 18, %v11027_v40  ;;  %v4133_v57 = vld [vmem:[#allocation2 + $0x51] sm:$0xff]  ;;  %v12963_v18 = vld [vmem:[#allocation21_spill] sm:$0xff] }
 0x22b   : > { %4044 = vst.msk [vmem:[#allocation2 + $0x73] sm:$0xff] %vm12954_vm11, %v3998_v27  ;;  %vm12955_vm8 = vmmov %vm12953_vm0  ;;  %v11139_v33 = vmul.u32.u64.low 3817748708, %v10668_v59  ;;  %v11140_v2 = vmul.u32.u64.high 3817748708, %v10668_v59, %v11139_v33  ;;  %v3242_v43 = vmax.f32 %v3206_v62, 0.0  ;;  %v3211_v25 = vadd.f32 %v10728_v0, %v3168_v58  ;;  %v12966_v21 = vld [vmem:[#allocation84_spill] sm:$0xff]  ;;  %v4078_v27 = vld [vmem:[#allocation2 + $0x50] sm:$0xff] }
 0x22c   : > { %8228 = vmatprep.mubr.msk.bf16.mxu0 %vm12955_vm8, %v4108_v13  ;;  %v3166_v15 = vmul.f32 %v10675_v34, %v3123_v54  ;;  %v3126_v3 = vadd.f32 %v8163_v52, %v10624_v53  ;;  %vm12957_vm3 = vnez %v12956_v22  ;;  %v11155_v17 = vadd.f32 %v8140_v20, %v10587_v30  ;;  %v12965_v53 = vld [vmem:[#allocation91_spill] sm:$0xff]  ;;  %v4136_v62 = vld [vmem:[#allocation2 + $0x69] sm:$0xff]  ;;  %v2766_v20 = vpop.f32.mrf.mxu1  ;;  %v4135_v22 = vld [vmem:[#allocation2 + $0x61] sm:$0xff] }
 0x22d   : > { %v12960_v35 = vsel %vm12957_vm3, %v12958_v4, %v12959_v9  ;;  %v4001_v13 = vsel %vm11045_vm9, %v3244_v10, 0.0  ;;  %vm12964_vm0 = vnez %v12963_v18  ;;  %v11169_v58 = vsub.s32 %v10601_v8, %v3683_v61  ;;  %vm12970_vm9 = vmmov %vm12955_vm8  ;;  %v4134_v8 = vld [vmem:[#allocation2 + $0x59] sm:$0xff]  ;;  %v8166_v9 = vpop.f32.mrf.mxu0 }
 0x22e   : > { %vm11150_vm6 = vcmp.lt.s32.totalorder %v12960_v35, 16  ;;  %v12967_v47 = vsel %vm12964_vm0, %v12965_v53, %v12966_v21  ;;  %v3660_v30 = vshrl.u32 %v11067_v29, 4  ;;  %4047 = vst.msk [vmem:[#allocation2 + $0x8b] sm:$0xff] %vm12970_vm9, %v4001_v13  ;;  %v3999_v54 = vsel %vm11057_vm2, %v3242_v43, 0.0  ;;  %v4079_v61 = vld [vmem:[#allocation2 + $0x58] sm:$0xff]  ;;  %vm12972_vm3 = vmmov %vm12970_vm9  ;;  %v12974_v35 = vld [vmem:[#allocation61_spill] sm:$0xff] }
 0x22f   : > { %vm11164_vm11 = vcmp.lt.s32.totalorder %v12967_v47, 16  ;;  %v3247_v10 = vmax.f32 %v3211_v25, 0.0  ;;  %v3209_v52 = vadd.f32 %v10728_v0, %v3166_v15  ;;  %v3169_v33 = vmul.f32 %v10675_v34, %v3126_v3  ;;  %4045 = vst.msk [vmem:[#allocation2 + $0x7b] sm:$0xff] %vm12972_vm3, %v3999_v54  ;;  %v12973_v29 = vld [vmem:[#allocation15_spill] sm:$0xff]  ;;  %v4080_v53 = vld [vmem:[#allocation2 + $0x60] sm:$0xff]  ;;  %v12981_v54 = vld [vmem:[#allocation26_spill] sm:$0xff] }
 0x230   : > { %vm12971_vm8 = vcmask 1043456   ;;  %v3124_v4 = vadd.f32 %v3031_v36, %v12973_v29  ;;  %vm12975_vm0 = vnez %v12974_v35  ;;  %v12977_v43 = vld [vmem:[#allocation87_spill] sm:$0xff]  ;;  %v4164_v3 = vpack.c.bf16 %v4134_v8, %v4133_v57  ;;  %v4081_v35 = vld [vmem:[#allocation2 + $0x68] sm:$0xff]  ;;  %v12985_v57 = vld [vmem:[#allocation10_spill] sm:$0xff] }
 0x231   : > { %8536 = vmatprep.subr.msk.bf16.mxu0 %vm12971_vm8, %v11175_v37  ;;  %v12978_v25 = vsel %vm12975_vm0, %v12976_v46, %v12977_v43  ;;  %v4109_v13 = vpack.c.bf16 %v4079_v61, %v4078_v27  ;;  %v4165_v18 = vpack.c.bf16 %v4136_v62, %v4135_v22  ;;  %v4004_v21 = vsel %vm11084_vm4, %v3247_v10, 0.0  ;;  %v3044_v62 = vpop.f32.mrf.mxu0  ;;  %vm12986_vm4 = vmmov %vm12972_vm3  ;;  %v12991_v8 = vld [vmem:[#allocation92_spill] sm:$0xff] }
 0x232   : > { %vm11191_vm2 = vcmp.lt.s32.totalorder %v12978_v25, 16  ;;  %v3245_v47 = vmax.f32 %v3209_v52, 0.0  ;;  %v3212_v36 = vadd.f32 %v10728_v0, %v3169_v33  ;;  %v3129_v29 = vadd.f32 %v8166_v9, %v12981_v54  ;;  %4050 = vst.msk [vmem:[#allocation2 + $0xa3] sm:$0xff] %vm12972_vm3, %v4004_v21  ;;  %8191 = vmatmul.mubr.msk.bf16.gmra.mxu1 %vm12986_vm4, %v4164_v3  ;;  %vm12987_vm0 = vmmov %vm12972_vm3  ;;  %v12988_v52 = vld [vmem:[#allocation43_spill] sm:$0xff]  ;;  %v12990_v33 = vld [vmem:[#allocation22_spill] sm:$0xff] }
 0x233   : > { %vm12982_vm9 = vcmp.lt.s32.totalorder %v11027_v40, 0  ;;  %v11208_v27 = vadd.f32 %v2766_v20, %v12985_v57  ;;  %v3167_v26 = vmul.f32 %v10675_v34, %v3124_v4  ;;  %8229 = vmatmul.mubr.msk.bf16.gmra.mxu0 %vm12987_vm0, %v4109_v13  ;;  %v4110_v10 = vpack.c.bf16 %v4081_v35, %v4080_v53  ;;  %v12995_v25 = vld [vmem:[#allocation23_spill] sm:$0xff]  ;;  %vm12997_vm3 = vmmov %vm12987_vm0  ;;  %v8167_v53 = vpop.f32.mrf.mxu0  ;;  %v12999_v21 = vld [vmem:[#allocation66_spill] sm:$0xff] }
 0x234   : > { %vm11203_vm8 = vmand %vm12982_vm9, %vm3727_vm1  ;;  %vm12989_vm15 = vnez %v12988_v52  ;;  %v3661_v20 = vmul.u32 18, %v3660_v30  ;;  %v4002_v9 = vsel %vm11101_vm13, %v3245_v47, 0.0  ;;  %v3248_v4 = vmax.f32 %v3212_v36, 0.0  ;;  %v13001_v30 = vld [vmem:[#allocation9_spill] sm:$0xff]  ;;  %v13002_v54 = vld [vmem:[#allocation63_spill] sm:$0xff] }
 0x235   : > { %v12992_v61 = vsel %vm12989_vm15, %v12990_v33, %v12991_v8  ;;  %v3172_v43 = vmul.f32 %v10675_v34, %v3129_v29  ;;  %v3127_v3 = vadd.f32 %v3044_v62, %v12995_v25  ;;  %vm12996_vm9 = vmmov %vm12987_vm0  ;;  %4048 = vst.msk [vmem:[#allocation2 + $0x93] sm:$0xff] %vm12997_vm3, %v4002_v9  ;;  %v3210_v13 = vadd.f32 %v10728_v0, %v3167_v26  ;;  %v13006_v57 = vld [vmem:[#allocation20_spill] sm:$0xff]  ;;  %v4137_v52 = vld [vmem:[#allocation2 + $0x71] sm:$0xff] }
 0x236   : > { %vm11219_vm1 = vcmp.lt.s32.totalorder %v12992_v61, 16  ;;  %8194 = vmatprep.mubr.msk.bf16.mxu1 %vm12996_vm9, %v4165_v18  ;;  %vm12998_vm15 = vmmov %vm12987_vm0  ;;  %vm13000_vm4 = vnez %v12999_v21  ;;  %v3871_v18 = vsel %vm11203_vm8, %v11136_v49, %v11027_v40  ;;  %vm3732_vm0 = vcmp.ne.s32.totalorder %v11169_v58, 0  ;;  %v4082_v33 = vld [vmem:[#allocation2 + $0x70] sm:$0xff]  ;;  %v13010_v21 = vld [vmem:[#allocation25_spill] sm:$0xff] }
 0x237   : > { %8232 = vmatprep.mubr.msk.bf16.mxu0 %vm12998_vm15, %v4110_v10  ;;  %v13003_v6 = vsel %vm13000_vm4, %v13001_v30, %v13002_v54  ;;  %vm3768_vm9 = vcmp.lt.s32.totalorder %v11169_v58, 0  ;;  %v4005_v36 = vsel %vm11118_vm5, %v3248_v4, 0.0  ;;  %v3215_v29 = vadd.f32 %v10728_v0, %v3172_v43  ;;  %v3047_v10 = vpop.f32.mrf.mxu0  ;;  %v4140_v8 = vld [vmem:[#allocation2 + $0x89] sm:$0xff] }
 0x238   : > { %vm11236_vm13 = vcmp.lt.s32.totalorder %v13003_v6, 16  ;;  %v3170_v35 = vmul.f32 %v10675_v34, %v3127_v3  ;;  %v3130_v26 = vadd.f32 %v8167_v53, %v13006_v57  ;;  %4051 = vst.msk [vmem:[#allocation2 + $0xab] sm:$0xff] %vm12997_vm3, %v4005_v36  ;;  %v3246_v62 = vmax.f32 %v3210_v13, 0.0  ;;  %v13007_v53 = vld [vmem:[#allocation36_spill] sm:$0xff] }
 0x239   : > { %v11253_v61 = vsub.s32 %v10612_v56, %v3661_v20  ;;  %v3693_v9 = vshrl.u32 %v11124_v42, 4  ;;  %v3671_v31 = vshrl.u32 %v11140_v2, 4  ;;  %v3251_v4 = vmax.f32 %v3215_v29, 0.0  ;;  %v13009_v13 = vld [vmem:[#allocation28_spill] sm:$0xff]  ;;  %v4083_v42 = vld [vmem:[#allocation2 + $0x78] sm:$0xff]  ;;  %v8170_v6 = vpop.f32.mrf.mxu0 }
 0x23a   : > { %v3213_v43 = vadd.f32 %v10728_v0, %v3170_v35  ;;  %v3173_v25 = vmul.f32 %v10675_v34, %v3130_v26  ;;  %v3128_v3 = vadd.f32 %v3047_v10, %v10765_v1  ;;  %vm13008_vm5 = vnez %v13007_v53  ;;  %v4138_v56 = vld [vmem:[#allocation2 + $0x79] sm:$0xff]  ;;  %v4139_v20 = vld [vmem:[#allocation2 + $0x81] sm:$0xff] }
 0x23b   : > { %v13011_v30 = vsel %vm13008_vm5, %v13009_v13, %v13010_v21  ;;  %v4003_v2 = vsel %vm11150_vm6, %v3246_v62, 0.0  ;;  %v13014_v1 = vsel %vm10690_vm7, %v10663_v51, %v10598_v41  ;;  %v4166_v29 = vpack.c.bf16 %v4138_v56, %v4137_v52  ;;  %v4084_v26 = vld [vmem:[#allocation2 + $0x80] sm:$0xff]  ;;  %v4085_v53 = vld [vmem:[#allocation2 + $0x88] sm:$0xff]  ;;  %vm13017_vm7 = vmmov %vm12997_vm3  ;;  %v3060_v51 = vpop.f32.mrf.mxu0 }
 0x23c   : > { %vm11265_vm15 = vcmp.lt.s32.totalorder %v13011_v30, 16  ;;  %vm11276_vm4 = vcmp.lt.s32.totalorder %v13014_v1, 16  ;;  %v4111_v35 = vpack.c.bf16 %v4083_v42, %v4082_v33  ;;  %v4167_v57 = vpack.c.bf16 %v4140_v8, %v4139_v20  ;;  %4049 = vst.msk [vmem:[#allocation2 + $0x9b] sm:$0xff] %vm12997_vm3, %v4003_v2  ;;  %vm13018_vm6 = vmmov %vm12997_vm3  ;;  %v13032_v20 = vld [vmem:[#allocation19_spill] sm:$0xff]  ;;  %v13033_v2 = vld [vmem:[#allocation78_spill] sm:$0xff] }
 0x23d   : > { %v4008_v63 = vsel %vm11164_vm11, %v3251_v4, 0.0  ;;  %v3249_v62 = vmax.f32 %v3213_v43, 0.0  ;;  %v3216_v10 = vadd.f32 %v10728_v0, %v3173_v25  ;;  %v3171_v44 = vmul.f32 %v10675_v34, %v3128_v3  ;;  %8195 = vmatmul.mubr.msk.bf16.gmra.mxu1 %vm13018_vm6, %v4166_v29  ;;  %vm13019_vm5 = vmmov %vm12997_vm3  ;;  %v8171_v15 = vpop.f32.mrf.mxu0  ;;  %v13035_v1 = vld [vmem:[#allocation32_spill] sm:$0xff] }
 0x23e   : > { %4054 = vst.msk [vmem:[#allocation2 + $0xc3] sm:$0xff] %vm13017_vm7, %v4008_v63  ;;  %v3133_v41 = vadd.f32 %v8170_v6, %v10769_v39  ;;  %8233 = vmatmul.mubr.msk.bf16.gmra.mxu0 %vm13019_vm5, %v4111_v35  ;;  %v4112_v52 = vpack.c.bf16 %v4085_v53, %v4084_v26  ;;  %v13020_v12 = vsel %vm10714_vm14, %v10695_v50, %v10608_v24  ;;  %v11299_v8 = vadd.s32 18, %v11169_v58  ;;  %v8141_v39 = vpop.f32.mrf.mxu1  ;;  %vm11310_vm14 = vmand %vm3768_vm9, %vm3732_vm0  ;;  %v13034_v6 = vld [vmem:[#allocation3_spill] sm:$0xff] }
 0x23f   : > { %vm11294_vm11 = vcmp.lt.s32.totalorder %v13020_v12, 16  ;;  %v3694_v4 = vmul.u32 18, %v3693_v9  ;;  %v4006_v43 = vsel %vm11191_vm2, %v3249_v62, 0.0  ;;  %v3252_v25 = vmax.f32 %v3216_v10, 0.0  ;;  %8198 = vmatprep.mubr.msk.bf16.mxu1 %vm12997_vm3, %v4167_v57  ;;  %vm13025_vm7 = vmmov %vm12997_vm3 }
 0x240   : > { %v3214_v3 = vadd.f32 %v10728_v0, %v3171_v44  ;;  %v3131_v19 = vadd.f32 %v3060_v51, %v10772_v55  ;;  %4052 = vst.msk [vmem:[#allocation2 + $0xb3] sm:$0xff] %vm13025_vm7, %v4006_v43  ;;  %v3176_v50 = vmul.f32 %v10675_v34, %v3133_v41  ;;  %vm13026_vm2 = vmmov %vm12997_vm3  ;;  %vm13027_vm6 = vnez %v12800_v45  ;;  %v13028_v55 = vld [vmem:[#allocation71_spill] sm:$0xff] }
 0x241   : > { %8236 = vmatprep.mubr.msk.bf16.mxu0 %vm13026_vm2, %v4112_v52  ;;  %v13029_v9 = vsel %vm13027_vm6, %v10719_v5, %v13028_v55  ;;  %vm3730_vm0 = vcmp.ne.s32.totalorder %v11253_v61, 0  ;;  %vm3766_vm9 = vcmp.lt.s32.totalorder %v11253_v61, 0  ;;  %v3672_v21 = vmul.u32 18, %v3671_v31  ;;  %vm13036_vm3 = vmmov %vm13026_vm2  ;;  %v3063_v31 = vpop.f32.mrf.mxu0  ;;  %v4141_v44 = vld [vmem:[#allocation2 + $0x91] sm:$0xff] }
 0x242   : > { %vm11322_vm5 = vcmp.lt.s32.totalorder %v13029_v9, 16  ;;  %v4009_v30 = vsel %vm11219_vm1, %v3252_v25, 0.0  ;;  %v3250_v56 = vmax.f32 %v3214_v3, 0.0  ;;  %v3174_v42 = vmul.f32 %v10675_v34, %v3131_v19  ;;  %vm13042_vm7 = vmmov %vm13026_vm2  ;;  %v13043_v3 = vld [vmem:[#allocation37_spill] sm:$0xff]  ;;  %v13046_v55 = vld [vmem:[#allocation34_spill] sm:$0xff] }
 0x243   : > { %v3134_v45 = vadd.f32 %v8171_v15, %v13032_v20  ;;  %v11334_v5 = vadd.f32 %v13034_v6, %v13033_v2  ;;  %v11337_v29 = vadd.f32 %v8141_v39, %v13035_v1  ;;  %4055 = vst.msk [vmem:[#allocation2 + $0xcb] sm:$0xff] %vm13036_vm3, %v4009_v30  ;;  %v3219_v35 = vadd.f32 %v10728_v0, %v3176_v50  ;;  %v8174_v47 = vpop.f32.mrf.mxu0  ;;  %v4142_v53 = vld [vmem:[#allocation2 + $0x99] sm:$0xff]  ;;  %v4143_v51 = vld [vmem:[#allocation2 + $0xa1] sm:$0xff]  ;;  %v13045_v15 = vld [vmem:[#allocation30_spill] sm:$0xff] }
 0x244   : > { %v13037_v22 = vsel %vm10858_vm10, %v10846_v32, %v10748_v60  ;;  %v3876_v26 = vsel %vm11310_vm14, %v11299_v8, %v11169_v58  ;;  %v4007_v63 = vsel %vm11236_vm13, %v3250_v56, 0.0  ;;  %v3217_v62 = vadd.f32 %v10728_v0, %v3174_v42  ;;  %vm11363_vm10 = vmand %vm3766_vm9, %vm3730_vm0  ;;  %v4087_v41 = vld [vmem:[#allocation2 + $0x98] sm:$0xff] }
 0x245   : > { %vm11346_vm1 = vcmp.lt.s32.totalorder %v13037_v22, 16  ;;  %v3177_v10 = vmul.f32 %v10675_v34, %v3134_v45  ;;  %v3132_v23 = vadd.f32 %v3063_v31, %v10862_v38  ;;  %4053 = vst.msk [vmem:[#allocation2 + $0xbb] sm:$0xff] %vm13042_vm7, %v4007_v63  ;;  %v3255_v32 = vmax.f32 %v3219_v35, 0.0  ;;  %v3076_v56 = vpop.f32.mrf.mxu0  ;;  %vm13053_vm6 = vmmov %vm13036_vm3  ;;  %v4089_v31 = vld [vmem:[#allocation2 + $0xa8] sm:$0xff] }
 0x246   : > { %v11369_v52 = vadd.s32 18, %v11253_v61  ;;  %v11372_v38 = vsub.s32 %v10634_v7, %v3694_v4  ;;  %v11375_v12 = vsub.s32 %v10668_v59, %v3672_v21  ;;  %v3253_v39 = vmax.f32 %v3217_v62, 0.0  ;;  %v4086_v7 = vld [vmem:[#allocation2 + $0x90] sm:$0xff]  ;;  %v4088_v59 = vld [vmem:[#allocation2 + $0xa0] sm:$0xff]  ;;  %vm13056_vm0 = vmmov %vm13036_vm3 }
 0x247   : > { %v3220_v43 = vadd.f32 %v10728_v0, %v3177_v10  ;;  %v3175_v25 = vmul.f32 %v10675_v34, %v3132_v23  ;;  %v3137_v19 = vadd.f32 %v8174_v47, %v13043_v3  ;;  %v13047_v9 = vsel %vm10886_vm12, %v13045_v15, %v13046_v55  ;;  %v4144_v4 = vld [vmem:[#allocation2 + $0xa9] sm:$0xff]  ;;  %vm13057_vm9 = vmmov %vm13056_vm0  ;;  %v8175_v48 = vpop.f32.mrf.mxu0  ;;  %v13059_v10 = vld [vmem:[#allocation27_spill] sm:$0xff] }
 0x248   : > { %vm11385_vm13 = vcmp.lt.s32.totalorder %v13047_v9, 16  ;;  %v4012_v21 = vsel %vm11265_vm15, %v3255_v32, 0.0  ;;  %v4168_v42 = vpack.c.bf16 %v4142_v53, %v4141_v44  ;;  %v4113_v20 = vpack.c.bf16 %v4087_v41, %v4086_v7  ;;  %vm13054_vm15 = vmmov %vm13036_vm3  ;;  %v4145_v47 = vld [vmem:[#allocation2 + $0xb1] sm:$0xff] }
 0x249   : > { %v4169_v45 = vpack.c.bf16 %v4144_v4, %v4143_v51  ;;  %vm11396_vm12 = vcmp.lt.s32.totalorder %v3873_v16, 16  ;;  %4058 = vst.msk [vmem:[#allocation2 + $0xe3] sm:$0xff] %vm13053_vm6, %v4012_v21  ;;  %v4010_v6 = vsel %vm11276_vm4, %v3253_v39, 0.0  ;;  %v3256_v54 = vmax.f32 %v3220_v43, 0.0  ;;  %vm13058_vm3 = vmmov %vm13056_vm0  ;;  %v3079_v32 = vpop.f32.mrf.mxu0  ;;  %v4090_v53 = vld [vmem:[#allocation2 + $0xb0] sm:$0xff]  ;;  %v2769_v21 = vpop.f32.mrf.mxu1 }
 0x24a   : > { %v3218_v1 = vadd.f32 %v10728_v0, %v3175_v25  ;;  %v3180_v35 = vmul.f32 %v10675_v34, %v3137_v19  ;;  %4056 = vst.msk [vmem:[#allocation2 + $0xd3] sm:$0xff] %vm13054_vm15, %v4010_v6  ;;  %v3135_v22 = vadd.f32 %v3076_v56, %v13055_v14  ;;  %8199 = vmatmul.mubr.msk.bf16.gmra.mxu1 %vm13056_vm0, %v4168_v42  ;;  %vm3733_vm4 = vcmp.ne.s32.totalorder %v11372_v38, 0  ;;  %vm13060_vm7 = vmmov %vm13056_vm0  ;;  %v4148_v41 = vld [vmem:[#allocation2 + $0xc9] sm:$0xff] }
 0x24b   : > { %8237 = vmatmul.mubr.msk.bf16.gmra.mxu0 %vm13057_vm9, %v4113_v20  ;;  %v4114_v11 = vpack.c.bf16 %v4089_v31, %v4088_v59  ;;  %v3874_v16 = vsel %vm11363_vm10, %v11369_v52, %v11253_v61  ;;  %v4013_v36 = vsel %vm11294_vm11, %v3256_v54, 0.0  ;;  %8202 = vmatprep.mubr.msk.bf16.mxu1 %vm13058_vm3, %v4169_v45  ;;  %v3138_v23 = vadd.f32 %v8175_v48, %v13059_v10  ;;  %vm13061_vm2 = vmmov %vm13056_vm0  ;;  %v13062_v43 = vld [vmem:[#allocation38_spill] sm:$0xff]  ;;  %v8178_v55 = vpop.f32.mrf.mxu0  ;;  %v4093_v45 = vld [vmem:[#allocation2 + $0xc8] sm:$0xff] }
 0x24c   : > { %v3254_v63 = vmax.f32 %v3218_v1, 0.0  ;;  %v3223_v62 = vadd.f32 %v10728_v0, %v3180_v35  ;;  %4059 = vst.msk [vmem:[#allocation2 + $0xeb] sm:$0xff] %vm13060_vm7, %v4013_v36  ;;  %v3178_v44 = vmul.f32 %v10675_v34, %v3135_v22  ;;  %vm3769_vm6 = vcmp.lt.s32.totalorder %v11372_v38, 0  ;;  %v4146_v3 = vld [vmem:[#allocation2 + $0xb9] sm:$0xff]  ;;  %v4147_v50 = vld [vmem:[#allocation2 + $0xc1] sm:$0xff]  ;;  %vm13072_vm7 = vmmov %vm13056_vm0 }
 0x24d   : > { %8240 = vmatprep.mubr.msk.bf16.mxu0 %vm13061_vm2, %v4114_v11  ;;  %vm3731_vm11 = vcmp.ne.s32.totalorder %v11375_v12, 0  ;;  %vm3767_vm15 = vcmp.lt.s32.totalorder %v11375_v12, 0  ;;  %v3181_v39 = vmul.f32 %v10675_v34, %v3138_v23  ;;  %v3136_v25 = vadd.f32 %v3079_v32, %v13062_v43  ;;  %v4091_v19 = vld [vmem:[#allocation2 + $0xb8] sm:$0xff]  ;;  %v4092_v59 = vld [vmem:[#allocation2 + $0xc0] sm:$0xff]  ;;  %v3092_v54 = vpop.f32.mrf.mxu0  ;;  %vm11441_vm9 = vmand %vm3769_vm6, %vm3733_vm4 }
 0x24e   : > { %v4011_v33 = vsel %vm11322_vm5, %v3254_v63, 0.0  ;;  %v3259_v51 = vmax.f32 %v3223_v62, 0.0  ;;  %v3221_v15 = vadd.f32 %v10728_v0, %v3178_v44  ;;  %v4170_v9 = vpack.c.bf16 %v4146_v3, %v4145_v47  ;;  %vm13063_vm5 = vmmov %vm13056_vm0  ;;  %v4648_v35 = vld [vmem:[#allocation2 + $0x2] sm:$0xff]  ;;  %v4975_v48 = vld [vmem:[#allocation2 + $0x1a] sm:$0xff] }
 0x24f   : > { %4057 = vst.msk [vmem:[#allocation2 + $0xdb] sm:$0xff] %vm13056_vm0, %v4011_v33  ;;  %v4115_v7 = vpack.c.bf16 %v4091_v19, %v4090_v53  ;;  %v4171_v4 = vpack.c.bf16 %v4148_v41, %v4147_v50  ;;  %v3224_v56 = vadd.f32 %v10728_v0, %v3181_v39  ;;  %v3179_v42 = vmul.f32 %v10675_v34, %v3136_v25  ;;  %v8179_v46 = vpop.f32.mrf.mxu0  ;;  %vm13074_vm2 = vmmov %vm13056_vm0  ;;  %v4976_v62 = vld [vmem:[#allocation2 + $0x22] sm:$0xff] }
 0x250   : > { %v4016_v13 = vsel %vm11346_vm1, %v3259_v51, 0.0  ;;  %v3141_v20 = vadd.f32 %v8178_v55, %v11155_v17  ;;  %v3257_v6 = vmax.f32 %v3221_v15, 0.0  ;;  %v4116_v1 = vpack.c.bf16 %v4093_v45, %v4092_v59  ;;  %vm11454_vm1 = vmand %vm3767_vm15, %vm3731_vm11 }
 0x251   : > { %4062 = vst.msk [vmem:[#allocation2 + $0x103] sm:$0xff] %vm13063_vm5, %v4016_v13  ;;  %v3841_v57 = vadd.s32 18, %v11372_v38  ;;  %v3839_v31 = vadd.s32 18, %v11375_v12  ;;  %v3260_v14 = vmax.f32 %v3224_v56, 0.0  ;;  %v3222_v17 = vadd.f32 %v10728_v0, %v3179_v42  ;;  %vm13075_vm8 = vmmov %vm13056_vm0  ;;  %v4149_v2 = vld [vmem:[#allocation2 + $0xd1] sm:$0xff] }
 0x252   : > { %v3184_v22 = vmul.f32 %v10675_v34, %v3141_v20  ;;  %v3139_v11 = vadd.f32 %v3092_v54, %v11208_v27  ;;  %v2814_v36 = vadd.f32 %v2769_v21, %v11334_v5  ;;  %v4014_v63 = vsel %vm11385_vm13, %v3257_v6, 0.0  ;;  %8203 = vmatmul.mubr.msk.bf16.gmra.mxu1 %vm13072_vm7, %v4170_v9  ;;  %vm13073_vm13 = vmmov %vm13056_vm0  ;;  %v4094_v60 = vld [vmem:[#allocation2 + $0xd0] sm:$0xff] }
 0x253   : > { %vm11466_vm4 = vcmp.lt.s32.totalorder %v3871_v18, 16  ;;  %vm11475_vm3 = vcmp.lt.s32.totalorder %v3876_v26, 16  ;;  %8241 = vmatmul.mubr.msk.bf16.gmra.mxu0 %vm13073_vm13, %v4115_v7  ;;  %4060 = vst.msk [vmem:[#allocation2 + $0xf3] sm:$0xff] %vm13074_vm2, %v4014_v63  ;;  %v4017_v40 = vsel %vm11396_vm12, %v3260_v14, 0.0  ;;  %v3258_v49 = vmax.f32 %v3222_v17, 0.0  ;;  %8206 = vmatprep.mubr.msk.bf16.mxu1 %vm13075_vm8, %v4171_v4  ;;  %vm13076_vm14 = vmmov %vm13056_vm0  ;;  %v3095_v26 = vpop.f32.mrf.mxu0  ;;  %v4152_v10 = vld [vmem:[#allocation2 + $0xe9] sm:$0xff] }
 0x254   : > { %v3227_v18 = vadd.f32 %v10728_v0, %v3184_v22  ;;  %v3182_v24 = vmul.f32 %v10675_v34, %v3139_v11  ;;  %8244 = vmatprep.mubr.msk.bf16.mxu0 %vm13076_vm14, %v4116_v1  ;;  %vm13077_vm6 = vmmov %vm13056_vm0  ;;  %vm11494_vm11 = vcmp.lt.s32.totalorder %v3874_v16, 16  ;;  %v3142_v8 = vadd.f32 %v8179_v46, %v11337_v29  ;;  %v4097_v33 = vld [vmem:[#allocation2 + $0xe8] sm:$0xff]  ;;  %v4974_v63 = vld [vmem:[#allocation2 + $0x12] sm:$0xff] }
 0x255   : > { %4063 = vst.msk [vmem:[#allocation2 + $0x10b] sm:$0xff] %vm13077_vm6, %v4017_v40  ;;  %v3877_v5 = vsel %vm11441_vm9, %v3841_v57, %v11372_v38  ;;  %v3875_v30 = vsel %vm11454_vm1, %v3839_v31, %v11375_v12  ;;  %v4015_v61 = vsel %vm11466_vm4, %v3258_v49, 0.0  ;;  %v3140_v23 = vadd.f32 %v3095_v26, %v2814_v36  ;;  %vm13080_vm10 = vmmov %vm13056_vm0  ;;  %v4649_v57 = vld [vmem:[#allocation2 + $0xa] sm:$0xff]  ;;  %v4979_v40 = vld [vmem:[#allocation2 + $0x3a] sm:$0xff] }
 0x256   : > { %v3263_v52 = vmax.f32 %v3227_v18, 0.0  ;;  %v3225_v16 = vadd.f32 %v10728_v0, %v3182_v24  ;;  %v4150_v29 = vld [vmem:[#allocation2 + $0xd9] sm:$0xff]  ;;  %v4151_v32 = vld [vmem:[#allocation2 + $0xe1] sm:$0xff]  ;;  %4061 = vst.msk [vmem:[#allocation2 + $0xfb] sm:$0xff] %vm13080_vm10, %v4015_v61  ;;  %v3185_v38 = vmul.f32 %v10675_v34, %v3142_v8  ;;  %vm13081_vm12 = vmmov %vm13056_vm0  ;;  %vm3913_vm15 = vcmp.lt.s32.totalorder %v3877_v5, 16 }
 0x257   : > { %v4095_v44 = vld [vmem:[#allocation2 + $0xd8] sm:$0xff]  ;;  %v4172_v47 = vpack.c.bf16 %v4150_v29, %v4149_v2  ;;  %v4173_v12 = vpack.c.bf16 %v4152_v10, %v4151_v32  ;;  %v4096_v41 = vld [vmem:[#allocation2 + $0xe0] sm:$0xff]  ;;  %v3183_v43 = vmul.f32 %v10675_v34, %v3140_v23  ;;  %vm3911_vm5 = vcmp.lt.s32.totalorder %v3875_v30, 16  ;;  %vm13082_vm9 = vmmov %vm13056_vm0 }
 0x258   : > { %v4117_v53 = vpack.c.bf16 %v4095_v44, %v4094_v60  ;;  %v4020_v51 = vsel %vm11475_vm3, %v3263_v52, 0.0  ;;  %v3261_v39 = vmax.f32 %v3225_v16, 0.0  ;;  %v4118_v25 = vpack.c.bf16 %v4097_v33, %v4096_v41  ;;  %vm13083_vm1 = vmmov %vm13056_vm0  ;;  %v4977_v46 = vld [vmem:[#allocation2 + $0x2a] sm:$0xff]  ;;  %v4978_v24 = vld [vmem:[#allocation2 + $0x32] sm:$0xff] }
 0x259   : > { %4066 = vst.msk [vmem:[#allocation2 + $0x123] sm:$0xff] %vm13081_vm12, %v4020_v51  ;;  %v3228_v3 = vadd.f32 %v10728_v0, %v3185_v38  ;;  %v3226_v50 = vadd.f32 %v10728_v0, %v3183_v43  ;;  %vm13084_vm4 = vmmov %vm13056_vm0  ;;  %v4684_v36 = vpack.c.bf16 %v4649_v57, %v4648_v35  ;;  %v5010_v27 = vpack.c.bf16 %v4975_v48, %v4974_v63  ;;  %v11542_v5 = vld [vmem:[%s12439_s4 + $0x18] sm:$0xf]  ;;  %v4981_v26 = vld [vmem:[#allocation2 + $0x4a] sm:$0xff] }
 0x25a   : > { %v4018_v19 = vsel %vm11494_vm11, %v3261_v39, 0.0  ;;  %8207 = vmatmul.mubr.msk.bf16.gmra.mxu1 %vm13082_vm9, %v4172_v47  ;;  %vm13085_vm3 = vmmov %vm13056_vm0  ;;  %v4153_v9 = vld [vmem:[#allocation2 + $0xf1] sm:$0xff]  ;;  %v5011_v49 = vpack.c.bf16 %v4977_v46, %v4976_v62  ;;  %v5012_v8 = vpack.c.bf16 %v4979_v40, %v4978_v24  ;;  %v4984_v10 = vld [vmem:[#allocation2 + $0x62] sm:$0xff] }
 0x25b   : > { %4064 = vst.msk [vmem:[#allocation2 + $0x113] sm:$0xff] %vm13056_vm0, %v4018_v19  ;;  %v3264_v15 = vmax.f32 %v3228_v3, 0.0  ;;  %8245 = vmatmul.mubr.msk.bf16.gmra.mxu0 %vm13083_vm1, %v4117_v53  ;;  %v3262_v34 = vmax.f32 %v3226_v50, 0.0  ;;  %8210 = vmatprep.mubr.msk.bf16.mxu1 %vm13084_vm4, %v4173_v12  ;;  %v4098_v7 = vld [vmem:[#allocation2 + $0xf0] sm:$0xff]  ;;  %vm13086_vm7 = vmmov %vm13056_vm0  ;;  %v11555_v61 = vld [vmem:[%s12439_s4 + $0x1c] sm:$0xf] }
 0x25c   : > { %8248 = vmatprep.mubr.msk.bf16.mxu0 %vm13085_vm3, %v4118_v25  ;;  %vm13087_vm13 = vmmov %vm13056_vm0  ;;  %v4156_v42 = vld [vmem:[#allocation2 + $0x109] sm:$0xff]  ;;  %v4982_v2 = vld [vmem:[#allocation2 + $0x52] sm:$0xff] }
 0x25d   : > { %v4021_v55 = vsel %vm3913_vm15, %v3264_v15, 0.0  ;;  %v4019_v4 = vsel %vm3911_vm5, %v3262_v34, 0.0  ;;  %v4154_v0 = vld [vmem:[#allocation2 + $0xf9] sm:$0xff]  ;;  %v4155_v21 = vld [vmem:[#allocation2 + $0x101] sm:$0xff]  ;;  %vm13088_vm2 = vmmov %vm13056_vm0 }
 0x25e   : > { %4067 = vst.msk [vmem:[#allocation2 + $0x12b] sm:$0xff] %vm13086_vm7, %v4021_v55  ;;  %v4099_v59 = vld [vmem:[#allocation2 + $0xf8] sm:$0xff]  ;;  %v4174_v13 = vpack.c.bf16 %v4154_v0, %v4153_v9  ;;  %v4100_v20 = vld [vmem:[#allocation2 + $0x100] sm:$0xff]  ;;  %v4101_v45 = vld [vmem:[#allocation2 + $0x108] sm:$0xff]  ;;  %v4175_v6 = vpack.c.bf16 %v4156_v42, %v4155_v21 }
 0x25f   : > { %4065 = vst.msk [vmem:[#allocation2 + $0x11b] sm:$0xff] %vm13087_vm13, %v4019_v4  ;;  %v4119_v56 = vpack.c.bf16 %v4099_v59, %v4098_v7  ;;  %v4120_v54 = vpack.c.bf16 %v4101_v45, %v4100_v20  ;;  %vm13089_vm8 = vmmov %vm13056_vm0  ;;  %v4987_v52 = vld [vmem:[#allocation2 + $0x7a] sm:$0xff]  ;;  %v4985_v16 = vld [vmem:[#allocation2 + $0x6a] sm:$0xff] }
 0x260   : > { %vm13090_vm14 = vmmov %vm13056_vm0  ;;  %v5015_v23 = vpack.c.bf16 %v4985_v16, %v4984_v10  ;;  %v4986_v29 = vld [vmem:[#allocation2 + $0x72] sm:$0xff]  ;;  %v4988_v32 = vld [vmem:[#allocation2 + $0x82] sm:$0xff] }
 0x261   : > { %vm13091_vm6 = vmmov %vm13056_vm0  ;;  %v5016_v44 = vpack.c.bf16 %v4987_v52, %v4986_v29  ;;  %v4991_v38 = vld [vmem:[#allocation2 + $0x9a] sm:$0xff]  ;;  %v4989_v47 = vld [vmem:[#allocation2 + $0x8a] sm:$0xff] }
 0x262   : > { %8211 = vmatmul.mubr.msk.bf16.gmra.mxu1 %vm13088_vm2, %v4174_v13  ;;  %v4157_v1 = vld [vmem:[#allocation2 + $0x111] sm:$0xff]  ;;  %vm13092_vm11 = vmmov %vm13056_vm0  ;;  %v5017_v53 = vpack.c.bf16 %v4989_v47, %v4988_v32  ;;  %v4992_v33 = vld [vmem:[#allocation2 + $0xa2] sm:$0xff] }
 0x263   : > { %8249 = vmatmul.mubr.msk.bf16.gmra.mxu0 %vm13089_vm8, %v4119_v56  ;;  %8214 = vmatprep.mubr.msk.bf16.mxu1 %vm13090_vm14, %v4175_v6  ;;  %v4102_v14 = vld [vmem:[#allocation2 + $0x110] sm:$0xff]  ;;  %vm13093_vm10 = vmmov %vm13056_vm0  ;;  %v4995_v51 = vld [vmem:[#allocation2 + $0xba] sm:$0xff] }
 0x264   : > { %8252 = vmatprep.mubr.msk.bf16.mxu0 %vm13091_vm6, %v4120_v54  ;;  %vm13094_vm12 = vmmov %vm13056_vm0  ;;  %v4990_v12 = vld [vmem:[#allocation2 + $0x92] sm:$0xff]  ;;  %v4993_v39 = vld [vmem:[#allocation2 + $0xaa] sm:$0xff] }
 0x265   : > { %vm13095_vm15 = vmmov %vm13056_vm0  ;;  %vm13096_vm0 = vcmask 1043456   ;;  %v5018_v41 = vpack.c.bf16 %v4991_v38, %v4990_v12  ;;  %v5019_v43 = vpack.c.bf16 %v4993_v39, %v4992_v33  ;;  %v4994_v25 = vld [vmem:[#allocation2 + $0xb2] sm:$0xff]  ;;  %v4996_v19 = vld [vmem:[#allocation2 + $0xc2] sm:$0xff] }
 0x266   : > { %v4158_v31 = vld [vmem:[#allocation2 + $0x119] sm:$0xff]  ;;  %v5411_v18 = vsel %vm13096_vm0, %v11033_v28, 0  ;;  %vm13097_vm5 = vmmov %vm13096_vm0  ;;  %v4980_v28 = vld [vmem:[#allocation2 + $0x42] sm:$0xff]  ;;  %v5020_v3 = vpack.c.bf16 %v4995_v51, %v4994_v25 }
 0x267   : > { %v4103_v17 = vld [vmem:[#allocation2 + $0x118] sm:$0xff]  ;;  %v4176_v22 = vpack.c.bf16 %v4158_v31, %v4157_v1  ;;  %v5737_v58 = vsel %vm13097_vm5, %v11175_v37, 0  ;;  %vm13098_vm9 = vmmov %vm13083_vm1  ;;  %v5013_v30 = vpack.c.bf16 %v4981_v26, %v4980_v28  ;;  %v4997_v15 = vld [vmem:[#allocation2 + $0xca] sm:$0xff] }
 0x268   : > { %v4121_v11 = vpack.c.bf16 %v4103_v17, %v4102_v14  ;;  %vm13099_vm4 = vmmov %vm13083_vm1  ;;  %v4983_v37 = vld [vmem:[#allocation2 + $0x5a] sm:$0xff]  ;;  %v5021_v34 = vpack.c.bf16 %v4997_v15, %v4996_v19  ;;  %v4998_v55 = vld [vmem:[#allocation2 + $0xd2] sm:$0xff] }
 0x269   : > { %vm13100_vm3 = vmmov %vm13083_vm1  ;;  %v5014_v60 = vpack.c.bf16 %v4983_v37, %v4982_v2  ;;  %v4999_v50 = vld [vmem:[#allocation2 + $0xda] sm:$0xff]  ;;  %v5000_v7 = vld [vmem:[#allocation2 + $0xe2] sm:$0xff] }
 0x26a   : > { %8215 = vmatmul.mubr.msk.bf16.gmra.mxu1 %vm13092_vm11, %v4176_v22  ;;  %vm13101_vm7 = vmmov %vm13096_vm0  ;;  %v5022_v9 = vpack.c.bf16 %v4999_v50, %v4998_v55  ;;  %v5003_v4 = vld [vmem:[#allocation2 + $0xfa] sm:$0xff]  ;;  %v5001_v0 = vld [vmem:[#allocation2 + $0xea] sm:$0xff] }
 0x26b   : > { %8253 = vmatmul.mubr.msk.bf16.gmra.mxu0 %vm13093_vm10, %v4121_v11  ;;  %8258 = vmatprep.mubr.msk.bf16.mxu1 %vm13095_vm15, %v4684_v36  ;;  %vm13102_vm13 = vmmov %vm13083_vm1  ;;  %v5023_v59 = vpack.c.bf16 %v5001_v0, %v5000_v7  ;;  %v5002_v21 = vld [vmem:[#allocation2 + $0xf2] sm:$0xff]  ;;  %v5004_v56 = vld [vmem:[#allocation2 + $0x102] sm:$0xff] }
 0x26c   : > { %8296 = vmatprep.mubr.msk.bf16.mxu0 %vm13094_vm12, %v5010_v27  ;;  %vm13103_vm2 = vmmov %vm13083_vm1  ;;  %v5024_v13 = vpack.c.bf16 %v5003_v4, %v5002_v21  ;;  %v5007_v42 = vld [vmem:[#allocation2 + $0x11a] sm:$0xff]  ;;  %v5005_v20 = vld [vmem:[#allocation2 + $0x10a] sm:$0xff] }
 0x26d   : > { %vm13104_vm8 = vmmov %vm13083_vm1  ;;  %v5025_v45 = vpack.c.bf16 %v5005_v20, %v5004_v56  ;;  %v5006_v6 = vld [vmem:[#allocation2 + $0x112] sm:$0xff]  ;;  %v5008_v1 = vld [vmem:[#allocation2 + $0x122] sm:$0xff] }
 0x26e   : > { %vm13105_vm14 = vmmov %vm13083_vm1  ;;  %v5026_v54 = vpack.c.bf16 %v5007_v42, %v5006_v6  ;;  %v5301_v35 = vld [vmem:[#allocation2 + $0x1b] sm:$0xff]  ;;  %v5009_v14 = vld [vmem:[#allocation2 + $0x12a] sm:$0xff] }
 0x26f   : > { %vm13106_vm6 = vmmov %vm13096_vm0  ;;  %v5626_v57 = vld [vmem:[#allocation2 + $0x14] sm:$0xff]  ;;  %v5627_v31 = vld [vmem:[#allocation2 + $0x1c] sm:$0xff]  ;;  %v5027_v17 = vpack.c.bf16 %v5009_v14, %v5008_v1 }
 0x270   : > { %vm13107_vm11 = vmmov %vm13083_vm1  ;;  %v5300_v22 = vld [vmem:[#allocation2 + $0x13] sm:$0xff]  ;;  %v5662_v48 = vpack.c.bf16 %v5627_v31, %v5626_v57  ;;  %v5303_v36 = vld [vmem:[#allocation2 + $0x2b] sm:$0xff] }
 0x271   : > { %vm13108_vm10 = vmmov %vm13083_vm1  ;;  %v5336_v11 = vpack.c.bf16 %v5301_v35, %v5300_v22  ;;  %v5629_v63 = vld [vmem:[#allocation2 + $0x2c] sm:$0xff]  ;;  %v5305_v62 = vld [vmem:[#allocation2 + $0x3b] sm:$0xff] }
 0x272   : > { %8259 = vmatmul.mubr.msk.bf16.vlgmr.msra.gmra.mxu1 %vm13098_vm9, %v5010_v27  ;;  %vm13109_vm12 = vmmov %vm13083_vm1  ;;  %v5302_v27 = vld [vmem:[#allocation2 + $0x23] sm:$0xff]  ;;  %v5630_v40 = vld [vmem:[#allocation2 + $0x34] sm:$0xff] }
 0x273   : > { %8297 = vmatmul.mubr.msk.bf16.vlgmr.msra.gmra.mxu0 %vm13083_vm1, %v5011_v49  ;;  %8333 = vmatpush3.bf16.msra.mxu1 %v5411_v18  ;;  %vm13110_vm15 = vmmov %vm13083_vm1  ;;  %v5628_v46 = vld [vmem:[#allocation2 + $0x24] sm:$0xff]  ;;  %v5337_v18 = vpack.c.bf16 %v5303_v36, %v5302_v27  ;;  %v5633_v2 = vld [vmem:[#allocation2 + $0x4c] sm:$0xff] }
 0x274   : > { %8262 = vmatprep.mubr.msk.bf16.mxu1 %vm13099_vm4, %v5011_v49  ;;  %8300 = vmatprep.mubr.msk.bf16.mxu0 %vm13100_vm3, %v5012_v8  ;;  %vm13111_vm0 = vmmov %vm13083_vm1  ;;  %v5631_v49 = vld [vmem:[#allocation2 + $0x3c] sm:$0xff]  ;;  %v11587_v24 = vpack.c.bf16 %v5629_v63, %v5628_v46  ;;  %v5634_v10 = vld [vmem:[#allocation2 + $0x54] sm:$0xff] }
 0x275   : > { %8371 = vmatpush3.bf16.msra.mxu0 %v5737_v58  ;;  %8537 = vmatprep.subr.msk.bf16.mxu1 %vm13101_vm7, %v11542_v5  ;;  %vm13112_vm5 = vmmov %vm13111_vm0  ;;  %v11596_v26 = vpack.c.bf16 %v5631_v49, %v5630_v40  ;;  %v5306_v52 = vld [vmem:[#allocation2 + $0x43] sm:$0xff]  ;;  %v5311_v47 = vld [vmem:[#allocation2 + $0x6b] sm:$0xff] }
 0x276   : > { %8538 = vmatprep.subr.msk.bf16.mxu0 %vm13106_vm6, %v11555_v61  ;;  %vm13113_vm9 = vmmov %vm13111_vm0  ;;  %v5632_v16 = vld [vmem:[#allocation2 + $0x44] sm:$0xff]  ;;  %v5313_v12 = vld [vmem:[#allocation2 + $0x7b] sm:$0xff] }
 0x277   : > { %vm13114_vm1 = vmmov %vm13111_vm0  ;;  %v11608_v29 = vpack.c.bf16 %v5633_v2, %v5632_v16  ;;  %v5639_v33 = vld [vmem:[#allocation2 + $0x7c] sm:$0xff]  ;;  %v5636_v39 = vld [vmem:[#allocation2 + $0x64] sm:$0xff] }
 0x278   : > { %vm13115_vm4 = vmmov %vm13111_vm0  ;;  %v5310_v51 = vld [vmem:[#allocation2 + $0x63] sm:$0xff]  ;;  %v5315_v15 = vld [vmem:[#allocation2 + $0x8b] sm:$0xff] }
 0x279   : > { %vm13116_vm3 = vmmov %vm13111_vm0  ;;  %v5317_v55 = vld [vmem:[#allocation2 + $0x9b] sm:$0xff]  ;;  %v5314_v4 = vld [vmem:[#allocation2 + $0x83] sm:$0xff] }
 0x27a   : > { %8263 = vmatmul.mubr.msk.bf16.gmra.mxu1 %vm13102_vm13, %v5012_v8  ;;  %vm13117_vm7 = vmmov %vm13111_vm0  ;;  %v5304_v8 = vld [vmem:[#allocation2 + $0x33] sm:$0xff]  ;;  %v5643_v7 = vld [vmem:[#allocation2 + $0x9c] sm:$0xff] }
 0x27b   : > { %8301 = vmatmul.mubr.msk.bf16.gmra.mxu0 %vm13103_vm2, %v5013_v30  ;;  %8266 = vmatprep.mubr.msk.bf16.mxu1 %vm13104_vm8, %v5013_v30  ;;  %vm13118_vm13 = vmmov %vm13111_vm0  ;;  %v5338_v28 = vpack.c.bf16 %v5305_v62, %v5304_v8  ;;  %v11601_v30 = vld [vmem:[%s12439_s4 + $0x20] sm:$0xf]  ;;  %v5640_v0 = vld [vmem:[#allocation2 + $0x84] sm:$0xff] }
 0x27c   : > { %8304 = vmatprep.mubr.msk.bf16.mxu0 %vm13105_vm14, %v5014_v60  ;;  %vm13119_vm2 = vmmov %vm13111_vm0  ;;  %v5319_v20 = vld [vmem:[#allocation2 + $0xab] sm:$0xff]  ;;  %v5321_v6 = vld [vmem:[#allocation2 + $0xbb] sm:$0xff] }
 0x27d   : > { %vm13120_vm8 = vmmov %vm13111_vm0  ;;  %v5647_v1 = vld [vmem:[#allocation2 + $0xbc] sm:$0xff]  ;;  %v5644_v57 = vld [vmem:[#allocation2 + $0xa4] sm:$0xff] }
 0x27e   : > { %vm13121_vm14 = vmmov %vm13111_vm0  ;;  %v5318_v35 = vld [vmem:[#allocation2 + $0xa3] sm:$0xff]  ;;  %v5649_v36 = vld [vmem:[#allocation2 + $0xcc] sm:$0xff] }
 0x27f   : > { %vm13122_vm6 = vmmov %vm13111_vm0  ;;  %v5345_v31 = vpack.c.bf16 %v5319_v20, %v5318_v35  ;;  %v5325_v63 = vld [vmem:[#allocation2 + $0xdb] sm:$0xff]  ;;  %v5322_v46 = vld [vmem:[#allocation2 + $0xc3] sm:$0xff] }
 0x280   : > { %v5650_v27 = vld [vmem:[#allocation2 + $0xd4] sm:$0xff]  ;;  %v5651_v62 = vld [vmem:[#allocation2 + $0xdc] sm:$0xff]  ;;  %v5648_v40 = vld [vmem:[#allocation2 + $0xc4] sm:$0xff] }
 0x281   : > { %v5329_v2 = vld [vmem:[#allocation2 + $0xfb] sm:$0xff] }
 0x282   : > { %8267 = vmatmul.mubr.msk.bf16.gmra.mxu1 %vm13107_vm11, %v5014_v60  ;;  %vm13123_vm11 = vmmov %vm13111_vm0  ;;  %v5309_v60 = vld [vmem:[#allocation2 + $0x5b] sm:$0xff] }
 0x283   : > { %8305 = vmatmul.mubr.msk.bf16.gmra.mxu0 %vm13108_vm10, %v5015_v23  ;;  %8270 = vmatprep.mubr.msk.bf16.mxu1 %vm13109_vm12, %v5015_v23  ;;  %vm13124_vm10 = vmmov %vm13111_vm0 }
 0x284   : > { %8308 = vmatprep.mubr.msk.bf16.mxu0 %vm13110_vm15, %v5016_v44  ;;  %vm13125_vm12 = vmmov %vm13111_vm0 }
 0x285   : > { %vm13126_vm15 = vmmov %vm13111_vm0 }
 0x28a   : > { %8271 = vmatmul.mubr.msk.bf16.gmra.mxu1 %vm13111_vm0, %v5016_v44  ;;  %v5308_v44 = vld [vmem:[#allocation2 + $0x53] sm:$0xff] }
 0x28b   : > { %8309 = vmatmul.mubr.msk.bf16.gmra.mxu0 %vm13112_vm5, %v5017_v53  ;;  %8274 = vmatprep.mubr.msk.bf16.mxu1 %vm13113_vm9, %v5017_v53  ;;  %vm13127_vm5 = vmmov %vm13111_vm0  ;;  %v5340_v32 = vpack.c.bf16 %v5309_v60, %v5308_v44  ;;  %v5637_v53 = vld [vmem:[#allocation2 + $0x6c] sm:$0xff]  ;;  %v5654_v60 = vld [vmem:[#allocation2 + $0xf4] sm:$0xff] }
 0x28c   : > { %8312 = vmatprep.mubr.msk.bf16.mxu0 %vm13114_vm1, %v5018_v41  ;;  %vm13128_vm9 = vmmov %vm13111_vm0  ;;  %v11618_v25 = vpack.c.bf16 %v5637_v53, %v5636_v39 }
 0x28d   : > { %vm13129_vm1 = vmmov %vm13111_vm0 }
 0x292   : > { %8275 = vmatmul.mubr.msk.bf16.gmra.mxu1 %vm13115_vm4, %v5018_v41  ;;  %vm13130_vm4 = vmmov %vm13111_vm0  ;;  %v5638_v41 = vld [vmem:[#allocation2 + $0x74] sm:$0xff] }
 0x293   : > { %8313 = vmatmul.mubr.msk.bf16.gmra.mxu0 %vm13116_vm3, %v5019_v43  ;;  %8278 = vmatprep.mubr.msk.bf16.mxu1 %vm13117_vm7, %v5019_v43  ;;  %vm13131_vm3 = vmmov %vm13111_vm0  ;;  %v5341_v43 = vpack.c.bf16 %v5311_v47, %v5310_v51  ;;  %v11620_v50 = vpack.c.bf16 %v5639_v33, %v5638_v41  ;;  %v5328_v47 = vld [vmem:[#allocation2 + $0xf3] sm:$0xff] }
 0x294   : > { %8316 = vmatprep.mubr.msk.bf16.mxu0 %vm13118_vm13, %v5020_v3  ;;  %vm13132_vm7 = vmmov %vm13111_vm0 }
 0x295   : > { %vm13133_vm13 = vmmov %vm13111_vm0 }
 0x29a   : > { %8279 = vmatmul.mubr.msk.bf16.gmra.mxu1 %vm13119_vm2, %v5020_v3  ;;  %vm13134_vm2 = vcmask 1043456   ;;  %v5312_v3 = vld [vmem:[#allocation2 + $0x73] sm:$0xff] }
 0x29b   : > { %8317 = vmatmul.mubr.msk.bf16.gmra.mxu0 %vm13120_vm8, %v5021_v34  ;;  %8282 = vmatprep.mubr.msk.bf16.mxu1 %vm13121_vm14, %v5021_v34  ;;  %v6063_v58 = vsel %vm13134_vm2, %v11542_v5, 0  ;;  %vm13135_vm8 = vmmov %vm13134_vm2  ;;  %v5307_v5 = vld [vmem:[#allocation2 + $0x4b] sm:$0xff]  ;;  %v5342_v19 = vpack.c.bf16 %v5313_v12, %v5312_v3  ;;  %v5350_v12 = vpack.c.bf16 %v5329_v2, %v5328_v47 }
 0x29c   : > { %8320 = vmatprep.mubr.msk.bf16.mxu0 %vm13122_vm6, %v5022_v9  ;;  %v6389_v37 = vsel %vm13135_vm8, %v11555_v61, 0  ;;  %vm13136_vm14 = vmmov %vm13111_vm0  ;;  %v5635_v61 = vld [vmem:[#allocation2 + $0x5c] sm:$0xff]  ;;  %v5339_v23 = vpack.c.bf16 %v5307_v5, %v5306_v52  ;;  %v5641_v34 = vld [vmem:[#allocation2 + $0x8c] sm:$0xff] }
 0x29d   : > { %vm13137_vm6 = vmmov %vm13111_vm0  ;;  %v11610_v38 = vpack.c.bf16 %v5635_v61, %v5634_v10  ;;  %v11628_v21 = vpack.c.bf16 %v5641_v34, %v5640_v0  ;;  %v5653_v5 = vld [vmem:[#allocation2 + $0xec] sm:$0xff]  ;;  %v5655_v10 = vld [vmem:[#allocation2 + $0xfc] sm:$0xff] }
 0x29e   : > { %vm13150_vm8 = vmmov %vm13111_vm0  ;;  %v5326_v61 = vld [vmem:[#allocation2 + $0xe3] sm:$0xff]  ;;  %v11662_v41 = vpack.c.bf16 %v5655_v10, %v5654_v60  ;;  %v5657_v34 = vld [vmem:[#allocation2 + $0x10c] sm:$0xff] }
 0x29f   : > { %v5652_v52 = vld [vmem:[#allocation2 + $0xe4] sm:$0xff]  ;;  %v5659_v0 = vld [vmem:[#allocation2 + $0x11c] sm:$0xff] }
 0x2a2   : > { %8283 = vmatmul.mubr.msk.bf16.gmra.mxu1 %vm13123_vm11, %v5022_v9  ;;  %vm13138_vm11 = vmmov %vm13111_vm0  ;;  %v5642_v9 = vld [vmem:[#allocation2 + $0x94] sm:$0xff] }
 0x2a3   : > { %8321 = vmatmul.mubr.msk.bf16.gmra.mxu0 %vm13124_vm10, %v5023_v59  ;;  %8286 = vmatprep.mubr.msk.bf16.mxu1 %vm13125_vm12, %v5023_v59  ;;  %vm13139_vm10 = vmmov %vm13111_vm0  ;;  %v5343_v59 = vpack.c.bf16 %v5315_v15, %v5314_v4  ;;  %v11630_v42 = vpack.c.bf16 %v5643_v7, %v5642_v9  ;;  %v5331_v15 = vld [vmem:[#allocation2 + $0x10b] sm:$0xff]  ;;  %v5333_v7 = vld [vmem:[#allocation2 + $0x11b] sm:$0xff] }
 0x2a4   : > { %8324 = vmatprep.mubr.msk.bf16.mxu0 %vm13126_vm15, %v5024_v13  ;;  %vm13140_vm12 = vmmov %vm13134_vm2  ;;  %v5658_v4 = vld [vmem:[#allocation2 + $0x114] sm:$0xff] }
 0x2a5   : > { %vm13141_vm15 = vmmov %vm13111_vm0 }
 0x2a6   : > { %vm13149_vm2 = vmmov %vm13111_vm0 }
 0x2aa   : > { %8287 = vmatmul.mubr.msk.bf16.gmra.mxu1 %vm13111_vm0, %v5024_v13  ;;  %v5316_v13 = vld [vmem:[#allocation2 + $0x93] sm:$0xff] }
 0x2ab   : > { %8325 = vmatmul.mubr.msk.bf16.gmra.mxu0 %vm13127_vm5, %v5025_v45  ;;  %8290 = vmatprep.mubr.msk.bf16.mxu1 %vm13128_vm9, %v5025_v45  ;;  %vm13142_vm5 = vmmov %vm13111_vm0  ;;  %v5344_v56 = vpack.c.bf16 %v5317_v55, %v5316_v13  ;;  %v5645_v45 = vld [vmem:[#allocation2 + $0xac] sm:$0xff]  ;;  %v5330_v13 = vld [vmem:[#allocation2 + $0x103] sm:$0xff] }
 0x2ac   : > { %8328 = vmatprep.mubr.msk.bf16.mxu0 %vm13129_vm1, %v5026_v54  ;;  %vm13143_vm9 = vmmov %vm13111_vm0  ;;  %v11638_v14 = vpack.c.bf16 %v5645_v45, %v5644_v57 }
 0x2ad   : > { %vm13144_vm1 = vmmov %vm13111_vm0 }
 0x2b2   : > { %8291 = vmatmul.mubr.msk.bf16.gmra.mxu1 %vm13130_vm4, %v5026_v54  ;;  %vm13145_vm4 = vmmov %vm13111_vm0  ;;  %v5646_v54 = vld [vmem:[#allocation2 + $0xb4] sm:$0xff] }
 0x2b3   : > { %8329 = vmatmul.mubr.msk.bf16.gmra.mxu0 %vm13131_vm3, %v5027_v17  ;;  %8334 = vmatprep.mubr.msk.bf16.mxu1 %vm13132_vm7, %v5336_v11  ;;  %vm13146_vm3 = vmmov %vm13111_vm0  ;;  %v5320_v17 = vld [vmem:[#allocation2 + $0xb3] sm:$0xff]  ;;  %v11640_v11 = vpack.c.bf16 %v5647_v1, %v5646_v54 }
 0x2b4   : > { %8372 = vmatprep.mubr.msk.bf16.mxu0 %vm13133_vm13, %v5662_v48  ;;  %vm13147_vm7 = vmmov %vm13111_vm0  ;;  %v5346_v22 = vpack.c.bf16 %v5321_v6, %v5320_v17  ;;  %v5323_v48 = vld [vmem:[#allocation2 + $0xcb] sm:$0xff]  ;;  %v5351_v6 = vpack.c.bf16 %v5331_v15, %v5330_v13  ;;  %v5332_v1 = vld [vmem:[#allocation2 + $0x113] sm:$0xff] }
 0x2b5   : > { %vm13148_vm13 = vmmov %vm13111_vm0  ;;  %v5347_v49 = vpack.c.bf16 %v5323_v48, %v5322_v46  ;;  %v5352_v57 = vpack.c.bf16 %v5333_v7, %v5332_v1  ;;  %v5660_v46 = vld [vmem:[#allocation2 + $0x124] sm:$0xff]  ;;  %v6283_v7 = vld [vmem:[#allocation2 + $0x4d] sm:$0xff] }
 0x2b6   : > { %v6281_v15 = vld [vmem:[#allocation2 + $0x3d] sm:$0xff] }
 0x2ba   : > { %8335 = vmatmul.mubr.msk.bf16.vlgmr.msra.gmra.mxu1 %vm13136_vm14, %v5337_v18  ;;  %vm13151_vm14 = vmmov %vm13111_vm0  ;;  %v11648_v18 = vpack.c.bf16 %v5649_v36, %v5648_v40  ;;  %v5661_v40 = vld [vmem:[#allocation2 + $0x12c] sm:$0xff] }
 0x2bb   : > { %8373 = vmatmul.mubr.msk.bf16.vlgmr.msra.gmra.mxu0 %vm13137_vm6, %v11587_v24  ;;  %8409 = vmatpush3.bf16.msra.mxu1 %v6063_v58  ;;  %vm13152_vm6 = vmmov %vm13111_vm0  ;;  %v5324_v58 = vld [vmem:[#allocation2 + $0xd3] sm:$0xff] }
 0x2bc   : > { %8338 = vmatprep.mubr.msk.bf16.mxu1 %vm13138_vm11, %v5338_v28  ;;  %8376 = vmatprep.mubr.msk.bf16.mxu0 %vm13139_vm10, %v11596_v26  ;;  %vm13153_vm11 = vmmov %vm13111_vm0  ;;  %v5348_v8 = vpack.c.bf16 %v5325_v63, %v5324_v58  ;;  %v11650_v28 = vpack.c.bf16 %v5651_v62, %v5650_v27  ;;  %v5335_v62 = vld [vmem:[#allocation2 + $0x12b] sm:$0xff] }
 0x2bd   : > { %8447 = vmatpush3.bf16.msra.mxu0 %v6389_v37  ;;  %8539 = vmatprep.subr.msk.bf16.mxu1 %vm13140_vm12, %v11601_v30  ;;  %vm13154_vm10 = vmmov %vm13111_vm0  ;;  %v5327_v37 = vld [vmem:[#allocation2 + $0xeb] sm:$0xff] }
 0x2be   : > { %vm13155_vm12 = vmmov %vm13111_vm0  ;;  %v5349_v44 = vpack.c.bf16 %v5327_v37, %v5326_v61  ;;  %v11694_v61 = vpack.c.bf16 %v5661_v40, %v5660_v46  ;;  %v6287_v46 = vld [vmem:[#allocation2 + $0x6d] sm:$0xff] }
 0x2c2   : > { %8339 = vmatmul.mubr.msk.bf16.gmra.mxu1 %vm13141_vm15, %v5339_v23  ;;  %vm13156_vm15 = vmmov %vm13111_vm0 }
 0x2c3   : > { %8377 = vmatmul.mubr.msk.bf16.gmra.mxu0 %vm13111_vm0, %v11608_v29  ;;  %8342 = vmatprep.mubr.msk.bf16.mxu1 %vm13142_vm5, %v5340_v32  ;;  %vm13157_vm5 = vmmov %vm13111_vm0  ;;  %v11658_v32 = vpack.c.bf16 %v5653_v5, %v5652_v52  ;;  %v5334_v5 = vld [vmem:[#allocation2 + $0x123] sm:$0xff] }
 0x2c4   : > { %8380 = vmatprep.mubr.msk.bf16.mxu0 %vm13143_vm9, %v11610_v38  ;;  %vm13158_vm9 = vmmov %vm13111_vm0  ;;  %v5353_v10 = vpack.c.bf16 %v5335_v62, %v5334_v5  ;;  %v6278_v52 = vld [vmem:[#allocation2 + $0x25] sm:$0xff] }
 0x2ca   : > { %8343 = vmatmul.mubr.msk.bf16.gmra.mxu1 %vm13144_vm1, %v5341_v43  ;;  %vm13159_vm1 = vmmov %vm13111_vm0 }
 0x2cb   : > { %8381 = vmatmul.mubr.msk.bf16.gmra.mxu0 %vm13145_vm4, %v11618_v25  ;;  %8346 = vmatprep.mubr.msk.bf16.mxu1 %vm13146_vm3, %v5342_v19  ;;  %vm13160_vm4 = vmmov %vm13111_vm0 }
 0x2cc   : > { %8384 = vmatprep.mubr.msk.bf16.mxu0 %vm13147_vm7, %v11620_v50  ;;  %vm13161_vm3 = vmmov %vm13111_vm0 }
 0x2cd   : > { %vm13162_vm7 = vmmov %vm13111_vm0 }
 0x2d2   : > { %8347 = vmatmul.mubr.msk.bf16.gmra.mxu1 %vm13148_vm13, %v5343_v59  ;;  %vm13163_vm13 = vmmov %vm13111_vm0 }
 0x2d3   : > { %8385 = vmatmul.mubr.msk.bf16.gmra.mxu0 %vm13149_vm2, %v11628_v21  ;;  %8350 = vmatprep.mubr.msk.bf16.mxu1 %vm13150_vm8, %v5344_v56  ;;  %v5656_v56 = vld [vmem:[#allocation2 + $0x104] sm:$0xff]  ;;  %vm13164_vm2 = vmmov %vm13111_vm0 }
 0x2d4   : > { %8388 = vmatprep.mubr.msk.bf16.mxu0 %vm13151_vm14, %v11630_v42  ;;  %v11676_v54 = vpack.c.bf16 %v5657_v34, %v5656_v56  ;;  %vm13165_vm8 = vmmov %vm13111_vm0 }
 0x2d5   : > { %vm13166_vm14 = vmmov %vm13111_vm0 }
 0x2da   : > { %8351 = vmatmul.mubr.msk.bf16.gmra.mxu1 %vm13152_vm6, %v5345_v31  ;;  %v11680_v31 = vpack.c.bf16 %v5659_v0, %v5658_v4  ;;  %vm13167_vm6 = vmmov %vm13111_vm0 }
 0x2db   : > { %8389 = vmatmul.mubr.msk.bf16.gmra.mxu0 %vm13153_vm11, %v11638_v14  ;;  %8354 = vmatprep.mubr.msk.bf16.mxu1 %vm13154_vm10, %v5346_v22  ;;  %vm13168_vm11 = vmmov %vm13111_vm0 }
 0x2dc   : > { %8392 = vmatprep.mubr.msk.bf16.mxu0 %vm13155_vm12, %v11640_v11  ;;  %v8222_v23 = vpop.f32.mrf.mxu0  ;;  %vm13169_vm10 = vmmov %vm13111_vm0 }
 0x2dd   : > { %v8184_v16 = vpop.f32.mrf.mxu1  ;;  %vm13170_vm12 = vmmov %vm13111_vm0 }
 0x2de   : > { %v11660_v53 = vadd.f32 %v8222_v23, %v8184_v16  ;;  %v4505_v51 = vpop.f32.mrf.mxu0 }
 0x2df   : > { %v4271_v33 = vpop.f32.mrf.mxu1 }
 0x2e0   : > { %v11670_v39 = vadd.f32 %v4505_v51, %v4271_v33  ;;  %v8223_v3 = vpop.f32.mrf.mxu0 }
 0x2e1   : > { %v8185_v43 = vpop.f32.mrf.mxu1 }
 0x2e2   : > { %8355 = vmatmul.mubr.msk.bf16.gmra.mxu1 %vm13156_vm15, %v5347_v49  ;;  %v11672_v19 = vadd.f32 %v8223_v3, %v8185_v43  ;;  %v4508_v9 = vpop.f32.mrf.mxu0  ;;  %v6280_v3 = vld [vmem:[#allocation2 + $0x35] sm:$0xff]  ;;  %vm13171_vm15 = vcmask 1043456  }
 0x2e3   : > { %8393 = vmatmul.mubr.msk.bf16.gmra.mxu0 %vm13111_vm0, %v11648_v18  ;;  %8358 = vmatprep.mubr.msk.bf16.mxu1 %vm13157_vm5, %v5348_v8  ;;  %v4274_v55 = vpop.f32.mrf.mxu1  ;;  %v6279_v8 = vld [vmem:[#allocation2 + $0x2d] sm:$0xff]  ;;  %v6315_v13 = vpack.c.bf16 %v6281_v15, %v6280_v3  ;;  %vm13172_vm5 = vmmov %vm13111_vm0 }
 0x2e4   : > { %8396 = vmatprep.mubr.msk.bf16.mxu0 %vm13158_vm9, %v11650_v28  ;;  %v11674_v59 = vadd.f32 %v4508_v9, %v4274_v55  ;;  %v6314_v23 = vpack.c.bf16 %v6279_v8, %v6278_v52  ;;  %vm13173_vm9 = vmmov %vm13111_vm0 }
 0x2e7   : > { %v8188_v20 = vpop.f32.mrf.mxu1 }
 0x2e8   : > { %v8226_v45 = vpop.f32.mrf.mxu0 }
 0x2e9   : > { %v11678_v35 = vadd.f32 %v8226_v45, %v8188_v20  ;;  %v4287_v17 = vpop.f32.mrf.mxu1  ;;  %v6282_v20 = vld [vmem:[#allocation2 + $0x45] sm:$0xff] }
 0x2ea   : > { %8359 = vmatmul.mubr.msk.bf16.gmra.mxu1 %vm13159_vm1, %v5349_v44  ;;  %v4521_v22 = vpop.f32.mrf.mxu0  ;;  %v6316_v45 = vpack.c.bf16 %v6283_v7, %v6282_v20  ;;  %vm13174_vm1 = vmmov %vm13111_vm0 }
 0x2eb   : > { %8397 = vmatmul.mubr.msk.bf16.gmra.mxu0 %vm13160_vm4, %v11658_v32  ;;  %8362 = vmatprep.mubr.msk.bf16.mxu1 %vm13161_vm3, %v5350_v12  ;;  %v11688_v48 = vadd.f32 %v4521_v22, %v4287_v17  ;;  %v8189_v36 = vpop.f32.mrf.mxu1  ;;  %vm13175_vm4 = vmmov %vm13111_vm0 }
 0x2ec   : > { %8400 = vmatprep.mubr.msk.bf16.mxu0 %vm13162_vm7, %v11662_v41  ;;  %v8227_v63 = vpop.f32.mrf.mxu0  ;;  %vm13176_vm3 = vmmov %vm13111_vm0 }
 0x2ed   : > { %v11690_v27 = vadd.f32 %v8227_v63, %v8189_v36  ;;  %v4290_v49 = vpop.f32.mrf.mxu1  ;;  %v6284_v36 = vld [vmem:[#allocation2 + $0x55] sm:$0xff]  ;;  %v6285_v63 = vld [vmem:[#allocation2 + $0x5d] sm:$0xff]  ;;  %vm13177_vm7 = vmmov %vm13111_vm0 }
 0x2ee   : > { %v4524_v58 = vpop.f32.mrf.mxu0 }
 0x2ef   : > { %v11692_v37 = vadd.f32 %v4524_v58, %v4290_v49  ;;  %v6317_v49 = vpack.c.bf16 %v6285_v63, %v6284_v36  ;;  %v6286_v58 = vld [vmem:[#allocation2 + $0x65] sm:$0xff]  ;;  %v6295_v36 = vld [vmem:[#allocation2 + $0xad] sm:$0xff] }
 0x2f0   : > { %v6318_v8 = vpack.c.bf16 %v6287_v46, %v6286_v58  ;;  %v6294_v46 = vld [vmem:[#allocation2 + $0xa5] sm:$0xff] }
 0x2f2   : > { %8363 = vmatmul.mubr.msk.bf16.gmra.mxu1 %vm13163_vm13, %v5351_v6  ;;  %v8192_v2 = vpop.f32.mrf.mxu1  ;;  %vm13178_vm13 = vmmov %vm13111_vm0 }
 0x2f3   : > { %8401 = vmatmul.mubr.msk.bf16.gmra.mxu0 %vm13164_vm2, %v11676_v54  ;;  %8366 = vmatprep.mubr.msk.bf16.mxu1 %vm13165_vm8, %v5352_v57  ;;  %v8230_v60 = vpop.f32.mrf.mxu0  ;;  %vm13179_vm2 = vmmov %vm13111_vm0 }
 0x2f4   : > { %8404 = vmatprep.mubr.msk.bf16.mxu0 %vm13166_vm14, %v11680_v31  ;;  %v11696_v16 = vadd.f32 %v8230_v60, %v8192_v2  ;;  %v4303_v44 = vpop.f32.mrf.mxu1  ;;  %vm13180_vm8 = vmmov %vm13111_vm0 }
 0x2f5   : > { %v4537_v47 = vpop.f32.mrf.mxu0  ;;  %vm13181_vm14 = vmmov %vm13111_vm0 }
 0x2f6   : > { %v11704_v12 = vadd.f32 %v4537_v47, %v4303_v44  ;;  %v8193_v33 = vpop.f32.mrf.mxu1  ;;  %v6289_v44 = vld [vmem:[#allocation2 + $0x7d] sm:$0xff] }
 0x2f7   : > { %v8231_v51 = vpop.f32.mrf.mxu0 }
 0x2f8   : > { %v11706_v43 = vadd.f32 %v8231_v51, %v8193_v33  ;;  %v4306_v34 = vpop.f32.mrf.mxu1  ;;  %v6291_v51 = vld [vmem:[#allocation2 + $0x8d] sm:$0xff] }
 0x2f9   : > { %v4540_v55 = vpop.f32.mrf.mxu0 }
 0x2fa   : > { %8367 = vmatmul.mubr.msk.bf16.gmra.mxu1 %vm13167_vm6, %v5353_v10  ;;  %v11708_v9 = vadd.f32 %v4540_v55, %v4306_v34  ;;  %v6290_v55 = vld [vmem:[#allocation2 + $0x85] sm:$0xff]  ;;  %vm13182_vm6 = vmmov %vm13111_vm0 }
 0x2fb   : > { %8405 = vmatmul.mubr.msk.bf16.gmra.mxu0 %vm13168_vm11, %v11694_v61  ;;  %8410 = vmatprep.mubr.msk.bf16.mxu1 %vm13169_vm10, %v11587_v24  ;;  %v6715_v24 = vsel %vm13171_vm15, %v11601_v30, 0  ;;  %vm13183_vm11 = vmmov %vm13111_vm0 }
 0x2fc   : > { %8448 = vmatprep.mubr.msk.bf16.mxu0 %vm13170_vm12, %v6314_v23  ;;  %v6288_v23 = vld [vmem:[#allocation2 + $0x75] sm:$0xff]  ;;  %vm13184_vm10 = vmmov %vm13111_vm0 }
 0x2fd   : > { %v8196_v4 = vpop.f32.mrf.mxu1  ;;  %v6319_v34 = vpack.c.bf16 %v6289_v44, %v6288_v23  ;;  %vm13185_vm12 = vmmov %vm13111_vm0  ;;  %v6296_v23 = vld [vmem:[#allocation2 + $0xb5] sm:$0xff]  ;;  %v6297_v44 = vld [vmem:[#allocation2 + $0xbd] sm:$0xff] }
 0x2fe   : > { %v8234_v0 = vpop.f32.mrf.mxu0  ;;  %vm13186_vm15 = vmmov %vm13111_vm0 }
 0x2ff   : > { %v11712_v56 = vadd.f32 %v8234_v0, %v8196_v4  ;;  %v4319_v6 = vpop.f32.mrf.mxu1 }
 0x300   : > { %v4553_v1 = vpop.f32.mrf.mxu0 }
 0x301   : > { %v11719_v57 = vadd.f32 %v4553_v1, %v4319_v6  ;;  %v8197_v30 = vpop.f32.mrf.mxu1  ;;  %v6292_v6 = vld [vmem:[#allocation2 + $0x95] sm:$0xff]  ;;  %v6293_v1 = vld [vmem:[#allocation2 + $0x9d] sm:$0xff] }
 0x302   : > { %8411 = vmatmul.mubr.msk.bf16.vlgmr.msra.gmra.mxu1 %vm13111_vm0, %v11596_v26  ;;  %v8235_v17 = vpop.f32.mrf.mxu0 }
 0x303   : > { %8449 = vmatmul.mubr.msk.bf16.vlgmr.msra.gmra.mxu0 %vm13172_vm5, %v6315_v13  ;;  %8485 = vmatpush3.bf16.msra.mxu1 %v6715_v24  ;;  %v11722_v22 = vadd.f32 %v8235_v17, %v8197_v30  ;;  %v4322_v26 = vpop.f32.mrf.mxu1  ;;  %vm13187_vm5 = vmmov %vm13111_vm0 }
 0x304   : > { %8414 = vmatprep.mubr.msk.bf16.mxu1 %vm13173_vm9, %v11608_v29  ;;  %8452 = vmatprep.mubr.msk.bf16.mxu0 %vm13174_vm1, %v6316_v45  ;;  %v4556_v62 = vpop.f32.mrf.mxu0  ;;  %vm13188_vm9 = vmmov %vm13111_vm0 }
 0x305   : > { %v11724_v40 = vadd.f32 %v4556_v62, %v4322_v26  ;;  %v6321_v62 = vpack.c.bf16 %v6293_v1, %v6292_v6  ;;  %vm13189_vm1 = vmmov %vm13111_vm0 }
 0x30a   : > { %v8200_v5 = vpop.f32.mrf.mxu1  ;;  %8415 = vmatmul.mubr.msk.bf16.gmra.mxu1 %vm13175_vm4, %v11610_v38  ;;  %vm13190_vm4 = vmmov %vm13111_vm0 }
 0x30b   : > { %v8238_v29 = vpop.f32.mrf.mxu0  ;;  %8453 = vmatmul.mubr.msk.bf16.gmra.mxu0 %vm13176_vm3, %v6317_v49  ;;  %8418 = vmatprep.mubr.msk.bf16.mxu1 %vm13177_vm7, %v11618_v25  ;;  %v6320_v25 = vpack.c.bf16 %v6291_v51, %v6290_v55  ;;  %v6299_v51 = vld [vmem:[#allocation2 + $0xcd] sm:$0xff]  ;;  %v6298_v55 = vld [vmem:[#allocation2 + $0xc5] sm:$0xff]  ;;  %vm13191_vm3 = vmmov %vm13111_vm0 }
 0x30c   : > { %v11729_v2 = vadd.f32 %v8238_v29, %v8200_v5  ;;  %8456 = vmatprep.mubr.msk.bf16.mxu0 %vm13178_vm13, %v6318_v8  ;;  %v4335_v60 = vpop.f32.mrf.mxu1  ;;  %vm13192_vm7 = vmmov %vm13111_vm0 }
 0x30d   : > { %v4569_v10 = vpop.f32.mrf.mxu0  ;;  %vm13193_vm13 = vmmov %vm13111_vm0 }
 0x30e   : > { %v11734_v52 = vadd.f32 %v4569_v10, %v4335_v60  ;;  %v8201_v47 = vpop.f32.mrf.mxu1 }
 0x30f   : > { %v8239_v33 = vpop.f32.mrf.mxu0 }
 0x310   : > { %v11736_v3 = vadd.f32 %v8239_v33, %v8201_v47  ;;  %v4338_v38 = vpop.f32.mrf.mxu1 }
 0x311   : > { %v4572_v15 = vpop.f32.mrf.mxu0 }
 0x312   : > { %v11738_v7 = vadd.f32 %v4572_v15, %v4338_v38  ;;  %v8204_v4 = vpop.f32.mrf.mxu1  ;;  %8419 = vmatmul.mubr.msk.bf16.gmra.mxu1 %vm13179_vm2, %v11620_v50  ;;  %vm13194_vm2 = vmmov %vm13111_vm0 }
 0x313   : > { %v8242_v0 = vpop.f32.mrf.mxu0  ;;  %8457 = vmatmul.mubr.msk.bf16.gmra.mxu0 %vm13180_vm8, %v6319_v34  ;;  %8422 = vmatprep.mubr.msk.bf16.mxu1 %vm13181_vm14, %v11628_v21  ;;  %v6322_v21 = vpack.c.bf16 %v6295_v36, %v6294_v46  ;;  %v6323_v34 = vpack.c.bf16 %v6297_v44, %v6296_v23  ;;  %vm13195_vm8 = vmmov %vm13111_vm0 }
 0x314   : > { %v11743_v13 = vadd.f32 %v8242_v0, %v8204_v4  ;;  %8460 = vmatprep.mubr.msk.bf16.mxu0 %vm13182_vm6, %v6320_v25  ;;  %v4351_v24 = vpop.f32.mrf.mxu1  ;;  %vm13196_vm14 = vmmov %vm13111_vm0 }
 0x315   : > { %v4585_v20 = vpop.f32.mrf.mxu0  ;;  %vm13197_vm6 = vmmov %vm13111_vm0 }
 0x316   : > { %v11748_v45 = vadd.f32 %v4585_v20, %v4351_v24  ;;  %v8205_v30 = vpop.f32.mrf.mxu1 }
 0x317   : > { %v8243_v17 = vpop.f32.mrf.mxu0 }
 0x318   : > { %v11750_v63 = vadd.f32 %v8243_v17, %v8205_v30  ;;  %v4354_v50 = vpop.f32.mrf.mxu1  ;;  %v6300_v30 = vld [vmem:[#allocation2 + $0xd5] sm:$0xff]  ;;  %v6301_v17 = vld [vmem:[#allocation2 + $0xdd] sm:$0xff] }
 0x319   : > { %v4588_v26 = vpop.f32.mrf.mxu0 }
 0x31a   : > { %v11752_v49 = vadd.f32 %v4588_v26, %v4354_v50  ;;  %v8208_v58 = vpop.f32.mrf.mxu1  ;;  %8423 = vmatmul.mubr.msk.bf16.gmra.mxu1 %vm13183_vm11, %v11630_v42  ;;  %v6303_v26 = vld [vmem:[#allocation2 + $0xed] sm:$0xff]  ;;  %vm13198_vm11 = vmmov %vm13111_vm0 }
 0x31b   : > { %v8246_v8 = vpop.f32.mrf.mxu0  ;;  %8461 = vmatmul.mubr.msk.bf16.gmra.mxu0 %vm13184_vm10, %v6321_v62  ;;  %8426 = vmatprep.mubr.msk.bf16.mxu1 %vm13185_vm12, %v11638_v14  ;;  %v6324_v14 = vpack.c.bf16 %v6299_v51, %v6298_v55  ;;  %v6304_v51 = vld [vmem:[#allocation2 + $0xf5] sm:$0xff]  ;;  %v6307_v55 = vld [vmem:[#allocation2 + $0x10d] sm:$0xff]  ;;  %vm13199_vm10 = vmmov %vm13111_vm0 }
 0x31c   : > { %v11757_v5 = vadd.f32 %v8246_v8, %v8208_v58  ;;  %8464 = vmatprep.mubr.msk.bf16.mxu0 %vm13186_vm15, %v6322_v21  ;;  %v4367_v29 = vpop.f32.mrf.mxu1  ;;  %v6325_v21 = vpack.c.bf16 %v6301_v17, %v6300_v30  ;;  %v6302_v58 = vld [vmem:[#allocation2 + $0xe5] sm:$0xff]  ;;  %vm13200_vm12 = vmmov %vm13111_vm0 }
 0x31d   : > { %v4601_v60 = vpop.f32.mrf.mxu0  ;;  %vm13201_vm15 = vmmov %vm13111_vm0 }
 0x31e   : > { %v11762_v10 = vadd.f32 %v4601_v60, %v4367_v29  ;;  %v8209_v47 = vpop.f32.mrf.mxu1 }
 0x31f   : > { %v8247_v33 = vpop.f32.mrf.mxu0 }
 0x320   : > { %v11764_v38 = vadd.f32 %v8247_v33, %v8209_v47  ;;  %v4370_v42 = vpop.f32.mrf.mxu1 }
 0x321   : > { %v4604_v15 = vpop.f32.mrf.mxu0 }
 0x322   : > { %v11766_v25 = vadd.f32 %v4604_v15, %v4370_v42  ;;  %v8212_v4 = vpop.f32.mrf.mxu1  ;;  %8427 = vmatmul.mubr.msk.bf16.gmra.mxu1 %vm13111_vm0, %v11640_v11  ;;  %v6305_v42 = vld [vmem:[#allocation2 + $0xfd] sm:$0xff] }
 0x323   : > { %v8250_v0 = vpop.f32.mrf.mxu0  ;;  %8465 = vmatmul.mubr.msk.bf16.gmra.mxu0 %vm13187_vm5, %v6323_v34  ;;  %8430 = vmatprep.mubr.msk.bf16.mxu1 %vm13188_vm9, %v11648_v18  ;;  %v6326_v18 = vpack.c.bf16 %v6303_v26, %v6302_v58  ;;  %v6309_v58 = vld [vmem:[#allocation2 + $0x11d] sm:$0xff]  ;;  %vm13202_vm5 = vmmov %vm13111_vm0 }
 0x324   : > { %v11771_v24 = vadd.f32 %v8250_v0, %v8212_v4  ;;  %8468 = vmatprep.mubr.msk.bf16.mxu0 %vm13189_vm1, %v6324_v14  ;;  %v4383_v20 = vpop.f32.mrf.mxu1  ;;  %v6327_v0 = vpack.c.bf16 %v6305_v42, %v6304_v51  ;;  %vm13203_vm9 = vmmov %vm13111_vm0 }
 0x325   : > { %v4617_v6 = vpop.f32.mrf.mxu0  ;;  %vm13204_vm1 = vmmov %vm13111_vm0 }
 0x326   : > { %v11776_v1 = vadd.f32 %v4617_v6, %v4383_v20  ;;  %v8213_v36 = vpop.f32.mrf.mxu1  ;;  %v6306_v20 = vld [vmem:[#allocation2 + $0x105] sm:$0xff] }
 0x327   : > { %v8251_v50 = vpop.f32.mrf.mxu0 }
 0x328   : > { %v11778_v62 = vadd.f32 %v8251_v50, %v8213_v36  ;;  %v4386_v11 = vpop.f32.mrf.mxu1 }
 0x329   : > { %v4620_v46 = vpop.f32.mrf.mxu0 }
 0x32a   : > { %v11780_v8 = vadd.f32 %v4620_v46, %v4386_v11  ;;  %v8216_v29 = vpop.f32.mrf.mxu1  ;;  %8431 = vmatmul.mubr.msk.bf16.gmra.mxu1 %vm13190_vm4, %v11650_v28  ;;  %vm13205_vm4 = vmmov %vm13111_vm0 }
 0x32b   : > { %v8254_v60 = vpop.f32.mrf.mxu0  ;;  %8469 = vmatmul.mubr.msk.bf16.gmra.mxu0 %vm13191_vm3, %v6325_v21  ;;  %8434 = vmatprep.mubr.msk.bf16.mxu1 %vm13192_vm7, %v11658_v32  ;;  %v6328_v32 = vpack.c.bf16 %v6307_v55, %v6306_v20  ;;  %v6308_v21 = vld [vmem:[#allocation2 + $0x115] sm:$0xff]  ;;  %v6313_v20 = vld [vmem:[#allocation2 + $0x13d] sm:$0xff]  ;;  %vm13206_vm3 = vmmov %vm13111_vm0 }
 0x32c   : > { %v11785_v23 = vadd.f32 %v8254_v60, %v8216_v29  ;;  %8472 = vmatprep.mubr.msk.bf16.mxu0 %vm13193_vm13, %v6326_v18  ;;  %v4399_v44 = vpop.f32.mrf.mxu1  ;;  %v6311_v60 = vld [vmem:[#allocation2 + $0x12d] sm:$0xff]  ;;  %v6329_v51 = vpack.c.bf16 %v6309_v58, %v6308_v21  ;;  %vm13207_vm7 = vmmov %vm13111_vm0 }
 0x32d   : > { %v4633_v47 = vpop.f32.mrf.mxu0  ;;  %vm13208_vm13 = vmmov %vm13111_vm0 }
 0x32e   : > { %v11790_v33 = vadd.f32 %v4633_v47, %v4399_v44  ;;  %v8217_v15 = vpop.f32.mrf.mxu1 }
 0x32f   : > { %v8255_v34 = vpop.f32.mrf.mxu0 }
 0x330   : > { %v11792_v14 = vadd.f32 %v8255_v34, %v8217_v15  ;;  %v4402_v28 = vpop.f32.mrf.mxu1 }
 0x331   : > { %v4636_v4 = vpop.f32.mrf.mxu0 }
 0x332   : > { %v11794_v6 = vadd.f32 %v4636_v4, %v4402_v28  ;;  %v8260_v30 = vpop.f32.mrf.mxu1  ;;  %8435 = vmatmul.mubr.msk.bf16.gmra.mxu1 %vm13194_vm2, %v11662_v41  ;;  %v6310_v41 = vld [vmem:[#allocation2 + $0x125] sm:$0xff]  ;;  %v5986_v28 = vld [vmem:[#allocation2 + $0x134] sm:$0xff]  ;;  %vm13209_vm2 = vmmov %vm13111_vm0 }
 0x333   : > { %v8298_v17 = vpop.f32.mrf.mxu0  ;;  %8473 = vmatmul.mubr.msk.bf16.gmra.mxu0 %vm13195_vm8, %v6327_v0  ;;  %v4940_v36 = vadd.f32 %v8260_v30, %v11660_v53  ;;  %8438 = vmatprep.mubr.msk.bf16.mxu1 %vm13196_vm14, %v11676_v54  ;;  %v6330_v34 = vpack.c.bf16 %v6311_v60, %v6310_v41  ;;  %v5987_v0 = vld [vmem:[#allocation2 + $0x13c] sm:$0xff]  ;;  %vm13210_vm8 = vmmov %vm13111_vm0 }
 0x334   : > { %8476 = vmatprep.mubr.msk.bf16.mxu0 %vm13197_vm6, %v6328_v32  ;;  %v4795_v50 = vpop.f32.mrf.mxu1  ;;  %vm13211_vm14 = vmmov %vm13111_vm0 }
 0x335   : > { %v5121_v26 = vpop.f32.mrf.mxu0  ;;  %v11803_v11 = vadd.f32 %v8298_v17, %v4940_v36  ;;  %v4938_v46 = vadd.f32 %v4795_v50, %v11670_v39  ;;  %vm13212_vm6 = vmmov %vm13111_vm0 }
 0x336   : > { %v8261_v18 = vpop.f32.mrf.mxu1 }
 0x337   : > { %v8299_v29 = vpop.f32.mrf.mxu0  ;;  %v11806_v44 = vadd.f32 %v5121_v26, %v4938_v46  ;;  %v4941_v53 = vadd.f32 %v8261_v18, %v11672_v19  ;;  %v6005_v26 = vpack.c.bf16 %v5987_v0, %v5986_v28  ;;  %v6605_v46 = vld [vmem:[#allocation2 + $0x2e] sm:$0xff] }
 0x338   : > { %v4798_v47 = vpop.f32.mrf.mxu1  ;;  %v6609_v0 = vld [vmem:[#allocation2 + $0x4e] sm:$0xff] }
 0x339   : > { %v5124_v54 = vpop.f32.mrf.mxu0  ;;  %v11809_v42 = vadd.f32 %v8299_v29, %v4941_v53  ;;  %v4939_v15 = vadd.f32 %v4798_v47, %v11674_v59  ;;  %v6312_v59 = vld [vmem:[#allocation2 + $0x135] sm:$0xff]  ;;  %v6604_v29 = vld [vmem:[#allocation2 + $0x26] sm:$0xff] }
 0x33a   : > { %v8264_v55 = vpop.f32.mrf.mxu1  ;;  %8439 = vmatmul.mubr.msk.bf16.gmra.mxu1 %vm13198_vm11, %v11680_v31  ;;  %v6331_v21 = vpack.c.bf16 %v6313_v20, %v6312_v59  ;;  %v6640_v53 = vpack.c.bf16 %v6605_v46, %v6604_v29  ;;  %vm13213_vm11 = vmmov %vm13111_vm0 }
 0x33b   : > { %v8302_v39 = vpop.f32.mrf.mxu0  ;;  %8477 = vmatmul.mubr.msk.bf16.gmra.mxu0 %vm13199_vm10, %v6329_v51  ;;  %v11815_v4 = vadd.f32 %v5124_v54, %v4939_v15  ;;  %v4944_v19 = vadd.f32 %v8264_v55, %v11678_v35  ;;  %8442 = vmatprep.mubr.msk.bf16.mxu1 %vm13200_vm12, %v11694_v61  ;;  %vm13214_vm10 = vmmov %vm13111_vm0 }
 0x33c   : > { %8480 = vmatprep.mubr.msk.bf16.mxu0 %vm13201_vm15, %v6330_v34  ;;  %v4811_v32 = vpop.f32.mrf.mxu1  ;;  %vm13215_vm12 = vmmov %vm13111_vm0 }
 0x33d   : > { %v5137_v30 = vpop.f32.mrf.mxu0  ;;  %v11821_v17 = vadd.f32 %v8302_v39, %v4944_v19  ;;  %v4942_v31 = vadd.f32 %v4811_v32, %v11688_v48  ;;  %v6607_v39 = vld [vmem:[#allocation2 + $0x3e] sm:$0xff]  ;;  %vm13216_vm15 = vmmov %vm13111_vm0 }
 0x33e   : > { %v8265_v36 = vpop.f32.mrf.mxu1 }
 0x33f   : > { %v8303_v50 = vpop.f32.mrf.mxu0  ;;  %v11824_v35 = vadd.f32 %v5137_v30, %v4942_v31  ;;  %v4945_v61 = vadd.f32 %v8265_v36, %v11690_v27  ;;  %v6608_v31 = vld [vmem:[#allocation2 + $0x46] sm:$0xff] }
 0x340   : > { %v4814_v58 = vpop.f32.mrf.mxu1 }
 0x341   : > { %v5140_v18 = vpop.f32.mrf.mxu0  ;;  %v11827_v41 = vadd.f32 %v8303_v50, %v4945_v61  ;;  %v4943_v60 = vadd.f32 %v4814_v58, %v11692_v37  ;;  %v6606_v37 = vld [vmem:[#allocation2 + $0x36] sm:$0xff] }
 0x342   : > { %v8268_v47 = vpop.f32.mrf.mxu1  ;;  %8443 = vmatmul.mubr.msk.bf16.gmra.mxu1 %vm13111_vm0, %v6005_v26  ;;  %v6642_v26 = vpack.c.bf16 %v6609_v0, %v6608_v31 }
 0x343   : > { %v8306_v54 = vpop.f32.mrf.mxu0  ;;  %8481 = vmatmul.mubr.msk.bf16.gmra.mxu0 %vm13202_vm5, %v6331_v21  ;;  %v11832_v48 = vadd.f32 %v5140_v18, %v4943_v60  ;;  %v4948_v51 = vadd.f32 %v8268_v47, %v11696_v16  ;;  %8486 = vmatprep.mubr.msk.bf16.mxu1 %vm13203_vm9, %v6640_v53  ;;  %v6641_v16 = vpack.c.bf16 %v6607_v39, %v6606_v37  ;;  %v6610_v60 = vld [vmem:[#allocation2 + $0x56] sm:$0xff]  ;;  %v6611_v53 = vld [vmem:[#allocation2 + $0x5e] sm:$0xff]  ;;  %v6612_v37 = vld [vmem:[#allocation2 + $0x66] sm:$0xff] }
 0x344   : > { %v4827_v27 = vpop.f32.mrf.mxu1  ;;  %vm13217_vm5 = vmmov %vm13111_vm0 }
 0x345   : > { %v5153_v15 = vpop.f32.mrf.mxu0  ;;  %v11836_v34 = vadd.f32 %v8306_v54, %v4948_v51  ;;  %v4946_v55 = vadd.f32 %v4827_v27, %v11704_v12  ;;  %v6613_v54 = vld [vmem:[#allocation2 + $0x6e] sm:$0xff]  ;;  %vm13218_vm9 = vmmov %vm13111_vm0 }
 0x346   : > { %v8269_v28 = vpop.f32.mrf.mxu1 }
 0x347   : > { %v8307_v19 = vpop.f32.mrf.mxu0  ;;  %v11839_v59 = vadd.f32 %v5153_v15, %v4946_v55  ;;  %v4949_v20 = vadd.f32 %v8269_v28, %v11706_v43 }
 0x348   : > { %v4830_v32 = vpop.f32.mrf.mxu1 }
 0x349   : > { %v5156_v30 = vpop.f32.mrf.mxu0  ;;  %v11842_v36 = vadd.f32 %v8307_v19, %v4949_v20  ;;  %v4947_v50 = vadd.f32 %v4830_v32, %v11708_v9  ;;  %v6644_v19 = vpack.c.bf16 %v6613_v54, %v6612_v37 }
 0x34a   : > { %v8272_v46 = vpop.f32.mrf.mxu1  ;;  %8487 = vmatmul.mubr.msk.bf16.vlgmr.msra.gmra.mxu1 %vm13204_vm1, %v6641_v16  ;;  %vm13219_vm1 = vmmov %vm13111_vm0 }
 0x34b   : > { %v8310_v12 = vpop.f32.mrf.mxu0  ;;  %v11846_v21 = vadd.f32 %v5156_v30, %v4947_v50  ;;  %v4952_v61 = vadd.f32 %v8272_v46, %v11712_v56  ;;  %8490 = vmatprep.mubr.msk.bf16.mxu1 %vm13205_vm4, %v6642_v26  ;;  %v6643_v56 = vpack.c.bf16 %v6611_v53, %v6610_v60  ;;  %v6614_v50 = vld [vmem:[#allocation2 + $0x76] sm:$0xff]  ;;  %v6615_v26 = vld [vmem:[#allocation2 + $0x7e] sm:$0xff]  ;;  %v6616_v60 = vld [vmem:[#allocation2 + $0x86] sm:$0xff] }
 0x34c   : > { %v4843_v43 = vpop.f32.mrf.mxu1  ;;  %vm13222_vm4 = vmmov %vm13111_vm0 }
 0x34d   : > { %v5169_v58 = vpop.f32.mrf.mxu0  ;;  %v11850_v18 = vadd.f32 %v8310_v12, %v4952_v61  ;;  %v4950_v29 = vadd.f32 %v4843_v43, %v11719_v57  ;;  %v6617_v12 = vld [vmem:[#allocation2 + $0x8e] sm:$0xff] }
 0x34e   : > { %v8273_v9 = vpop.f32.mrf.mxu1 }
 0x34f   : > { %v8311_v47 = vpop.f32.mrf.mxu0  ;;  %v11853_v51 = vadd.f32 %v5169_v58, %v4950_v29  ;;  %v4953_v27 = vadd.f32 %v8273_v9, %v11722_v22 }
 0x350   : > { %v4846_v15 = vpop.f32.mrf.mxu1 }
 0x351   : > { %v5172_v55 = vpop.f32.mrf.mxu0  ;;  %v11856_v39 = vadd.f32 %v8311_v47, %v4953_v27  ;;  %v4951_v28 = vadd.f32 %v4846_v15, %v11724_v40  ;;  %v6646_v47 = vpack.c.bf16 %v6617_v12, %v6616_v60 }
 0x352   : > { %v8276_v0 = vpop.f32.mrf.mxu1  ;;  %8491 = vmatmul.mubr.msk.bf16.gmra.mxu1 %vm13206_vm3, %v6643_v56  ;;  %vm13223_vm3 = vmmov %vm13111_vm0 }
 0x353   : > { %v8314_v57 = vpop.f32.mrf.mxu0  ;;  %v11860_v20 = vadd.f32 %v5172_v55, %v4951_v28  ;;  %v4956_v32 = vadd.f32 %v8276_v0, %v11729_v2  ;;  %8494 = vmatprep.mubr.msk.bf16.mxu1 %vm13207_vm7, %v6644_v19  ;;  %v6645_v2 = vpack.c.bf16 %v6615_v26, %v6614_v50  ;;  %v6618_v28 = vld [vmem:[#allocation2 + $0x96] sm:$0xff]  ;;  %v6619_v19 = vld [vmem:[#allocation2 + $0x9e] sm:$0xff]  ;;  %v6620_v50 = vld [vmem:[#allocation2 + $0xa6] sm:$0xff] }
 0x354   : > { %v4859_v22 = vpop.f32.mrf.mxu1  ;;  %vm13224_vm7 = vmmov %vm13111_vm0 }
 0x355   : > { %v5185_v30 = vpop.f32.mrf.mxu0  ;;  %v11864_v16 = vadd.f32 %v8314_v57, %v4956_v32  ;;  %v4954_v31 = vadd.f32 %v4859_v22, %v11734_v52  ;;  %v6621_v57 = vld [vmem:[#allocation2 + $0xae] sm:$0xff] }
 0x356   : > { %v8277_v40 = vpop.f32.mrf.mxu1 }
 0x357   : > { %v8315_v46 = vpop.f32.mrf.mxu0  ;;  %v11867_v61 = vadd.f32 %v5185_v30, %v4954_v31  ;;  %v4957_v43 = vadd.f32 %v8277_v40, %v11736_v3 }
 0x358   : > { %v4862_v58 = vpop.f32.mrf.mxu1 }
 0x359   : > { %v5188_v29 = vpop.f32.mrf.mxu0  ;;  %v11870_v53 = vadd.f32 %v8315_v46, %v4957_v43  ;;  %v4955_v9 = vadd.f32 %v4862_v58, %v11738_v7  ;;  %v6648_v46 = vpack.c.bf16 %v6621_v57, %v6620_v50 }
 0x35a   : > { %v8280_v54 = vpop.f32.mrf.mxu1  ;;  %8495 = vmatmul.mubr.msk.bf16.gmra.mxu1 %vm13208_vm13, %v6645_v2  ;;  %vm13225_vm13 = vmmov %vm13111_vm0 }
 0x35b   : > { %v8318_v52 = vpop.f32.mrf.mxu0  ;;  %v11874_v27 = vadd.f32 %v5188_v29, %v4955_v9  ;;  %v4960_v15 = vadd.f32 %v8280_v54, %v11743_v13  ;;  %8498 = vmatprep.mubr.msk.bf16.mxu1 %vm13209_vm2, %v6646_v47  ;;  %v6647_v13 = vpack.c.bf16 %v6619_v19, %v6618_v28  ;;  %v6622_v9 = vld [vmem:[#allocation2 + $0xb6] sm:$0xff]  ;;  %v6623_v47 = vld [vmem:[#allocation2 + $0xbe] sm:$0xff]  ;;  %v6624_v28 = vld [vmem:[#allocation2 + $0xc6] sm:$0xff] }
 0x35c   : > { %v4875_v3 = vpop.f32.mrf.mxu1  ;;  %vm13226_vm2 = vmmov %vm13111_vm0 }
 0x35d   : > { %v5201_v55 = vpop.f32.mrf.mxu0  ;;  %v11878_v56 = vadd.f32 %v8318_v52, %v4960_v15  ;;  %v4958_v37 = vadd.f32 %v4875_v3, %v11748_v45  ;;  %v6625_v52 = vld [vmem:[#allocation2 + $0xce] sm:$0xff] }
 0x35e   : > { %v8281_v7 = vpop.f32.mrf.mxu1 }
 0x35f   : > { %v8319_v0 = vpop.f32.mrf.mxu0  ;;  %v11881_v32 = vadd.f32 %v5201_v55, %v4958_v37  ;;  %v4961_v22 = vadd.f32 %v8281_v7, %v11750_v63 }
 0x360   : > { %v4878_v30 = vpop.f32.mrf.mxu1 }
 0x361   : > { %v5204_v31 = vpop.f32.mrf.mxu0  ;;  %v11884_v26 = vadd.f32 %v8319_v0, %v4961_v22  ;;  %v4959_v40 = vadd.f32 %v4878_v30, %v11752_v49  ;;  %v6650_v0 = vpack.c.bf16 %v6625_v52, %v6624_v28 }
 0x362   : > { %v8284_v12 = vpop.f32.mrf.mxu1  ;;  %8499 = vmatmul.mubr.msk.bf16.gmra.mxu1 %vm13210_vm8, %v6647_v13  ;;  %vm13227_vm8 = vmmov %vm13111_vm0 }
 0x363   : > { %v8322_v45 = vpop.f32.mrf.mxu0  ;;  %v11888_v43 = vadd.f32 %v5204_v31, %v4959_v40  ;;  %v4964_v58 = vadd.f32 %v8284_v12, %v11757_v5  ;;  %8502 = vmatprep.mubr.msk.bf16.mxu1 %vm13211_vm14, %v6648_v46  ;;  %v6649_v5 = vpack.c.bf16 %v6623_v47, %v6622_v9  ;;  %v6626_v40 = vld [vmem:[#allocation2 + $0xd6] sm:$0xff]  ;;  %v6627_v46 = vld [vmem:[#allocation2 + $0xde] sm:$0xff]  ;;  %v6628_v9 = vld [vmem:[#allocation2 + $0xe6] sm:$0xff] }
 0x364   : > { %v4891_v63 = vpop.f32.mrf.mxu1  ;;  %vm13228_vm14 = vmmov %vm13111_vm0 }
 0x365   : > { %v5217_v29 = vpop.f32.mrf.mxu0  ;;  %v11892_v2 = vadd.f32 %v8322_v45, %v4964_v58  ;;  %v4962_v60 = vadd.f32 %v4891_v63, %v11762_v10  ;;  %v6629_v45 = vld [vmem:[#allocation2 + $0xee] sm:$0xff] }
 0x366   : > { %v8285_v49 = vpop.f32.mrf.mxu1 }
 0x367   : > { %v8323_v54 = vpop.f32.mrf.mxu0  ;;  %v11895_v15 = vadd.f32 %v5217_v29, %v4962_v60  ;;  %v4965_v3 = vadd.f32 %v8285_v49, %v11764_v38 }
 0x368   : > { %v4894_v55 = vpop.f32.mrf.mxu1 }
 0x369   : > { %v5220_v37 = vpop.f32.mrf.mxu0  ;;  %v11898_v19 = vadd.f32 %v8323_v54, %v4965_v3  ;;  %v4963_v7 = vadd.f32 %v4894_v55, %v11766_v25  ;;  %v6652_v54 = vpack.c.bf16 %v6629_v45, %v6628_v9 }
 0x36a   : > { %v8288_v57 = vpop.f32.mrf.mxu1  ;;  %8503 = vmatmul.mubr.msk.bf16.gmra.mxu1 %vm13212_vm6, %v6649_v5  ;;  %vm13229_vm6 = vmmov %vm13111_vm0 }
 0x36b   : > { %v8326_v10 = vpop.f32.mrf.mxu0  ;;  %v11902_v22 = vadd.f32 %v5220_v37, %v4963_v7  ;;  %v4968_v30 = vadd.f32 %v8288_v57, %v11771_v24  ;;  %8506 = vmatprep.mubr.msk.bf16.mxu1 %vm13213_vm11, %v6650_v0  ;;  %v6651_v24 = vpack.c.bf16 %v6627_v46, %v6626_v40  ;;  %v6630_v7 = vld [vmem:[#allocation2 + $0xf6] sm:$0xff]  ;;  %v6631_v0 = vld [vmem:[#allocation2 + $0xfe] sm:$0xff]  ;;  %v6632_v40 = vld [vmem:[#allocation2 + $0x106] sm:$0xff] }
 0x36c   : > { %v4907_v38 = vpop.f32.mrf.mxu1  ;;  %vm13230_vm11 = vmmov %vm13111_vm0 }
 0x36d   : > { %v5233_v31 = vpop.f32.mrf.mxu0  ;;  %v11906_v13 = vadd.f32 %v8326_v10, %v4968_v30  ;;  %v4966_v50 = vadd.f32 %v4907_v38, %v11776_v1  ;;  %v6633_v10 = vld [vmem:[#allocation2 + $0x10e] sm:$0xff] }
 0x36e   : > { %v8289_v25 = vpop.f32.mrf.mxu1 }
 0x36f   : > { %v8327_v12 = vpop.f32.mrf.mxu0  ;;  %v11909_v58 = vadd.f32 %v5233_v31, %v4966_v50  ;;  %v4969_v63 = vadd.f32 %v8289_v25, %v11778_v62 }
 0x370   : > { %v4910_v29 = vpop.f32.mrf.mxu1 }
 0x371   : > { %v5236_v60 = vpop.f32.mrf.mxu0  ;;  %v11912_v47 = vadd.f32 %v8327_v12, %v4969_v63  ;;  %v4967_v49 = vadd.f32 %v4910_v29, %v11780_v8  ;;  %v6654_v12 = vpack.c.bf16 %v6633_v10, %v6632_v40 }
 0x372   : > { %v8292_v52 = vpop.f32.mrf.mxu1  ;;  %8507 = vmatmul.mubr.msk.bf16.gmra.mxu1 %vm13214_vm10, %v6651_v24  ;;  %vm13231_vm10 = vmmov %vm13111_vm0 }
 0x373   : > { %v8330_v1 = vpop.f32.mrf.mxu0  ;;  %v11916_v3 = vadd.f32 %v5236_v60, %v4967_v49  ;;  %v4972_v55 = vadd.f32 %v8292_v52, %v11785_v23  ;;  %8510 = vmatprep.mubr.msk.bf16.mxu1 %vm13215_vm12, %v6652_v54  ;;  %v6653_v23 = vpack.c.bf16 %v6631_v0, %v6630_v7  ;;  %v6634_v49 = vld [vmem:[#allocation2 + $0x116] sm:$0xff]  ;;  %v6635_v54 = vld [vmem:[#allocation2 + $0x11e] sm:$0xff]  ;;  %vm13232_vm12 = vmmov %vm13111_vm0 }
 0x374   : > { %v4923_v62 = vpop.f32.mrf.mxu1  ;;  %v6655_v7 = vpack.c.bf16 %v6635_v54, %v6634_v49 }
 0x375   : > { %v5249_v37 = vpop.f32.mrf.mxu0  ;;  %v11920_v5 = vadd.f32 %v8330_v1, %v4972_v55  ;;  %v4970_v28 = vadd.f32 %v4923_v62, %v11790_v33  ;;  %v6636_v1 = vld [vmem:[#allocation2 + $0x126] sm:$0xff]  ;;  %v6637_v55 = vld [vmem:[#allocation2 + $0x12e] sm:$0xff] }
 0x376   : > { %v8293_v8 = vpop.f32.mrf.mxu1 }
 0x377   : > { %v8331_v57 = vpop.f32.mrf.mxu0  ;;  %v11923_v30 = vadd.f32 %v5249_v37, %v4970_v28  ;;  %v4973_v38 = vadd.f32 %v8293_v8, %v11792_v14 }
 0x378   : > { %v4926_v31 = vpop.f32.mrf.mxu1 }
 0x379   : > { %v5252_v50 = vpop.f32.mrf.mxu0  ;;  %v11926_v46 = vadd.f32 %v8331_v57, %v4973_v38  ;;  %v4971_v25 = vadd.f32 %v4926_v31, %v11794_v6  ;;  %v6656_v57 = vpack.c.bf16 %v6637_v55, %v6636_v1 }
 0x37a   : > { %v8336_v45 = vpop.f32.mrf.mxu1  ;;  %8511 = vmatmul.mubr.msk.bf16.gmra.mxu1 %vm13216_vm15, %v6653_v23  ;;  %vm13233_vm15 = vmmov %vm13111_vm0 }
 0x37b   : > { %v8374_v33 = vpop.f32.mrf.mxu0  ;;  %v11930_v63 = vadd.f32 %v5252_v50, %v4971_v25  ;;  %v5592_v29 = vadd.f32 %v8336_v45, %v11803_v11  ;;  %8514 = vmatprep.mubr.msk.bf16.mxu1 %vm13111_vm0, %v6654_v12  ;;  %v6638_v50 = vld [vmem:[#allocation2 + $0x136] sm:$0xff] }
 0x37c   : > { %v5447_v14 = vpop.f32.mrf.mxu1 }
 0x37d   : > { %v5773_v60 = vpop.f32.mrf.mxu0  ;;  %v11934_v24 = vadd.f32 %v8374_v33, %v5592_v29  ;;  %v5590_v9 = vadd.f32 %v5447_v14, %v11806_v44 }
 0x37e   : > { %v8337_v6 = vpop.f32.mrf.mxu1 }
 0x37f   : > { %v8375_v52 = vpop.f32.mrf.mxu0  ;;  %v11937_v62 = vadd.f32 %v5773_v60, %v5590_v9  ;;  %v5593_v37 = vadd.f32 %v8337_v6, %v11809_v42  ;;  %v6639_v42 = vld [vmem:[#allocation2 + $0x13e] sm:$0xff] }
 0x380   : > { %v5450_v28 = vpop.f32.mrf.mxu1  ;;  %v6657_v33 = vpack.c.bf16 %v6639_v42, %v6638_v50 }
 0x381   : > { %v5776_v11 = vpop.f32.mrf.mxu0  ;;  %v11940_v0 = vadd.f32 %v8375_v52, %v5593_v37  ;;  %v5591_v8 = vadd.f32 %v5450_v28, %v11815_v4 }
 0x382   : > { %v8340_v10 = vpop.f32.mrf.mxu1  ;;  %8515 = vmatmul.mubr.msk.bf16.gmra.mxu1 %vm13217_vm5, %v6655_v7  ;;  %vm13234_vm5 = vmmov %vm13111_vm0 }
 0x383   : > { %v8378_v44 = vpop.f32.mrf.mxu0  ;;  %v11944_v38 = vadd.f32 %v5776_v11, %v5591_v8  ;;  %v5596_v31 = vadd.f32 %v8340_v10, %v11821_v17  ;;  %8518 = vmatprep.mubr.msk.bf16.mxu1 %vm13218_vm9, %v6656_v57  ;;  %vm13235_vm9 = vmmov %vm13111_vm0 }
 0x384   : > { %v5463_v23 = vpop.f32.mrf.mxu1 }
 0x385   : > { %v5789_v40 = vpop.f32.mrf.mxu0  ;;  %v11948_v25 = vadd.f32 %v8378_v44, %v5596_v31  ;;  %v5594_v12 = vadd.f32 %v5463_v23, %v11824_v35 }
 0x386   : > { %v8341_v4 = vpop.f32.mrf.mxu1 }
 0x387   : > { %v8379_v45 = vpop.f32.mrf.mxu0  ;;  %v11951_v29 = vadd.f32 %v5789_v40, %v5594_v12  ;;  %v5597_v14 = vadd.f32 %v8341_v4, %v11827_v41 }
 0x388   : > { %v5466_v60 = vpop.f32.mrf.mxu1 }
 0x389   : > { %v5792_v9 = vpop.f32.mrf.mxu0  ;;  %v11954_v17 = vadd.f32 %v8379_v45, %v5597_v14  ;;  %v5595_v49 = vadd.f32 %v5466_v60, %v11832_v48 }
 0x38a   : > { %v8344_v54 = vpop.f32.mrf.mxu1  ;;  %8519 = vmatmul.mubr.msk.bf16.gmra.mxu1 %vm13219_vm1, %v6657_v33  ;;  %vm13236_vm1 = vmmov %vm13111_vm0 }
 0x38b   : > { %v8382_v6 = vpop.f32.mrf.mxu0  ;;  %v11958_v52 = vadd.f32 %v5792_v9, %v5595_v49  ;;  %v5600_v35 = vadd.f32 %v8344_v54, %v11836_v34 }
 0x38c   : > { %v5479_v1 = vpop.f32.mrf.mxu1 }
 0x38d   : > { %v5805_v55 = vpop.f32.mrf.mxu0  ;;  %v11961_v37 = vadd.f32 %v8382_v6, %v5600_v35  ;;  %v5598_v41 = vadd.f32 %v5479_v1, %v11839_v59 }
 0x38e   : > { %v8345_v28 = vpop.f32.mrf.mxu1 }
 0x38f   : > { %v8383_v11 = vpop.f32.mrf.mxu0  ;;  %v11964_v7 = vadd.f32 %v5805_v55, %v5598_v41  ;;  %v5601_v48 = vadd.f32 %v8345_v28, %v11842_v36 }
 0x390   : > { %v5482_v8 = vpop.f32.mrf.mxu1 }
 0x391   : > { %v5808_v57 = vpop.f32.mrf.mxu0  ;;  %v11967_v10 = vadd.f32 %v8383_v11, %v5601_v48  ;;  %v5599_v44 = vadd.f32 %v5482_v8, %v11846_v21 }
 0x392   : > { %v8348_v31 = vpop.f32.mrf.mxu1 }
 0x393   : > { %v8386_v34 = vpop.f32.mrf.mxu0  ;;  %v11970_v50 = vadd.f32 %v5808_v57, %v5599_v44  ;;  %v5604_v42 = vadd.f32 %v8348_v31, %v11850_v18 }
 0x394   : > { %v5495_v23 = vpop.f32.mrf.mxu1 }
 0x395   : > { %v5821_v59 = vpop.f32.mrf.mxu0  ;;  %v11973_v40 = vadd.f32 %v8386_v34, %v5604_v42  ;;  %v5602_v12 = vadd.f32 %v5495_v23, %v11853_v51 }
 0x396   : > { %v8349_v4 = vpop.f32.mrf.mxu1 }
 0x397   : > { %v8387_v36 = vpop.f32.mrf.mxu0  ;;  %v11976_v45 = vadd.f32 %v5821_v59, %v5602_v12  ;;  %v5605_v33 = vadd.f32 %v8349_v4, %v11856_v39 }
 0x398   : > { %v5498_v14 = vpop.f32.mrf.mxu1 }
 0x399   : > { %v5824_v21 = vpop.f32.mrf.mxu0  ;;  %v11979_v60 = vadd.f32 %v8387_v36, %v5605_v33  ;;  %v5603_v9 = vadd.f32 %v5498_v14, %v11860_v20 }
 0x39a   : > { %v8352_v49 = vpop.f32.mrf.mxu1 }
 0x39b   : > { %v8390_v18 = vpop.f32.mrf.mxu0  ;;  %v11982_v54 = vadd.f32 %v5824_v21, %v5603_v9  ;;  %v5608_v6 = vadd.f32 %v8352_v49, %v11864_v16 }
 0x39c   : > { %v5511_v35 = vpop.f32.mrf.mxu1 }
 0x39d   : > { %v5837_v51 = vpop.f32.mrf.mxu0  ;;  %v11985_v1 = vadd.f32 %v8390_v18, %v5608_v6  ;;  %v5606_v55 = vadd.f32 %v5511_v35, %v11867_v61 }
 0x39e   : > { %v8353_v41 = vpop.f32.mrf.mxu1 }
 0x39f   : > { %v8391_v39 = vpop.f32.mrf.mxu0  ;;  %v11988_v28 = vadd.f32 %v5837_v51, %v5606_v55  ;;  %v5609_v11 = vadd.f32 %v8353_v41, %v11870_v53 }
 0x3a0   : > { %v5514_v48 = vpop.f32.mrf.mxu1 }
 0x3a1   : > { %v5840_v20 = vpop.f32.mrf.mxu0  ;;  %v11991_v8 = vadd.f32 %v8391_v39, %v5609_v11  ;;  %v5607_v57 = vadd.f32 %v5514_v48, %v11874_v27 }
 0x3a2   : > { %v8356_v44 = vpop.f32.mrf.mxu1 }
 0x3a3   : > { %v8394_v16 = vpop.f32.mrf.mxu0  ;;  %v11994_v31 = vadd.f32 %v5840_v20, %v5607_v57  ;;  %v5612_v34 = vadd.f32 %v8356_v44, %v11878_v56 }
 0x3a4   : > { %v5527_v42 = vpop.f32.mrf.mxu1 }
 0x3a5   : > { %v5853_v61 = vpop.f32.mrf.mxu0  ;;  %v11997_v23 = vadd.f32 %v8394_v16, %v5612_v34  ;;  %v5610_v59 = vadd.f32 %v5527_v42, %v11881_v32 }
 0x3a6   : > { %v8357_v12 = vpop.f32.mrf.mxu1 }
 0x3a7   : > { %v8395_v53 = vpop.f32.mrf.mxu0  ;;  %v12000_v4 = vadd.f32 %v5853_v61, %v5610_v59  ;;  %v5613_v36 = vadd.f32 %v8357_v12, %v11884_v26 }
 0x3a8   : > { %v5530_v33 = vpop.f32.mrf.mxu1 }
 0x3a9   : > { %v5856_v27 = vpop.f32.mrf.mxu0  ;;  %v12003_v14 = vadd.f32 %v8395_v53, %v5613_v36  ;;  %v5611_v21 = vadd.f32 %v5530_v33, %v11888_v43 }
 0x3aa   : > { %v8360_v9 = vpop.f32.mrf.mxu1 }
 0x3ab   : > { %v8398_v56 = vpop.f32.mrf.mxu0  ;;  %v12006_v49 = vadd.f32 %v5856_v27, %v5611_v21  ;;  %v5616_v18 = vadd.f32 %v8360_v9, %v11892_v2 }
 0x3ac   : > { %v5543_v6 = vpop.f32.mrf.mxu1 }
 0x3ad   : > { %v5869_v32 = vpop.f32.mrf.mxu0  ;;  %v12009_v35 = vadd.f32 %v8398_v56, %v5616_v18  ;;  %v5614_v51 = vadd.f32 %v5543_v6, %v11895_v15 }
 0x3ae   : > { %v8361_v55 = vpop.f32.mrf.mxu1 }
 0x3af   : > { %v8399_v26 = vpop.f32.mrf.mxu0  ;;  %v12012_v41 = vadd.f32 %v5869_v32, %v5614_v51  ;;  %v5617_v39 = vadd.f32 %v8361_v55, %v11898_v19 }
 0x3b0   : > { %v5546_v11 = vpop.f32.mrf.mxu1 }
 0x3b1   : > { %v5872_v43 = vpop.f32.mrf.mxu0  ;;  %v12015_v48 = vadd.f32 %v8399_v26, %v5617_v39  ;;  %v5615_v20 = vadd.f32 %v5546_v11, %v11902_v22 }
 0x3b2   : > { %v8364_v57 = vpop.f32.mrf.mxu1 }
 0x3b3   : > { %v8402_v2 = vpop.f32.mrf.mxu0  ;;  %v12018_v44 = vadd.f32 %v5872_v43, %v5615_v20  ;;  %v5620_v16 = vadd.f32 %v8364_v57, %v11906_v13 }
 0x3b4   : > { %v5559_v34 = vpop.f32.mrf.mxu1 }
 0x3b5   : > { %v5885_v15 = vpop.f32.mrf.mxu0  ;;  %v12021_v42 = vadd.f32 %v8402_v2, %v5620_v16  ;;  %v5618_v61 = vadd.f32 %v5559_v34, %v11909_v58 }
 0x3b6   : > { %v8365_v59 = vpop.f32.mrf.mxu1 }
 0x3b7   : > { %v8403_v19 = vpop.f32.mrf.mxu0  ;;  %v12024_v12 = vadd.f32 %v5885_v15, %v5618_v61  ;;  %v5621_v53 = vadd.f32 %v8365_v59, %v11912_v47 }
 0x3b8   : > { %v5562_v36 = vpop.f32.mrf.mxu1 }
 0x3b9   : > { %v5888_v22 = vpop.f32.mrf.mxu0  ;;  %v12027_v33 = vadd.f32 %v8403_v19, %v5621_v53  ;;  %v5619_v27 = vadd.f32 %v5562_v36, %v11916_v3 }
 0x3ba   : > { %v8368_v21 = vpop.f32.mrf.mxu1 }
 0x3bb   : > { %v8406_v13 = vpop.f32.mrf.mxu0  ;;  %v12030_v9 = vadd.f32 %v5888_v22, %v5619_v27  ;;  %v5624_v56 = vadd.f32 %v8368_v21, %v11920_v5 }
 0x3bc   : > { %v5575_v18 = vpop.f32.mrf.mxu1 }
 0x3bd   : > { %v5901_v58 = vpop.f32.mrf.mxu0  ;;  %v12033_v6 = vadd.f32 %v8406_v13, %v5624_v56  ;;  %v5622_v32 = vadd.f32 %v5575_v18, %v11923_v30 }
 0x3be   : > { %v8369_v51 = vpop.f32.mrf.mxu1 }
 0x3bf   : > { %v8407_v47 = vpop.f32.mrf.mxu0  ;;  %v12036_v55 = vadd.f32 %v5901_v58, %v5622_v32  ;;  %v5625_v26 = vadd.f32 %v8369_v51, %v11926_v46 }
 0x3c0   : > { %v5578_v39 = vpop.f32.mrf.mxu1 }
 0x3c1   : > { %v5904_v3 = vpop.f32.mrf.mxu0  ;;  %v12039_v11 = vadd.f32 %v8407_v47, %v5625_v26  ;;  %v5623_v43 = vadd.f32 %v5578_v39, %v11930_v63 }
 0x3c2   : > { %v8412_v20 = vpop.f32.mrf.mxu1 }
 0x3c3   : > { %v12042_v5 = vpop.f32.mrf.mxu0  ;;  %v12044_v57 = vadd.f32 %v5904_v3, %v5623_v43  ;;  %v12047_v2 = vadd.f32 %v8412_v20, %v11934_v24 }
 0x3c4   : > { %v6099_v30 = vpop.f32.mrf.mxu1 }
 0x3c5   : > { %v12050_v16 = vadd.f32 %v6099_v30, %v11937_v62  ;;  %v12052_v34 = vpop.f32.mrf.mxu0 }
 0x3c6   : > { %v8413_v46 = vpop.f32.mrf.mxu1 }
 0x3c7   : > { %v12055_v15 = vadd.f32 %v8413_v46, %v11940_v0  ;;  %v12057_v63 = vpop.f32.mrf.mxu0 }
 0x3c8   : > { %v6102_v61 = vpop.f32.mrf.mxu1 }
 0x3c9   : > { %v12060_v59 = vadd.f32 %v6102_v61, %v11944_v38  ;;  %v12065_v36 = vpop.f32.mrf.mxu0 }
 0x3ca   : > { %v8416_v19 = vpop.f32.mrf.mxu1 }
 0x3cb   : > { %v12063_v24 = vadd.f32 %v8416_v19, %v11948_v25  ;;  %v12073_v21 = vpop.f32.mrf.mxu0 }
 0x3cc   : > { %v6115_v53 = vpop.f32.mrf.mxu1 }
 0x3cd   : > { %v12068_v62 = vadd.f32 %v6115_v53, %v11951_v29  ;;  %v12081_v18 = vpop.f32.mrf.mxu0 }
 0x3ce   : > { %v8417_v22 = vpop.f32.mrf.mxu1 }
 0x3cf   : > { %v12071_v0 = vadd.f32 %v8417_v22, %v11954_v17  ;;  %v12089_v51 = vpop.f32.mrf.mxu0 }
 0x3d0   : > { %v6118_v27 = vpop.f32.mrf.mxu1 }
 0x3d1   : > { %v12076_v38 = vadd.f32 %v6118_v27, %v11958_v52  ;;  %v12097_v39 = vpop.f32.mrf.mxu0 }
 0x3d2   : > { %v8420_v13 = vpop.f32.mrf.mxu1 }
 0x3d3   : > { %v12079_v25 = vadd.f32 %v8420_v13, %v11961_v37  ;;  %v12105_v20 = vpop.f32.mrf.mxu0 }
 0x3d4   : > { %v6131_v56 = vpop.f32.mrf.mxu1 }
 0x3d5   : > { %v12084_v29 = vadd.f32 %v6131_v56, %v11964_v7  ;;  %v12113_v61 = vpop.f32.mrf.mxu0 }
 0x3d6   : > { %v8421_v58 = vpop.f32.mrf.mxu1 }
 0x3d7   : > { %v12087_v17 = vadd.f32 %v8421_v58, %v11967_v10  ;;  %v12121_v22 = vpop.f32.mrf.mxu0 }
 0x3d8   : > { %v6134_v32 = vpop.f32.mrf.mxu1 }
 0x3d9   : > { %v12092_v52 = vadd.f32 %v6134_v32, %v11970_v50  ;;  %v12129_v56 = vpop.f32.mrf.mxu0 }
 0x3da   : > { %v8424_v47 = vpop.f32.mrf.mxu1 }
 0x3db   : > { %v12095_v37 = vadd.f32 %v8424_v47, %v11973_v40  ;;  %v12137_v47 = vpop.f32.mrf.mxu0 }
 0x3dc   : > { %v6147_v26 = vpop.f32.mrf.mxu1 }
 0x3dd   : > { %v12100_v7 = vadd.f32 %v6147_v26, %v11976_v45 }
 0x3de   : > { %v8425_v3 = vpop.f32.mrf.mxu1 }
 0x3df   : > { %v12103_v10 = vadd.f32 %v8425_v3, %v11979_v60 }
 0x3e0   : > { %v6150_v43 = vpop.f32.mrf.mxu1 }
 0x3e1   : > { %v12108_v50 = vadd.f32 %v6150_v43, %v11982_v54  ;;  %v12145_v43 = vpop.f32.mrf.mxu0 }
 0x3e2   : > { %v8428_v30 = vpop.f32.mrf.mxu1 }
 0x3e3   : > { %v12111_v40 = vadd.f32 %v8428_v30, %v11985_v1 }
 0x3e4   : > { %v6163_v46 = vpop.f32.mrf.mxu1 }
 0x3e5   : > { %v12116_v45 = vadd.f32 %v6163_v46, %v11988_v28 }
 0x3e6   : > { %v8429_v19 = vpop.f32.mrf.mxu1 }
 0x3e7   : > { %v12119_v60 = vadd.f32 %v8429_v19, %v11991_v8  ;;  %v12153_v19 = vpop.f32.mrf.mxu0 }
 0x3e8   : > { %v6166_v53 = vpop.f32.mrf.mxu1 }
 0x3e9   : > { %v12124_v54 = vadd.f32 %v6166_v53, %v11994_v31 }
 0x3ea   : > { %v8432_v27 = vpop.f32.mrf.mxu1 }
 0x3eb   : > { %v12127_v1 = vadd.f32 %v8432_v27, %v11997_v23 }
 0x3ec   : > { %v6179_v13 = vpop.f32.mrf.mxu1 }
 0x3ed   : > { %v12132_v28 = vadd.f32 %v6179_v13, %v12000_v4  ;;  %v12161_v13 = vpop.f32.mrf.mxu0 }
 0x3ee   : > { %v8433_v58 = vpop.f32.mrf.mxu1 }
 0x3ef   : > { %v12135_v8 = vadd.f32 %v8433_v58, %v12003_v14 }
 0x3f0   : > { %v6182_v32 = vpop.f32.mrf.mxu1 }
 0x3f1   : > { %v12140_v31 = vadd.f32 %v6182_v32, %v12006_v49 }
 0x3f2   : > { %v8436_v26 = vpop.f32.mrf.mxu1 }
 0x3f3   : > { %v12143_v23 = vadd.f32 %v8436_v26, %v12009_v35  ;;  %v12169_v26 = vpop.f32.mrf.mxu0 }
 0x3f4   : > { %v6195_v3 = vpop.f32.mrf.mxu1 }
 0x3f5   : > { %v12148_v4 = vadd.f32 %v6195_v3, %v12012_v41 }
 0x3f6   : > { %v8437_v30 = vpop.f32.mrf.mxu1 }
 0x3f7   : > { %v12151_v14 = vadd.f32 %v8437_v30, %v12015_v48 }
 0x3f8   : > { %v6198_v46 = vpop.f32.mrf.mxu1 }
 0x3f9   : > { %v12156_v49 = vadd.f32 %v6198_v46, %v12018_v44  ;;  %v12177_v46 = vpop.f32.mrf.mxu0 }
 0x3fa   : > { %v8440_v53 = vpop.f32.mrf.mxu1 }
 0x3fb   : > { %v12159_v35 = vadd.f32 %v8440_v53, %v12021_v42 }
 0x3fc   : > { %v6211_v27 = vpop.f32.mrf.mxu1 }
 0x3fd   : > { %v12164_v41 = vadd.f32 %v6211_v27, %v12024_v12 }
 0x3fe   : > { %v8441_v58 = vpop.f32.mrf.mxu1 }
 0x3ff   : > { %v12167_v48 = vadd.f32 %v8441_v58, %v12027_v33  ;;  %v12187_v58 = vpop.f32.mrf.mxu0 }
 0x400   : > { %v6214_v32 = vpop.f32.mrf.mxu1 }
 0x401   : > { %v12172_v44 = vadd.f32 %v6214_v32, %v12030_v9  ;;  %v6570_v9 = vadd.f32 %v12042_v5, %v12047_v2  ;;  %v12203_v5 = vld [vmem:[%s12441_s6] ss:$0 sm:$0xff] }
 0x402   : > { %v8444_v3 = vpop.f32.mrf.mxu1 }
 0x403   : > { %v12175_v42 = vadd.f32 %v8444_v3, %v12033_v6  ;;  %v12195_v3 = vld [vmem:[%s12440_s5] ss:$0 sm:$0xff] }
 0x404   : > { %v6227_v30 = vpop.f32.mrf.mxu1 }
 0x405   : > { %v12180_v12 = vadd.f32 %v6227_v30, %v12036_v55  ;;  %v6568_v55 = vadd.f32 %v12052_v34, %v12050_v16  ;;  %v12207_v30 = vpop.f32.mrf.mxu0  ;;  %v6569_v16 = vadd.f32 %v12065_v36, %v12060_v59 }
 0x406   : > { %v8445_v53 = vpop.f32.mrf.mxu1 }
 0x407   : > { %v12183_v33 = vadd.f32 %v8445_v53, %v12039_v11 }
 0x408   : > { %v6230_v27 = vpop.f32.mrf.mxu1 }
 0x409   : > { %13220 = vst [vmem:[#allocation35_spill] sm:$0xff] %v12183_v33  ;;  %v12190_v32 = vadd.f32 %v6230_v27, %v12044_v57  ;;  %v6571_v57 = vadd.f32 %v12057_v63, %v12055_v15  ;;  %v6574_v33 = vadd.f32 %v12073_v21, %v12063_v24  ;;  %v12221_v63 = vpop.f32.mrf.mxu0 }
 0x40a   : > { %v8488_v6 = vpop.f32.mrf.mxu1 }
 0x40b   : > { %13221 = vst [vmem:[#allocation29_spill] sm:$0xff] %v12190_v32  ;;  %v6896_v11 = vadd.f32 %v8488_v6, %v6570_v9 }
 0x40c   : > { %v6751_v2 = vpop.f32.mrf.mxu1 }
 0x40d   : > { %v6939_v53 = vmul.f32 %v12195_v3, %v6896_v11  ;;  %v6894_v27 = vadd.f32 %v6751_v2, %v6568_v55 }
 0x40e   : > { %v8489_v32 = vpop.f32.mrf.mxu1 }
 0x40f   : > { %v6982_v34 = vadd.f32 %v12203_v5, %v6939_v53  ;;  %v6937_v9 = vmul.f32 %v12195_v3, %v6894_v27  ;;  %v6897_v6 = vadd.f32 %v8489_v32, %v6571_v57  ;;  %v6572_v32 = vadd.f32 %v12081_v18, %v12068_v62 }
 0x410   : > { %v6754_v15 = vpop.f32.mrf.mxu1  ;;  %v6575_v27 = vadd.f32 %v12089_v51, %v12071_v0 }
 0x411   : > { %v7018_v55 = vmax.f32 %v6982_v34, 0.0  ;;  %v6980_v59 = vadd.f32 %v12203_v5, %v6937_v9  ;;  %v6940_v36 = vmul.f32 %v12195_v3, %v6897_v6  ;;  %v6895_v11 = vadd.f32 %v6754_v15, %v6569_v16  ;;  %v12233_v9 = vpop.f32.mrf.mxu0 }
 0x412   : > { %v8492_v24 = vpop.f32.mrf.mxu1  ;;  %v6573_v15 = vadd.f32 %v12097_v39, %v12076_v38 }
 0x413   : > { %7054 = vst.msk [vmem:[%s12219_s11 + $0x10] sm:$0xff] %vm13222_vm4, %v7018_v55  ;;  %v7016_v21 = vmax.f32 %v6980_v59, 0.0  ;;  %v6983_v2 = vadd.f32 %v12203_v5, %v6940_v36  ;;  %v6938_v57 = vmul.f32 %v12195_v3, %v6895_v11  ;;  %v6900_v53 = vadd.f32 %v8492_v24, %v6574_v33  ;;  %v12247_v24 = vpop.f32.mrf.mxu0  ;;  %vm13237_vm4 = vmmov %vm13111_vm0 }
 0x414   : > { %v6767_v34 = vpop.f32.mrf.mxu1  ;;  %v6578_v36 = vadd.f32 %v12105_v20, %v12079_v25 }
 0x415   : > { %7052 = vst.msk [vmem:[%s12219_s11] sm:$0xff] %vm13223_vm3, %v7016_v21  ;;  %v7019_v62 = vmax.f32 %v6983_v2, 0.0  ;;  %v6981_v18 = vadd.f32 %v12203_v5, %v6938_v57  ;;  %v6943_v16 = vmul.f32 %v12195_v3, %v6900_v53  ;;  %v6898_v6 = vadd.f32 %v6767_v34, %v6572_v32  ;;  %vm13238_vm3 = vmmov %vm13111_vm0 }
 0x416   : > { %v8493_v55 = vpop.f32.mrf.mxu1  ;;  %v6576_v2 = vadd.f32 %v12113_v61, %v12084_v29  ;;  %v6579_v34 = vadd.f32 %v12121_v22, %v12087_v17 }
 0x417   : > { %7055 = vst.msk [vmem:[%s12219_s11 + $0x18] sm:$0xff] %vm13224_vm7, %v7019_v62  ;;  %v7017_v0 = vmax.f32 %v6981_v18, 0.0  ;;  %v6986_v51 = vadd.f32 %v12203_v5, %v6943_v16  ;;  %v6941_v33 = vmul.f32 %v12195_v3, %v6898_v6  ;;  %v6901_v59 = vadd.f32 %v8493_v55, %v6575_v27  ;;  %v12261_v18 = vpop.f32.mrf.mxu0  ;;  %vm13239_vm7 = vmmov %vm13111_vm0 }
 0x418   : > { %v6770_v11 = vpop.f32.mrf.mxu1 }
 0x419   : > { %7053 = vst.msk [vmem:[%s12219_s11 + $0x8] sm:$0xff] %vm13225_vm13, %v7017_v0  ;;  %v7022_v38 = vmax.f32 %v6986_v51, 0.0  ;;  %v6984_v39 = vadd.f32 %v12203_v5, %v6941_v33  ;;  %v6944_v32 = vmul.f32 %v12195_v3, %v6901_v59  ;;  %v6899_v21 = vadd.f32 %v6770_v11, %v6573_v15  ;;  %vm13240_vm13 = vmmov %vm13111_vm0 }
 0x41a   : > { %v8496_v57 = vpop.f32.mrf.mxu1  ;;  %v6577_v15 = vadd.f32 %v12129_v56, %v12092_v52  ;;  %v6582_v33 = vadd.f32 %v12137_v47, %v12095_v37 }
 0x41b   : > { %7058 = vst.msk [vmem:[%s12219_s11 + $0x30] sm:$0xff] %vm13226_vm2, %v7022_v38  ;;  %v7020_v25 = vmax.f32 %v6984_v39, 0.0  ;;  %v6987_v20 = vadd.f32 %v12203_v5, %v6944_v32  ;;  %v6942_v53 = vmul.f32 %v12195_v3, %v6899_v21  ;;  %v6904_v27 = vadd.f32 %v8496_v57, %v6578_v36  ;;  %v12275_v36 = vpop.f32.mrf.mxu0  ;;  %vm13241_vm2 = vmmov %vm13111_vm0 }
 0x41c   : > { %v6783_v62 = vpop.f32.mrf.mxu1  ;;  %v6580_v39 = vadd.f32 %v12145_v43, %v12100_v7  ;;  %v6583_v57 = vadd.f32 %v12153_v19, %v12103_v10 }
 0x41d   : > { %7056 = vst.msk [vmem:[%s12219_s11 + $0x20] sm:$0xff] %vm13227_vm8, %v7020_v25  ;;  %v7023_v29 = vmax.f32 %v6987_v20, 0.0  ;;  %v6985_v61 = vadd.f32 %v12203_v5, %v6942_v53  ;;  %v6947_v16 = vmul.f32 %v12195_v3, %v6904_v27  ;;  %v6902_v6 = vadd.f32 %v6783_v62, %v6576_v2  ;;  %v12289_v20 = vpop.f32.mrf.mxu0  ;;  %vm13242_vm8 = vmmov %vm13111_vm0 }
 0x41e   : > { %v8497_v55 = vpop.f32.mrf.mxu1 }
 0x41f   : > { %7059 = vst.msk [vmem:[%s12219_s11 + $0x38] sm:$0xff] %vm13228_vm14, %v7023_v29  ;;  %v7021_v17 = vmax.f32 %v6985_v61, 0.0  ;;  %v6990_v22 = vadd.f32 %v12203_v5, %v6947_v16  ;;  %v6945_v0 = vmul.f32 %v12195_v3, %v6902_v6  ;;  %v6905_v51 = vadd.f32 %v8497_v55, %v6579_v34  ;;  %vm13243_vm14 = vmmov %vm13111_vm0 }
 0x420   : > { %v6786_v59 = vpop.f32.mrf.mxu1  ;;  %v6581_v34 = vadd.f32 %v12161_v13, %v12108_v50  ;;  %v6586_v16 = vadd.f32 %v12169_v26, %v12111_v40 }
 0x421   : > { %7057 = vst.msk [vmem:[%s12219_s11 + $0x28] sm:$0xff] %vm13229_vm6, %v7021_v17  ;;  %v7026_v52 = vmax.f32 %v6990_v22, 0.0  ;;  %v6988_v56 = vadd.f32 %v12203_v5, %v6945_v0  ;;  %v6948_v11 = vmul.f32 %v12195_v3, %v6905_v51  ;;  %v6903_v38 = vadd.f32 %v6786_v59, %v6577_v15  ;;  %v12303_v15 = vpop.f32.mrf.mxu0  ;;  %vm13244_vm6 = vmmov %vm13111_vm0 }
 0x422   : > { %v8500_v32 = vpop.f32.mrf.mxu1  ;;  %v6584_v22 = vadd.f32 %v12177_v46, %v12116_v45  ;;  %v6587_v59 = vadd.f32 %v12187_v58, %v12119_v60 }
 0x423   : > { %7062 = vst.msk [vmem:[%s12219_s11 + $0x50] sm:$0xff] %vm13230_vm11, %v7026_v52  ;;  %v7024_v37 = vmax.f32 %v6988_v56, 0.0  ;;  %v6991_v47 = vadd.f32 %v12203_v5, %v6948_v11  ;;  %v6946_v21 = vmul.f32 %v12195_v3, %v6903_v38  ;;  %v6908_v2 = vadd.f32 %v8500_v32, %v6582_v33  ;;  %v12317_v56 = vpop.f32.mrf.mxu0  ;;  %vm13245_vm11 = vmmov %vm13111_vm0 }
 0x424   : > { %v6799_v25 = vpop.f32.mrf.mxu1 }
 0x425   : > { %7060 = vst.msk [vmem:[%s12219_s11 + $0x40] sm:$0xff] %vm13231_vm10, %v7024_v37  ;;  %v7027_v7 = vmax.f32 %v6991_v47, 0.0  ;;  %v6989_v43 = vadd.f32 %v12203_v5, %v6946_v21  ;;  %v6951_v53 = vmul.f32 %v12195_v3, %v6908_v2  ;;  %v6906_v27 = vadd.f32 %v6799_v25, %v6580_v39  ;;  %vm13246_vm10 = vmmov %vm13111_vm0 }
 0x426   : > { %v8501_v62 = vpop.f32.mrf.mxu1  ;;  %v6585_v39 = vadd.f32 %v12207_v30, %v12124_v54  ;;  %v6590_v21 = vadd.f32 %v12221_v63, %v12127_v1 }
 0x427   : > { %7063 = vst.msk [vmem:[%s12219_s11 + $0x58] sm:$0xff] %vm13232_vm12, %v7027_v7  ;;  %v7025_v10 = vmax.f32 %v6989_v43, 0.0  ;;  %v6994_v19 = vadd.f32 %v12203_v5, %v6951_v53  ;;  %v6949_v29 = vmul.f32 %v12195_v3, %v6906_v27  ;;  %v6909_v61 = vadd.f32 %v8501_v62, %v6583_v57  ;;  %v8478_v57 = vpop.f32.mrf.mxu0  ;;  %vm13247_vm12 = vmmov %vm13111_vm0 }
 0x428   : > { %v6802_v6 = vpop.f32.mrf.mxu1  ;;  %v6588_v43 = vadd.f32 %v12233_v9, %v12132_v28  ;;  %v6591_v62 = vadd.f32 %v12247_v24, %v12135_v8 }
 0x429   : > { %7061 = vst.msk [vmem:[%s12219_s11 + $0x48] sm:$0xff] %vm13233_vm15, %v7025_v10  ;;  %v7030_v50 = vmax.f32 %v6994_v19, 0.0  ;;  %v6992_v13 = vadd.f32 %v12203_v5, %v6949_v29  ;;  %v6952_v55 = vmul.f32 %v12195_v3, %v6909_v61  ;;  %v6907_v17 = vadd.f32 %v6802_v6, %v6581_v34  ;;  %v6537_v19 = vpop.f32.mrf.mxu0  ;;  %vm13248_vm15 = vmmov %vm13111_vm0 }
 0x42a   : > { %v8504_v0 = vpop.f32.mrf.mxu1 }
 0x42b   : > { %7066 = vst.msk [vmem:[%s12219_s11 + $0x70] sm:$0xff] %vm13111_vm0, %v7030_v50  ;;  %v7028_v40 = vmax.f32 %v6992_v13, 0.0  ;;  %v6995_v26 = vadd.f32 %v12203_v5, %v6952_v55  ;;  %v6950_v51 = vmul.f32 %v12195_v3, %v6907_v17  ;;  %v6912_v33 = vadd.f32 %v8504_v0, %v6586_v16 }
 0x42c   : > { %v6815_v52 = vpop.f32.mrf.mxu1  ;;  %v6589_v16 = vadd.f32 %v12261_v18, %v12140_v31  ;;  %v6594_v55 = vadd.f32 %v12275_v36, %v12143_v23 }
 0x42d   : > { %7064 = vst.msk [vmem:[%s12219_s11 + $0x60] sm:$0xff] %vm13234_vm5, %v7028_v40  ;;  %v7031_v45 = vmax.f32 %v6995_v26, 0.0  ;;  %v6993_v46 = vadd.f32 %v12203_v5, %v6950_v51  ;;  %v6955_v11 = vmul.f32 %v12195_v3, %v6912_v33  ;;  %v6910_v38 = vadd.f32 %v6815_v52, %v6584_v22  ;;  %v8479_v22 = vpop.f32.mrf.mxu0  ;;  %vm13250_vm5 = vmmov %vm13111_vm0 }
 0x42e   : > { %v8505_v32 = vpop.f32.mrf.mxu1  ;;  %v6592_v26 = vadd.f32 %v12289_v20, %v12148_v4  ;;  %v6595_v52 = vadd.f32 %v12303_v15, %v12151_v14 }
 0x42f   : > { %7067 = vst.msk [vmem:[%s12219_s11 + $0x78] sm:$0xff] %vm13235_vm9, %v7031_v45  ;;  %v7029_v60 = vmax.f32 %v6993_v46, 0.0  ;;  %v6998_v58 = vadd.f32 %v12203_v5, %v6955_v11  ;;  %v6953_v37 = vmul.f32 %v12195_v3, %v6910_v38  ;;  %v6913_v47 = vadd.f32 %v8505_v32, %v6587_v59  ;;  %v6540_v46 = vpop.f32.mrf.mxu0  ;;  %vm13252_vm9 = vmmov %vm13111_vm0 }
 0x430   : > { %v6818_v2 = vpop.f32.mrf.mxu1 }
 0x431   : > { %7065 = vst.msk [vmem:[%s12219_s11 + $0x68] sm:$0xff] %vm13236_vm1, %v7029_v60  ;;  %v7034_v25 = vmax.f32 %v6998_v58, 0.0  ;;  %v6996_v54 = vadd.f32 %v12203_v5, %v6953_v37  ;;  %v6956_v30 = vmul.f32 %v12195_v3, %v6913_v47  ;;  %v6911_v7 = vadd.f32 %v6818_v2, %v6585_v39  ;;  %v8482_v60 = vpop.f32.mrf.mxu0  ;;  %vm13253_vm1 = vmmov %vm13111_vm0 }
 0x432   : > { %v8508_v53 = vpop.f32.mrf.mxu1  ;;  %v6593_v39 = vadd.f32 %v12317_v56, %v12156_v49  ;;  %v6598_v47 = vadd.f32 %v8478_v57, %v12159_v35 }
 0x433   : > { %7070 = vst.msk [vmem:[%s12219_s11 + $0x90] sm:$0xff] %vm13237_vm4, %v7034_v25  ;;  %v7032_v27 = vmax.f32 %v6996_v54, 0.0  ;;  %v6999_v1 = vadd.f32 %v12203_v5, %v6956_v30  ;;  %v6954_v63 = vmul.f32 %v12195_v3, %v6911_v7  ;;  %v6916_v34 = vadd.f32 %v8508_v53, %v6590_v21  ;;  %v6553_v7 = vpop.f32.mrf.mxu0  ;;  %vm13254_vm4 = vmmov %vm13111_vm0 }
 0x434   : > { %v6831_v10 = vpop.f32.mrf.mxu1  ;;  %v6596_v54 = vadd.f32 %v6537_v19, %v12164_v41 }
 0x435   : > { %7068 = vst.msk [vmem:[%s12219_s11 + $0x80] sm:$0xff] %vm13238_vm3, %v7032_v27  ;;  %v7035_v29 = vmax.f32 %v6999_v1, 0.0  ;;  %v6997_v28 = vadd.f32 %v12203_v5, %v6954_v63  ;;  %v6959_v9 = vmul.f32 %v12195_v3, %v6916_v34  ;;  %v6914_v61 = vadd.f32 %v6831_v10, %v6588_v43  ;;  %vm13255_vm3 = vmmov %vm13111_vm0 }
 0x436   : > { %v8509_v6 = vpop.f32.mrf.mxu1  ;;  %v6599_v27 = vadd.f32 %v8479_v22, %v12167_v48  ;;  %v6597_v10 = vadd.f32 %v6540_v46, %v12172_v44 }
 0x437   : > { %7071 = vst.msk [vmem:[%s12219_s11 + $0x98] sm:$0xff] %vm13239_vm7, %v7035_v29  ;;  %v7033_v50 = vmax.f32 %v6997_v28, 0.0  ;;  %v7002_v8 = vadd.f32 %v12203_v5, %v6959_v9  ;;  %v6957_v24 = vmul.f32 %v12195_v3, %v6914_v61  ;;  %v6917_v13 = vadd.f32 %v8509_v6, %v6591_v62  ;;  %v8483_v29 = vpop.f32.mrf.mxu0  ;;  %vm13256_vm7 = vmmov %vm13111_vm0 }
 0x438   : > { %v6834_v17 = vpop.f32.mrf.mxu1 }
 0x439   : > { %7069 = vst.msk [vmem:[%s12219_s11 + $0x88] sm:$0xff] %vm13240_vm13, %v7033_v50  ;;  %v7038_v0 = vmax.f32 %v7002_v8, 0.0  ;;  %v7000_v31 = vadd.f32 %v12203_v5, %v6957_v24  ;;  %v6960_v18 = vmul.f32 %v12195_v3, %v6917_v13  ;;  %v6915_v40 = vadd.f32 %v6834_v17, %v6589_v16  ;;  %v6556_v17 = vpop.f32.mrf.mxu0  ;;  %vm13257_vm13 = vmmov %vm13111_vm0 }
 0x43a   : > { %v8512_v51 = vpop.f32.mrf.mxu1  ;;  %v6602_v16 = vadd.f32 %v8482_v60, %v12175_v42  ;;  %v6600_v13 = vadd.f32 %v6553_v7, %v12180_v12 }
 0x43b   : > { %7074 = vst.msk [vmem:[%s12219_s11 + $0xb0] sm:$0xff] %vm13241_vm2, %v7038_v0  ;;  %v7036_v33 = vmax.f32 %v7000_v31, 0.0  ;;  %v7003_v23 = vadd.f32 %v12203_v5, %v6960_v18  ;;  %v6958_v36 = vmul.f32 %v12195_v3, %v6915_v40  ;;  %v6920_v59 = vadd.f32 %v8512_v51, %v6594_v55  ;;  %v13249_v18 = vld [vmem:[#allocation35_spill] sm:$0xff] }
 0x43c   : > { %v6847_v45 = vpop.f32.mrf.mxu1  ;;  %v6603_v40 = vadd.f32 %v8483_v29, %v13249_v18 }
 0x43d   : > { %7072 = vst.msk [vmem:[%s12219_s11 + $0xa0] sm:$0xff] %vm13242_vm8, %v7036_v33  ;;  %v7039_v11 = vmax.f32 %v7003_v23, 0.0  ;;  %v7001_v4 = vadd.f32 %v12203_v5, %v6958_v36  ;;  %v6963_v20 = vmul.f32 %v12195_v3, %v6920_v59  ;;  %v6918_v38 = vadd.f32 %v6847_v45, %v6592_v26  ;;  %v13251_v36 = vld [vmem:[#allocation29_spill] sm:$0xff] }
 0x43e   : > { %v8513_v32 = vpop.f32.mrf.mxu1  ;;  %v6601_v59 = vadd.f32 %v6556_v17, %v13251_v36 }
 0x43f   : > { %7075 = vst.msk [vmem:[%s12219_s11 + $0xb8] sm:$0xff] %vm13243_vm14, %v7039_v11  ;;  %v7037_v14 = vmax.f32 %v7001_v4, 0.0  ;;  %v7006_v15 = vadd.f32 %v12203_v5, %v6963_v20  ;;  %v6961_v58 = vmul.f32 %v12195_v3, %v6918_v38  ;;  %v6921_v37 = vadd.f32 %v8513_v32, %v6595_v52 }
 0x440   : > { %v6850_v21 = vpop.f32.mrf.mxu1 }
 0x441   : > { %7073 = vst.msk [vmem:[%s12219_s11 + $0xa8] sm:$0xff] %vm13244_vm6, %v7037_v14  ;;  %v7042_v2 = vmax.f32 %v7006_v15, 0.0  ;;  %v7004_v49 = vadd.f32 %v12203_v5, %v6961_v58  ;;  %v6964_v56 = vmul.f32 %v12195_v3, %v6921_v37  ;;  %v6919_v25 = vadd.f32 %v6850_v21, %v6593_v39 }
 0x442   : > { %v8516_v30 = vpop.f32.mrf.mxu1 }
 0x443   : > { %7078 = vst.msk [vmem:[%s12219_s11 + $0xd0] sm:$0xff] %vm13245_vm11, %v7042_v2  ;;  %v7040_v43 = vmax.f32 %v7004_v49, 0.0  ;;  %v7007_v35 = vadd.f32 %v12203_v5, %v6964_v56  ;;  %v6962_v57 = vmul.f32 %v12195_v3, %v6919_v25  ;;  %v6924_v53 = vadd.f32 %v8516_v30, %v6598_v47 }
 0x444   : > { %v6863_v1 = vpop.f32.mrf.mxu1 }
 0x445   : > { %7076 = vst.msk [vmem:[%s12219_s11 + $0xc0] sm:$0xff] %vm13246_vm10, %v7040_v43  ;;  %v7043_v63 = vmax.f32 %v7007_v35, 0.0  ;;  %v7005_v41 = vadd.f32 %v12203_v5, %v6962_v57  ;;  %v6967_v34 = vmul.f32 %v12195_v3, %v6924_v53  ;;  %v6922_v62 = vadd.f32 %v6863_v1, %v6596_v54 }
 0x446   : > { %v8517_v19 = vpop.f32.mrf.mxu1 }
 0x447   : > { %7079 = vst.msk [vmem:[%s12219_s11 + $0xd8] sm:$0xff] %vm13247_vm12, %v7043_v63  ;;  %v7041_v28 = vmax.f32 %v7005_v41, 0.0  ;;  %v7010_v48 = vadd.f32 %v12203_v5, %v6967_v34  ;;  %v6965_v9 = vmul.f32 %v12195_v3, %v6922_v62  ;;  %v6925_v61 = vadd.f32 %v8517_v19, %v6599_v27 }
 0x448   : > { %v6866_v6 = vpop.f32.mrf.mxu1 }
 0x449   : > { %7077 = vst.msk [vmem:[%s12219_s11 + $0xc8] sm:$0xff] %vm13248_vm15, %v7041_v28  ;;  %v7046_v50 = vmax.f32 %v7010_v48, 0.0  ;;  %v7008_v44 = vadd.f32 %v12203_v5, %v6965_v9  ;;  %v6968_v8 = vmul.f32 %v12195_v3, %v6925_v61  ;;  %v6923_v24 = vadd.f32 %v6866_v6, %v6597_v10 }
 0x44a   : > { %v8520_v55 = vpop.f32.mrf.mxu1 }
 0x44b   : > { %7082 = vst.msk [vmem:[%s12219_s11 + $0xf0] sm:$0xff] %vm13111_vm0, %v7046_v50  ;;  %v7044_v22 = vmax.f32 %v7008_v44, 0.0  ;;  %v7011_v42 = vadd.f32 %v12203_v5, %v6968_v8  ;;  %v6966_v0 = vmul.f32 %v12195_v3, %v6923_v24  ;;  %v6928_v31 = vadd.f32 %v8520_v55, %v6602_v16 }
 0x44c   : > { %v6879_v26 = vpop.f32.mrf.mxu1 }
 0x44d   : > { %7080 = vst.msk [vmem:[%s12219_s11 + $0xe0] sm:$0xff] %vm13250_vm5, %v7044_v22  ;;  %v7047_v51 = vmax.f32 %v7011_v42, 0.0  ;;  %v7009_v12 = vadd.f32 %v12203_v5, %v6966_v0  ;;  %v6971_v33 = vmul.f32 %v12195_v3, %v6928_v31  ;;  %v6926_v23 = vadd.f32 %v6879_v26, %v6600_v13 }
 0x44e   : > { %v8521_v52 = vpop.f32.mrf.mxu1 }
 0x44f   : > { %7083 = vst.msk [vmem:[%s12219_s11 + $0xf8] sm:$0xff] %vm13252_vm9, %v7047_v51  ;;  %v7045_v45 = vmax.f32 %v7009_v12, 0.0  ;;  %v7014_v46 = vadd.f32 %v12203_v5, %v6971_v33  ;;  %v6969_v11 = vmul.f32 %v12195_v3, %v6926_v23  ;;  %v6929_v4 = vadd.f32 %v8521_v52, %v6603_v40 }
 0x450   : > { %v6882_v20 = vpop.f32.mrf.mxu1 }
 0x451   : > { %7081 = vst.msk [vmem:[%s12219_s11 + $0xe8] sm:$0xff] %vm13253_vm1, %v7045_v45  ;;  %v7050_v38 = vmax.f32 %v7014_v46, 0.0  ;;  %v7012_v39 = vadd.f32 %v12203_v5, %v6969_v11  ;;  %v6972_v32 = vmul.f32 %v12195_v3, %v6929_v4  ;;  %v6927_v60 = vadd.f32 %v6882_v20, %v6601_v59 }
 0x453   : > { %7086 = vst.msk [vmem:[%s12219_s11 + $0x110] sm:$0xff] %vm13254_vm4, %v7050_v38  ;;  %v7048_v14 = vmax.f32 %v7012_v39, 0.0  ;;  %v7015_v15 = vadd.f32 %v12203_v5, %v6972_v32  ;;  %v6970_v58 = vmul.f32 %v12195_v3, %v6927_v60 }
 0x455   : > { %7084 = vst.msk [vmem:[%s12219_s11 + $0x100] sm:$0xff] %vm13255_vm3, %v7048_v14  ;;  %v7051_v37 = vmax.f32 %v7015_v15, 0.0  ;;  %v7013_v47 = vadd.f32 %v12203_v5, %v6970_v58 }
 0x457   : > { %7087 = vst.msk [vmem:[%s12219_s11 + $0x118] sm:$0xff] %vm13256_vm7, %v7051_v37  ;;  %v7049_v21 = vmax.f32 %v7013_v47, 0.0 }
 0x459   : > { %7085 = vst.msk [vmem:[%s12219_s11 + $0x108] sm:$0xff] %vm13257_vm13, %v7049_v21 }
 0x45a PF: > { %s17_s24 = sadd.s32 1, %s8629_s24  }
 0x45b   : > { %p14_p4 = scmp.ge.s32.totalorder %s17_s24, 4  }
 0x45d   :  { %16 = sbr.rel (!%p14_p4) target bundleno = 1 (0x1), region = 94 }

</bundles_post_ra>
